<compile_context>
chip_gen: v7x
topology: tpu7x:2x2x1
jax: 0.10.0
libtpu: 0.0.40
codegen_flags: <defaults>
</compile_context>

<pallas_src>
import functools

import jax
import jax.numpy as jnp
from jax.experimental import pallas as pl
from jax.experimental.pallas import tpu as pltpu

_LPAD = 8   # left halo width: keeps interior scratch stores sublane(8)-aligned
_RPAD = 8   # right halo width: keeps the right zero-strip store aligned


def _zero_halo(pad_ref, hh, ww):
    """Zero only the halo strips of a (hh+2, _LPAD+ww+_RPAD, c) scratch.

    The interior is fully overwritten every grid step, so no full-tile zeroing
    (this removes two whole-scratch zero stores per step).  Strips are
    re-zeroed every step (cheap) so each core's private scratch stays valid.
    """
    wp, c = pad_ref.shape[1], pad_ref.shape[2]
    dt = pad_ref.dtype
    pad_ref[0:1, :, :] = jnp.zeros((1, wp, c), dt)                       # top row
    pad_ref[hh + 1:hh + 2, :, :] = jnp.zeros((1, wp, c), dt)             # bottom row
    pad_ref[1:hh + 1, 0:_LPAD, :] = jnp.zeros((hh, _LPAD, c), dt)        # left strip
    pad_ref[1:hh + 1, _LPAD + ww:wp, :] = jnp.zeros((hh, wp - _LPAD - ww, c), dt)


def _conv3x3(pad_ref, w_ref, ho, wo, stride):
    """3x3 conv as ONE MXU matmul with K = 9*cin.

    pad_ref: (hh+2, _LPAD+ww+_RPAD, cin) zero-haloed f32 scratch.
    w_ref:   (9*cin, cout), rows ordered (kh, kw, cin), BN scale pre-folded.
    Builds the im2col slab (lane-concat of the 9 taps), casts it to the weight
    dtype (bf16) and issues a single jnp.dot with f32 accumulation.
    """
    cin = pad_ref.shape[-1]
    taps = []
    for kh in range(3):
        for kw in range(3):
            c0 = _LPAD - 1 + kw
            if stride == 1:
                taps.append(pad_ref[kh:kh + ho, c0:c0 + wo, :])
            else:
                taps.append(pad_ref[pl.ds(kh, ho, stride), pl.ds(c0, wo, stride), :])
    slab = jnp.concatenate(taps, axis=-1).reshape(ho * wo, 9 * cin)
    return jnp.dot(slab.astype(w_ref.dtype), w_ref[...],
                   preferred_element_type=jnp.float32)


def _basic_block_kernel(x_ref, w1_ref, b1_ref, w2_ref, b2_ref, *rest,
                        stride, ho, wo, has_proj):
    """Fused BasicBlock for one image (grid iterates over the batch)."""
    if has_proj:
        wsc_ref, bsc_ref, out_ref, xpad_ref, mpad_ref = rest
    else:
        out_ref, xpad_ref, mpad_ref = rest

    h, w, cin = x_ref.shape
    cout = b2_ref.shape[-1]

    # conv1 input: zero halo strips, copy the image at a sublane-aligned offset.
    _zero_halo(xpad_ref, h, w)
    xpad_ref[1:h + 1, _LPAD:_LPAD + w, :] = x_ref[...].astype(xpad_ref.dtype)

    # conv1 (BN1 scale folded into w1) + bias + relu.
    acc1 = _conv3x3(xpad_ref, w1_ref, ho, wo, stride)
    mid = jnp.maximum(acc1 + b1_ref[...], 0.0)

    # conv2 input scratch.
    _zero_halo(mpad_ref, ho, wo)
    mpad_ref[1:ho + 1, _LPAD:_LPAD + wo, :] = (
        mid.reshape(ho, wo, cout).astype(mpad_ref.dtype))

    # conv2 (BN2 scale folded into w2) + bias.
    out = _conv3x3(mpad_ref, w2_ref, ho, wo, 1) + b2_ref[...]

    # shortcut: identity, or strided 1x1 projection with folded BN.
    if has_proj:
        if stride == 1:
            xs = xpad_ref[1:ho + 1, _LPAD:_LPAD + wo, :]
        else:
            xs = xpad_ref[pl.ds(1, ho, stride), pl.ds(_LPAD, wo, stride), :]
        sc = jnp.dot(xs.reshape(ho * wo, cin).astype(wsc_ref.dtype), wsc_ref[...],
                     preferred_element_type=jnp.float32) + bsc_ref[...]
    else:
        sc = x_ref[...].astype(jnp.float32).reshape(ho * wo, cout)

    # residual add + final relu.
    res = jnp.maximum(out + sc, 0.0)
    # TODO(synk): for planes < 128 a lane-dense writeback (folding wo into the
    # lane axis) would avoid masked vst.msk stores; it needs the
    # (ho*wo, cout) -> (ho, wo*cout) in-kernel relayout, left out for safety.
    out_ref[...] = res.reshape(ho, wo, cout).astype(out_ref.dtype)


def _const_spec(shape):
    """Resident (constant-index) parameter, single-buffered to halve its VMEM."""
    nd = len(shape)
    return pl.BlockSpec(shape, lambda b: (0,) * nd, pipeline_mode=pl.Buffered(1))


def _vmem_limit_bytes():
    # v5e/v6e have 128 MiB VMEM, v7x only 64 MiB: derive the scoped-VMEM cap
    # from the actual part instead of a flat 32 MiB.
    try:
        cap = int(pltpu.get_tpu_info().vmem_capacity_bytes)
    except Exception:
        cap = 64 * 1024 * 1024
    return min(cap * 3 // 4, 96 * 1024 * 1024)


def basic_block_forward(x_nchw, params, in_planes, planes, stride,
                        *, mxu_dtype=jnp.bfloat16):
    """out = relu(bn2(conv2(relu(bn1(conv1(x))))) + shortcut(x)) as ONE fused kernel.

    Inference-mode BN (scale pre-folded into the conv weights at init).  MXU
    operands are `mxu_dtype` (bf16 by default); accumulation, bias, ReLU and
    the residual add stay f32, and the output keeps the input dtype.
    """
    orig_dtype = x_nchw.dtype
    x = jnp.transpose(x_nchw, (0, 2, 3, 1)).astype(mxu_dtype)   # NCHW -> NHWC, bf16 DMA
    n, h, w, cin = x.shape
    assert cin == in_planes
    # PyTorch 3x3 / pad=1 output size: (h - 1)//stride + 1 (correct for odd sizes).
    ho = (h - 1) // stride + 1
    wo = (w - 1) // stride + 1
    has_proj = (stride != 1) or (in_planes != planes)

    kernel = functools.partial(_basic_block_kernel, stride=stride, ho=ho, wo=wo,
                               has_proj=has_proj)

    inputs = [x, params["w1"], params["b1"], params["w2"], params["b2"]]
    in_specs = [
        pl.BlockSpec((None, h, w, cin), lambda b: (b, 0, 0, 0)),   # per-image tile
        _const_spec((9 * cin, planes)),
        _const_spec((1, planes)),
        _const_spec((9 * planes, planes)),
        _const_spec((1, planes)),
    ]
    if has_proj:
        inputs += [params["wsc"], params["bsc"]]
        in_specs += [_const_spec((cin, planes)), _const_spec((1, planes))]

    flops = 2 * n * ho * wo * 9 * (cin + planes) * planes
    if has_proj:
        flops += 2 * n * ho * wo * cin * planes
    bytes_accessed = int(
        x.size * x.dtype.itemsize
        + n * ho * wo * planes * jnp.dtype(orig_dtype).itemsize
        + sum(int(p.size) * p.dtype.itemsize for p in inputs[1:]))

    out_nhwc = pl.pallas_call(
        kernel,
        out_shape=jax.ShapeDtypeStruct((n, ho, wo, planes), orig_dtype),
        grid=(n,),
        in_specs=in_specs,
        out_specs=pl.BlockSpec((None, ho, wo, planes), lambda b: (b, 0, 0, 0)),
        scratch_shapes=[
            # f32 scratches keep every halo store / strided tap read on the
            # best-supported relayout path.
            # TODO(synk): switch these to bf16 to halve VMEM-internal traffic.
            pltpu.VMEM((h + 2, _LPAD + w + _RPAD, cin), jnp.float32),
            pltpu.VMEM((ho + 2, _LPAD + wo + _RPAD, planes), jnp.float32),
        ],
        compiler_params=pltpu.CompilerParams(
            dimension_semantics=("parallel",),          # shard batch across TCs
            vmem_limit_bytes=_vmem_limit_bytes(),
        ),
        cost_estimate=pl.CostEstimate(flops=int(flops), transcendentals=0,
                                      bytes_accessed=bytes_accessed),
    )(*inputs)
    # TODO(synk): for spatial sizes whose per-image working set exceeds VMEM
    # (stem / layer1 at high resolution), add an output-row grid axis with a
    # 2-row input halo instead of whole-image blocks.
    return jnp.transpose(out_nhwc, (0, 3, 1, 2))                  # NHWC -> NCHW


# ----------------------------- init + reference ------------------------------

def _fold_bn(kg, kb, km, kv, c, eps=1e-5):
    """Random inference-mode BN params, folded to per-channel (scale, bias)."""
    gamma = 1.0 + 0.1 * jax.random.normal(kg, (c,), jnp.float32)
    beta = 0.1 * jax.random.normal(kb, (c,), jnp.float32)
    running_mean = 0.1 * jax.random.normal(km, (c,), jnp.float32)
    running_var = jnp.abs(jax.random.normal(kv, (c,), jnp.float32)) + 0.5
    scale = gamma * jax.lax.rsqrt(running_var + eps)
    bias = beta - running_mean * scale
    return scale, bias


def _pack_3x3(w_oihw, scale, mxu_dtype):
    """PyTorch (out,in,3,3) conv weight -> (9*in, out), rows ordered (kh,kw,in),
    with the BN scale folded over the out axis (zero-cost at init)."""
    cout, cin = w_oihw.shape[0], w_oihw.shape[1]
    w = jnp.transpose(w_oihw, (2, 3, 1, 0)).reshape(9 * cin, cout)
    return (w * scale[None, :]).astype(mxu_dtype)


def init_basic_block(key, in_planes, planes, stride, *, mxu_dtype=jnp.bfloat16):
    """Returns (kernel params, raw f32 params for the pure-JAX reference)."""
    ks = jax.random.split(key, 15)
    raw = {}
    raw["w1"] = 0.1 * jax.random.normal(ks[0], (planes, in_planes, 3, 3), jnp.float32)
    raw["s1"], raw["b1"] = _fold_bn(ks[1], ks[2], ks[3], ks[4], planes)
    raw["w2"] = 0.1 * jax.random.normal(ks[5], (planes, planes, 3, 3), jnp.float32)
    raw["s2"], raw["b2"] = _fold_bn(ks[6], ks[7], ks[8], ks[9], planes)
    if stride != 1 or in_planes != planes:
        raw["wsc"] = 0.1 * jax.random.normal(ks[10], (planes, in_planes, 1, 1),
                                             jnp.float32)
        raw["ssc"], raw["bsc"] = _fold_bn(ks[11], ks[12], ks[13], ks[14], planes)

    params = {
        "w1": _pack_3x3(raw["w1"], raw["s1"], mxu_dtype),
        "b1": raw["b1"].reshape(1, planes),
        "w2": _pack_3x3(raw["w2"], raw["s2"], mxu_dtype),
        "b2": raw["b2"].reshape(1, planes),
    }
    if "wsc" in raw:
        wsc = jnp.transpose(raw["wsc"], (2, 3, 1, 0)).reshape(in_planes, planes)
        params["wsc"] = (wsc * raw["ssc"][None, :]).astype(mxu_dtype)
        params["bsc"] = raw["bsc"].reshape(1, planes)
    return params, raw


def basic_block_reference(x_nchw, raw, stride):
    """Pure-JAX f32 reference of the PyTorch BasicBlock (inference-mode BN)."""
    dn = ("NCHW", "OIHW", "NCHW")
    hi = jax.lax.Precision.HIGHEST

    def conv(x, w, s, p):
        return jax.lax.conv_general_dilated(x, w, (s, s), [(p, p), (p, p)],
                                            dimension_numbers=dn, precision=hi)

    def bn(y, scale, bias):
        return y * scale[None, :, None, None] + bias[None, :, None, None]

    out = jax.nn.relu(bn(conv(x_nchw, raw["w1"], stride, 1), raw["s1"], raw["b1"]))
    out = bn(conv(out, raw["w2"], 1, 1), raw["s2"], raw["b2"])
    if "wsc" in raw:
        sc = bn(conv(x_nchw, raw["wsc"], stride, 0), raw["ssc"], raw["bsc"])
    else:
        sc = x_nchw
    return jax.nn.relu(out + sc)


if __name__ == "__main__":
    key = jax.random.PRNGKey(0)
    kx, kpa, kpb = jax.random.split(key, 3)
    x = jax.random.normal(kx, (2, 4, 16, 16), jnp.float32)   # NCHW, like PyTorch

    # Block A: identity shortcut (in_planes == planes, stride == 1).
    params_a, raw_a = init_basic_block(kpa, in_planes=4, planes=4, stride=1)
    y_a = basic_block_forward(x, params_a, in_planes=4, planes=4, stride=1)

    # Block B: projection shortcut (stride=2, channel expansion 4 -> 8).
    params_b, raw_b = init_basic_block(kpb, in_planes=4, planes=8, stride=2)
    y_b = basic_block_forward(x, params_b, in_planes=4, planes=8, stride=2)

    jax.block_until_ready((y_a, y_b))
    assert y_a.shape == (2, 4, 16, 16) and y_a.dtype == jnp.float32
    assert y_b.shape == (2, 8, 8, 8) and y_b.dtype == jnp.float32
    assert bool(jnp.all(y_a >= 0)) and bool(jnp.all(y_b >= 0))   # final ReLU

    # Numerical check vs. a pure-JAX f32 reference of the PyTorch module.
    # Loose tolerance: the kernel deliberately feeds the MXU bf16 operands.
    ref_a = basic_block_reference(x, raw_a, stride=1)
    ref_b = basic_block_reference(x, raw_b, stride=2)
    err_a = float(jnp.max(jnp.abs(y_a - ref_a)))
    err_b = float(jnp.max(jnp.abs(y_b - ref_b)))
    assert err_a < 0.25 and err_b < 0.25, (err_a, err_b)
    print("KERNEL_OK")
</pallas_src>

<mosaic_0001>
module attributes {stable_mosaic.version = 11 : i64} {
  func.func @_basic_block_kernel(%arg0: i32, %arg1: memref<1x16x16x4xbf16, #tpu.memory_space<vmem>>, %arg2: memref<36x4xbf16, #tpu.memory_space<vmem>>, %arg3: memref<1x4xf32, #tpu.memory_space<vmem>>, %arg4: memref<36x4xbf16, #tpu.memory_space<vmem>>, %arg5: memref<1x4xf32, #tpu.memory_space<vmem>>, %arg6: memref<1x16x16x4xf32, #tpu.memory_space<vmem>>, %arg7: memref<18x32x4xf32, #tpu.memory_space<vmem>>, %arg8: memref<18x32x4xf32, #tpu.memory_space<vmem>>) attributes {dimension_semantics = [#tpu.dimension_semantics<parallel>], iteration_bounds = array<i64: 2>, scalar_prefetch = 0 : i64, scratch_operands = 2 : i64, tpu.core_type = #tpu.core_type<tc>, window_params = [{transform_indices = @transform_0, window_bounds = array<i64: 1, 16, 16, 4>}, {pipeline_mode = #tpu.pipeline_mode<synchronous>, transform_indices = @transform_1, window_bounds = array<i64: 36, 4>}, {pipeline_mode = #tpu.pipeline_mode<synchronous>, transform_indices = @transform_2, window_bounds = array<i64: 1, 4>}, {pipeline_mode = #tpu.pipeline_mode<synchronous>, transform_indices = @transform_3, window_bounds = array<i64: 36, 4>}, {pipeline_mode = #tpu.pipeline_mode<synchronous>, transform_indices = @transform_4, window_bounds = array<i64: 1, 4>}, {transform_indices = @transform_5, window_bounds = array<i64: 1, 16, 16, 4>}]} {
    %cst = arith.constant 0.000000e+00 : f32
    %0 = vector.broadcast %cst : f32 to vector<1x32x4xf32>
    %c0 = arith.constant 0 : index
    %c0_0 = arith.constant 0 : index
    %c0_1 = arith.constant 0 : index
    %1 = vector.load %arg7[%c0, %c0_0, %c0_1] : memref<18x32x4xf32, #tpu.memory_space<vmem>>, vector<1x32x4xf32>
    tpu.vector_store %arg7[%c0, %c0_0, %c0_1], %0 {strides = array<i32>} : memref<18x32x4xf32, #tpu.memory_space<vmem>>, vector<1x32x4xf32>,
    %cst_2 = arith.constant 0.000000e+00 : f32
    %2 = vector.broadcast %cst_2 : f32 to vector<1x32x4xf32>
    %c17 = arith.constant 17 : index
    %c0_3 = arith.constant 0 : index
    %c0_4 = arith.constant 0 : index
    %3 = vector.load %arg7[%c17, %c0_3, %c0_4] : memref<18x32x4xf32, #tpu.memory_space<vmem>>, vector<1x32x4xf32>
    tpu.vector_store %arg7[%c17, %c0_3, %c0_4], %2 {strides = array<i32>} : memref<18x32x4xf32, #tpu.memory_space<vmem>>, vector<1x32x4xf32>,
    %cst_5 = arith.constant 0.000000e+00 : f32
    %4 = vector.broadcast %cst_5 : f32 to vector<16x8x4xf32>
    %c1 = arith.constant 1 : index
    %c0_6 = arith.constant 0 : index
    %c0_7 = arith.constant 0 : index
    %5 = vector.load %arg7[%c1, %c0_6, %c0_7] : memref<18x32x4xf32, #tpu.memory_space<vmem>>, vector<16x8x4xf32>
    tpu.vector_store %arg7[%c1, %c0_6, %c0_7], %4 {strides = array<i32>} : memref<18x32x4xf32, #tpu.memory_space<vmem>>, vector<16x8x4xf32>,
    %cst_8 = arith.constant 0.000000e+00 : f32
    %6 = vector.broadcast %cst_8 : f32 to vector<16x8x4xf32>
    %c1_9 = arith.constant 1 : index
    %c24 = arith.constant 24 : index
    %c0_10 = arith.constant 0 : index
    %7 = vector.load %arg7[%c1_9, %c24, %c0_10] : memref<18x32x4xf32, #tpu.memory_space<vmem>>, vector<16x8x4xf32>
    tpu.vector_store %arg7[%c1_9, %c24, %c0_10], %6 {strides = array<i32>} : memref<18x32x4xf32, #tpu.memory_space<vmem>>, vector<16x8x4xf32>,
    %c0_11 = arith.constant 0 : index
    %c0_12 = arith.constant 0 : index
    %c0_13 = arith.constant 0 : index
    %c0_14 = arith.constant 0 : index
    %8 = vector.load %arg1[%c0_11, %c0_12, %c0_13, %c0_14] : memref<1x16x16x4xbf16, #tpu.memory_space<vmem>>, vector<1x16x16x4xbf16>
    %9 = vector.shape_cast %8 : vector<1x16x16x4xbf16> to vector<16x16x4xbf16>
    %10 = arith.extf %9 : vector<16x16x4xbf16> to vector<16x16x4xf32>
    %c1_15 = arith.constant 1 : index
    %c8 = arith.constant 8 : index
    %c0_16 = arith.constant 0 : index
    %11 = vector.load %arg7[%c1_15, %c8, %c0_16] : memref<18x32x4xf32, #tpu.memory_space<vmem>>, vector<16x16x4xf32>
    tpu.vector_store %arg7[%c1_15, %c8, %c0_16], %10 {strides = array<i32>} : memref<18x32x4xf32, #tpu.memory_space<vmem>>, vector<16x16x4xf32>,
    %c0_17 = arith.constant 0 : index
    %c7 = arith.constant 7 : index
    %c0_18 = arith.constant 0 : index
    %12 = vector.load %arg7[%c0_17, %c7, %c0_18] : memref<18x32x4xf32, #tpu.memory_space<vmem>>, vector<16x16x4xf32>
    %c0_19 = arith.constant 0 : index
    %c8_20 = arith.constant 8 : index
    %c0_21 = arith.constant 0 : index
    %13 = vector.load %arg7[%c0_19, %c8_20, %c0_21] : memref<18x32x4xf32, #tpu.memory_space<vmem>>, vector<16x16x4xf32>
    %c0_22 = arith.constant 0 : index
    %c9 = arith.constant 9 : index
    %c0_23 = arith.constant 0 : index
    %14 = vector.load %arg7[%c0_22, %c9, %c0_23] : memref<18x32x4xf32, #tpu.memory_space<vmem>>, vector<16x16x4xf32>
    %c1_24 = arith.constant 1 : index
    %c7_25 = arith.constant 7 : index
    %c0_26 = arith.constant 0 : index
    %15 = vector.load %arg7[%c1_24, %c7_25, %c0_26] : memref<18x32x4xf32, #tpu.memory_space<vmem>>, vector<16x16x4xf32>
    %c1_27 = arith.constant 1 : index
    %c8_28 = arith.constant 8 : index
    %c0_29 = arith.constant 0 : index
    %16 = vector.load %arg7[%c1_27, %c8_28, %c0_29] : memref<18x32x4xf32, #tpu.memory_space<vmem>>, vector<16x16x4xf32>
    %c1_30 = arith.constant 1 : index
    %c9_31 = arith.constant 9 : index
    %c0_32 = arith.constant 0 : index
    %17 = vector.load %arg7[%c1_30, %c9_31, %c0_32] : memref<18x32x4xf32, #tpu.memory_space<vmem>>, vector<16x16x4xf32>
    %c2 = arith.constant 2 : index
    %c7_33 = arith.constant 7 : index
    %c0_34 = arith.constant 0 : index
    %18 = vector.load %arg7[%c2, %c7_33, %c0_34] : memref<18x32x4xf32, #tpu.memory_space<vmem>>, vector<16x16x4xf32>
    %c2_35 = arith.constant 2 : index
    %c8_36 = arith.constant 8 : index
    %c0_37 = arith.constant 0 : index
    %19 = vector.load %arg7[%c2_35, %c8_36, %c0_37] : memref<18x32x4xf32, #tpu.memory_space<vmem>>, vector<16x16x4xf32>
    %c2_38 = arith.constant 2 : index
    %c9_39 = arith.constant 9 : index
    %c0_40 = arith.constant 0 : index
    %20 = vector.load %arg7[%c2_38, %c9_39, %c0_40] : memref<18x32x4xf32, #tpu.memory_space<vmem>>, vector<16x16x4xf32>
    %21 = tpu.concatenate %12, %13, %14, %15, %16, %17, %18, %19, %20 in 2 : vector<16x16x4xf32>, vector<16x16x4xf32>, vector<16x16x4xf32>, vector<16x16x4xf32>, vector<16x16x4xf32>, vector<16x16x4xf32>, vector<16x16x4xf32>, vector<16x16x4xf32>, vector<16x16x4xf32> -> vector<16x16x36xf32>
    %22 = vector.shape_cast %21 : vector<16x16x36xf32> to vector<256x36xf32>
    %23 = arith.truncf %22 : vector<256x36xf32> to vector<256x36xbf16>
    %c0_41 = arith.constant 0 : index
    %c0_42 = arith.constant 0 : index
    %24 = vector.load %arg2[%c0_41, %c0_42] : memref<36x4xbf16, #tpu.memory_space<vmem>>, vector<36x4xbf16>
    %cst_43 = arith.constant dense<0.000000e+00> : vector<256x4xf32>
    %25 = tpu.matmul %23, %24, %cst_43 {dimension_numbers = #tpu.dot_dimension_numbers<[1], [0], [0], [1], [0, 0, 1, 1], [], []>} : vector<256x36xbf16>, vector<36x4xbf16>, vector<256x4xf32> -> vector<256x4xf32>
    %c0_44 = arith.constant 0 : index
    %c0_45 = arith.constant 0 : index
    %26 = vector.load %arg3[%c0_44, %c0_45] : memref<1x4xf32, #tpu.memory_space<vmem>>, vector<1x4xf32>
    %27 = vector.broadcast %26 : vector<1x4xf32> to vector<256x4xf32>
    %28 = arith.addf %25, %27 : vector<256x4xf32>
    %cst_46 = arith.constant 0.000000e+00 : f32
    %29 = vector.broadcast %cst_46 : f32 to vector<256x4xf32>
    %30 = arith.maximumf %28, %29 : vector<256x4xf32>
    %cst_47 = arith.constant 0.000000e+00 : f32
    %31 = vector.broadcast %cst_47 : f32 to vector<1x32x4xf32>
    %c0_48 = arith.constant 0 : index
    %c0_49 = arith.constant 0 : index
    %c0_50 = arith.constant 0 : index
    %32 = vector.load %arg8[%c0_48, %c0_49, %c0_50] : memref<18x32x4xf32, #tpu.memory_space<vmem>>, vector<1x32x4xf32>
    tpu.vector_store %arg8[%c0_48, %c0_49, %c0_50], %31 {strides = array<i32>} : memref<18x32x4xf32, #tpu.memory_space<vmem>>, vector<1x32x4xf32>,
    %cst_51 = arith.constant 0.000000e+00 : f32
    %33 = vector.broadcast %cst_51 : f32 to vector<1x32x4xf32>
    %c17_52 = arith.constant 17 : index
    %c0_53 = arith.constant 0 : index
    %c0_54 = arith.constant 0 : index
    %34 = vector.load %arg8[%c17_52, %c0_53, %c0_54] : memref<18x32x4xf32, #tpu.memory_space<vmem>>, vector<1x32x4xf32>
    tpu.vector_store %arg8[%c17_52, %c0_53, %c0_54], %33 {strides = array<i32>} : memref<18x32x4xf32, #tpu.memory_space<vmem>>, vector<1x32x4xf32>,
    %cst_55 = arith.constant 0.000000e+00 : f32
    %35 = vector.broadcast %cst_55 : f32 to vector<16x8x4xf32>
    %c1_56 = arith.constant 1 : index
    %c0_57 = arith.constant 0 : index
    %c0_58 = arith.constant 0 : index
    %36 = vector.load %arg8[%c1_56, %c0_57, %c0_58] : memref<18x32x4xf32, #tpu.memory_space<vmem>>, vector<16x8x4xf32>
    tpu.vector_store %arg8[%c1_56, %c0_57, %c0_58], %35 {strides = array<i32>} : memref<18x32x4xf32, #tpu.memory_space<vmem>>, vector<16x8x4xf32>,
    %cst_59 = arith.constant 0.000000e+00 : f32
    %37 = vector.broadcast %cst_59 : f32 to vector<16x8x4xf32>
    %c1_60 = arith.constant 1 : index
    %c24_61 = arith.constant 24 : index
    %c0_62 = arith.constant 0 : index
    %38 = vector.load %arg8[%c1_60, %c24_61, %c0_62] : memref<18x32x4xf32, #tpu.memory_space<vmem>>, vector<16x8x4xf32>
    tpu.vector_store %arg8[%c1_60, %c24_61, %c0_62], %37 {strides = array<i32>} : memref<18x32x4xf32, #tpu.memory_space<vmem>>, vector<16x8x4xf32>,
    %39 = vector.shape_cast %30 : vector<256x4xf32> to vector<16x16x4xf32>
    %c1_63 = arith.constant 1 : index
    %c8_64 = arith.constant 8 : index
    %c0_65 = arith.constant 0 : index
    %40 = vector.load %arg8[%c1_63, %c8_64, %c0_65] : memref<18x32x4xf32, #tpu.memory_space<vmem>>, vector<16x16x4xf32>
    tpu.vector_store %arg8[%c1_63, %c8_64, %c0_65], %39 {strides = array<i32>} : memref<18x32x4xf32, #tpu.memory_space<vmem>>, vector<16x16x4xf32>,
    %c0_66 = arith.constant 0 : index
    %c7_67 = arith.constant 7 : index
    %c0_68 = arith.constant 0 : index
    %41 = vector.load %arg8[%c0_66, %c7_67, %c0_68] : memref<18x32x4xf32, #tpu.memory_space<vmem>>, vector<16x16x4xf32>
    %c0_69 = arith.constant 0 : index
    %c8_70 = arith.constant 8 : index
    %c0_71 = arith.constant 0 : index
    %42 = vector.load %arg8[%c0_69, %c8_70, %c0_71] : memref<18x32x4xf32, #tpu.memory_space<vmem>>, vector<16x16x4xf32>
    %c0_72 = arith.constant 0 : index
    %c9_73 = arith.constant 9 : index
    %c0_74 = arith.constant 0 : index
    %43 = vector.load %arg8[%c0_72, %c9_73, %c0_74] : memref<18x32x4xf32, #tpu.memory_space<vmem>>, vector<16x16x4xf32>
    %c1_75 = arith.constant 1 : index
    %c7_76 = arith.constant 7 : index
    %c0_77 = arith.constant 0 : index
    %44 = vector.load %arg8[%c1_75, %c7_76, %c0_77] : memref<18x32x4xf32, #tpu.memory_space<vmem>>, vector<16x16x4xf32>
    %c1_78 = arith.constant 1 : index
    %c8_79 = arith.constant 8 : index
    %c0_80 = arith.constant 0 : index
    %45 = vector.load %arg8[%c1_78, %c8_79, %c0_80] : memref<18x32x4xf32, #tpu.memory_space<vmem>>, vector<16x16x4xf32>
    %c1_81 = arith.constant 1 : index
    %c9_82 = arith.constant 9 : index
    %c0_83 = arith.constant 0 : index
    %46 = vector.load %arg8[%c1_81, %c9_82, %c0_83] : memref<18x32x4xf32, #tpu.memory_space<vmem>>, vector<16x16x4xf32>
    %c2_84 = arith.constant 2 : index
    %c7_85 = arith.constant 7 : index
    %c0_86 = arith.constant 0 : index
    %47 = vector.load %arg8[%c2_84, %c7_85, %c0_86] : memref<18x32x4xf32, #tpu.memory_space<vmem>>, vector<16x16x4xf32>
    %c2_87 = arith.constant 2 : index
    %c8_88 = arith.constant 8 : index
    %c0_89 = arith.constant 0 : index
    %48 = vector.load %arg8[%c2_87, %c8_88, %c0_89] : memref<18x32x4xf32, #tpu.memory_space<vmem>>, vector<16x16x4xf32>
    %c2_90 = arith.constant 2 : index
    %c9_91 = arith.constant 9 : index
    %c0_92 = arith.constant 0 : index
    %49 = vector.load %arg8[%c2_90, %c9_91, %c0_92] : memref<18x32x4xf32, #tpu.memory_space<vmem>>, vector<16x16x4xf32>
    %50 = tpu.concatenate %41, %42, %43, %44, %45, %46, %47, %48, %49 in 2 : vector<16x16x4xf32>, vector<16x16x4xf32>, vector<16x16x4xf32>, vector<16x16x4xf32>, vector<16x16x4xf32>, vector<16x16x4xf32>, vector<16x16x4xf32>, vector<16x16x4xf32>, vector<16x16x4xf32> -> vector<16x16x36xf32>
    %51 = vector.shape_cast %50 : vector<16x16x36xf32> to vector<256x36xf32>
    %52 = arith.truncf %51 : vector<256x36xf32> to vector<256x36xbf16>
    %c0_93 = arith.constant 0 : index
    %c0_94 = arith.constant 0 : index
    %53 = vector.load %arg4[%c0_93, %c0_94] : memref<36x4xbf16, #tpu.memory_space<vmem>>, vector<36x4xbf16>
    %cst_95 = arith.constant dense<0.000000e+00> : vector<256x4xf32>
    %54 = tpu.matmul %52, %53, %cst_95 {dimension_numbers = #tpu.dot_dimension_numbers<[1], [0], [0], [1], [0, 0, 1, 1], [], []>} : vector<256x36xbf16>, vector<36x4xbf16>, vector<256x4xf32> -> vector<256x4xf32>
    %c0_96 = arith.constant 0 : index
    %c0_97 = arith.constant 0 : index
    %55 = vector.load %arg5[%c0_96, %c0_97] : memref<1x4xf32, #tpu.memory_space<vmem>>, vector<1x4xf32>
    %56 = vector.broadcast %55 : vector<1x4xf32> to vector<256x4xf32>
    %57 = arith.addf %54, %56 : vector<256x4xf32>
    %c0_98 = arith.constant 0 : index
    %c0_99 = arith.constant 0 : index
    %c0_100 = arith.constant 0 : index
    %c0_101 = arith.constant 0 : index
    %58 = vector.load %arg1[%c0_98, %c0_99, %c0_100, %c0_101] : memref<1x16x16x4xbf16, #tpu.memory_space<vmem>>, vector<1x16x16x4xbf16>
    %59 = vector.shape_cast %58 : vector<1x16x16x4xbf16> to vector<16x16x4xbf16>
    %60 = arith.extf %59 : vector<16x16x4xbf16> to vector<16x16x4xf32>
    %61 = vector.shape_cast %60 : vector<16x16x4xf32> to vector<256x4xf32>
    %62 = arith.addf %57, %61 : vector<256x4xf32>
    %cst_102 = arith.constant 0.000000e+00 : f32
    %63 = vector.broadcast %cst_102 : f32 to vector<256x4xf32>
    %64 = arith.maximumf %62, %63 : vector<256x4xf32>
    %65 = vector.shape_cast %64 : vector<256x4xf32> to vector<16x16x4xf32>
    %c0_103 = arith.constant 0 : index
    %c0_104 = arith.constant 0 : index
    %c0_105 = arith.constant 0 : index
    %c0_106 = arith.constant 0 : index
    %66 = vector.load %arg6[%c0_103, %c0_104, %c0_105, %c0_106] : memref<1x16x16x4xf32, #tpu.memory_space<vmem>>, vector<1x16x16x4xf32>
    %67 = vector.shape_cast %66 : vector<1x16x16x4xf32> to vector<16x16x4xf32>
    %68 = vector.shape_cast %65 : vector<16x16x4xf32> to vector<1x16x16x4xf32>
    tpu.vector_store %arg6[%c0_103, %c0_104, %c0_105, %c0_106], %68 {strides = array<i32>} : memref<1x16x16x4xf32, #tpu.memory_space<vmem>>, vector<1x16x16x4xf32>,
    return
  }
  func.func @transform_0(%arg0: i32) -> (i32, i32, i32, i32) {
    %c0_i32 = arith.constant 0 : i32
    %c0_i32_0 = arith.constant 0 : i32
    %c0_i32_1 = arith.constant 0 : i32
    %c0_i32_2 = arith.constant 0 : i32
    return %arg0, %c0_i32, %c0_i32_0, %c0_i32_1 : i32, i32, i32, i32
  }
  func.func @transform_1(%arg0: i32) -> (i32, i32) {
    %c0_i32 = arith.constant 0 : i32
    %c0_i32_0 = arith.constant 0 : i32
    %c0_i32_1 = arith.constant 0 : i32
    return %c0_i32, %c0_i32_0 : i32, i32
  }
  func.func @transform_2(%arg0: i32) -> (i32, i32) {
    %c0_i32 = arith.constant 0 : i32
    %c0_i32_0 = arith.constant 0 : i32
    %c0_i32_1 = arith.constant 0 : i32
    return %c0_i32, %c0_i32_0 : i32, i32
  }
  func.func @transform_3(%arg0: i32) -> (i32, i32) {
    %c0_i32 = arith.constant 0 : i32
    %c0_i32_0 = arith.constant 0 : i32
    %c0_i32_1 = arith.constant 0 : i32
    return %c0_i32, %c0_i32_0 : i32, i32
  }
  func.func @transform_4(%arg0: i32) -> (i32, i32) {
    %c0_i32 = arith.constant 0 : i32
    %c0_i32_0 = arith.constant 0 : i32
    %c0_i32_1 = arith.constant 0 : i32
    return %c0_i32, %c0_i32_0 : i32, i32
  }
  func.func @transform_5(%arg0: i32) -> (i32, i32, i32, i32) {
    %c0_i32 = arith.constant 0 : i32
    %c0_i32_0 = arith.constant 0 : i32
    %c0_i32_1 = arith.constant 0 : i32
    %c0_i32_2 = arith.constant 0 : i32
    return %arg0, %c0_i32, %c0_i32_0, %c0_i32_1 : i32, i32, i32, i32
  }
}

</mosaic_0001>

<bundles_post_ra>
// kernel: tpu_custom_call.1
= control target key start
LH: loop header
LB: loop body
LE: loop exit
PB: predicated region body
PF: predicated region fallthrough
CT: control target
= control target key end

     0   :  { %s6020_s18 = smov 0   ;;  %s8785_s0 = inlined_call_operand.vmem [shape: bf16[2,16,16,4], index: 0, kind: input, shape index: {}]   ;;  %s8786_s1 = inlined_call_operand.vmem [shape: bf16[36,4], index: 1, kind: input, shape index: {}]   ;;  %s8787_s2 = inlined_call_operand.vmem [shape: f32[1,4], index: 2, kind: input, shape index: {}]   ;;  %s8788_s3 = inlined_call_operand.vmem [shape: bf16[36,4], index: 3, kind: input, shape index: {}]   ;;  %s8789_s4 = inlined_call_operand.vmem [shape: f32[1,4], index: 4, kind: input, shape index: {}]   ;;  %s8790_s5 = inlined_call_operand.vmem [shape: f32[2,16,16,4], index: 5, kind: output, shape index: {}]  }
   0x1 LB: > { %s4343_s19 = sadd.s32 4294967295, %s5979_s18   ;;  %p4347_p0 = scmp.ge.s32.totalorder %s5979_s18, 1  ;;  %s5979_s18 = sphi %s6020_s18, %s15_s18  }
   0x2   : > { %p187_p1 = scmp.lt.s32.totalorder %s5979_s18, 3 }
   0x4   : > { %p188_p2 = pnand %p4347_p0, %p187_p1 }
   0x6   : > { %191 = sbr.rel (%p188_p2) target bundleno = 1202 (0x4b2), region = 40 }
   0xd   : > { %vm226_vm0 = vcmask 31744   ;;  %p6030_p3 = scmp.lt.s32.totalorder %s4343_s19, 1  ;;  %v5981_v0 = vmov 0.0   ;;  %s5982_s25 = smov 4   ;;  %vm2033_vm1 = vcmask 1041408   ;;  %vm1710_vm2 = vcmask 64512  }
   0xe   : > { %228 = vst.msk [vmem:[#allocation2 + $0x8] sm:$0xff] %vm226_vm0, %v5981_v0  ;;  %229 = vst.msk [vmem:[#allocation2 + $0x10] sm:$0xff] %vm226_vm0, %v5981_v0  ;;  %s5983_s26 = smov 8   ;;  %s5984_s27 = smov 12   ;;  %vm1743_vm3 = vcmask 97280   ;;  %vm1776_vm4 = vcmask 130048  }
   0xf   : > { %227 = vst.msk [vmem:[#allocation2] sm:$0xff] %vm226_vm0, %v5981_v0  ;;  %230 = vst.msk [vmem:[#allocation2 + $0x18] sm:$0xff] %vm226_vm0, %v5981_v0  ;;  %s9007_s19 = smov (!%p6030_p3, %s4343_s19), 1  ;;  %s5985_s28 = smov 16   ;;  %vm1809_vm5 = vcmask 162816   ;;  %vm1842_vm6 = vcmask 195584  }
  0x10   : > { %232 = vst.msk [vmem:[#allocation2 + $0x220] sm:$0xff] %vm226_vm0, %v5981_v0  ;;  %233 = vst.msk [vmem:[#allocation2 + $0x228] sm:$0xff] %vm226_vm0, %v5981_v0  ;;  %s4394_s21 = sshll.u32 %s9007_s19, 7  ;;  %s5986_s29 = smov 20   ;;  %vm1875_vm7 = vcmask 228352   ;;  %vm1908_vm8 = vcmask 261120  }
  0x11   : > { %234 = vst.msk [vmem:[#allocation2 + $0x230] sm:$0xff] %vm226_vm0, %v5981_v0  ;;  %235 = vst.msk [vmem:[#allocation2 + $0x238] sm:$0xff] %vm226_vm0, %v5981_v0  ;;  %s6204_s24 = scalar_lea.vmem %s8785_s0, %s4394_s21  ;;  %s5987_s30 = smov 24   ;;  %vm1984_vm9 = vcmask 293888  }
  0x12   : > { %237 = vst.msk [vmem:[#allocation2 + $0x20] sm:$0xff] %vm226_vm0, %v5981_v0  ;;  %238 = vst.msk [vmem:[#allocation2 + $0x40] sm:$0xff] %vm226_vm0, %v5981_v0  ;;  %v4524_v1 = vld [vmem:[%s6204_s24 + $0x8] sm:$0xff]   ;;  %v4397_v2 = vld [vmem:[%s6204_s24] sm:$0xff]   ;;  %s5988_s12 = smov 28   ;;  %s5989_s13 = smov 32  }
  0x13   : > { %239 = vst.msk [vmem:[#allocation2 + $0x60] sm:$0xff] %vm226_vm0, %v5981_v0  ;;  %240 = vst.msk [vmem:[#allocation2 + $0x80] sm:$0xff] %vm226_vm0, %v5981_v0  ;;  %v4525_v3 = vld [vmem:[%s6204_s24 + $0x10] sm:$0xff]   ;;  %v4402_v4 = vunpack.c.l.bf16 %v4524_v1  ;;  %v4403_v5 = vunpack.c.h.bf16 %v4524_v1  ;;  %v4398_v6 = vunpack.c.l.bf16 %v4397_v2  ;;  %v4399_v7 = vunpack.c.h.bf16 %v4397_v2  ;;  %v4526_v8 = vld [vmem:[%s6204_s24 + $0x18] sm:$0xff]  }
  0x14   : > { %241 = vst.msk [vmem:[#allocation2 + $0xa0] sm:$0xff] %vm226_vm0, %v5981_v0  ;;  %242 = vst.msk [vmem:[#allocation2 + $0xc0] sm:$0xff] %vm226_vm0, %v5981_v0  ;;  %v4527_v9 = vld [vmem:[%s6204_s24 + $0x20] sm:$0xff]   ;;  %v4528_v10 = vld [vmem:[%s6204_s24 + $0x28] sm:$0xff]   ;;  %v4406_v13 = vunpack.c.l.bf16 %v4525_v3  ;;  %v4407_v14 = vunpack.c.h.bf16 %v4525_v3  ;;  %v4410_v15 = vunpack.c.l.bf16 %v4526_v8  ;;  %v4411_v16 = vunpack.c.h.bf16 %v4526_v8 }
  0x15   : > { %243 = vst.msk [vmem:[#allocation2 + $0xe0] sm:$0xff] %vm226_vm0, %v5981_v0  ;;  %244 = vst.msk [vmem:[#allocation2 + $0x100] sm:$0xff] %vm226_vm0, %v5981_v0  ;;  %v397_v11 = vld [vmem:[#allocation2 + $0x8] sm:$0xff]  ;;  %v398_v12 = vld [vmem:[#allocation2 + $0x10] sm:$0xff]  ;;  %v4414_v19 = vunpack.c.l.bf16 %v4527_v9  ;;  %v4415_v20 = vunpack.c.h.bf16 %v4527_v9  ;;  %v4418_v21 = vunpack.c.l.bf16 %v4528_v10  ;;  %v4419_v25 = vunpack.c.h.bf16 %v4528_v10 }
  0x16   : > { %245 = vst.msk [vmem:[#allocation2 + $0x120] sm:$0xff] %vm226_vm0, %v5981_v0  ;;  %246 = vst.msk [vmem:[#allocation2 + $0x140] sm:$0xff] %vm226_vm0, %v5981_v0  ;;  %v4529_v17 = vld [vmem:[%s6204_s24 + $0x30] sm:$0xff]   ;;  %v4687_v18 = vpack.i.bf16 %v398_v12, %v397_v11  ;;  %v4530_v22 = vld [vmem:[%s6204_s24 + $0x38] sm:$0xff]  }
  0x17   : > { %247 = vst.msk [vmem:[#allocation2 + $0x160] sm:$0xff] %vm226_vm0, %v5981_v0  ;;  %248 = vst.msk [vmem:[#allocation2 + $0x180] sm:$0xff] %vm226_vm0, %v5981_v0  ;;  %v4531_v23 = vld [vmem:[%s6204_s24 + $0x40] sm:$0xff]   ;;  %v4532_v24 = vld [vmem:[%s6204_s24 + $0x48] sm:$0xff]   ;;  %v4422_v26 = vunpack.c.l.bf16 %v4529_v17  ;;  %v4423_v27 = vunpack.c.h.bf16 %v4529_v17  ;;  %v4426_v28 = vunpack.c.l.bf16 %v4530_v22  ;;  %v4427_v32 = vunpack.c.h.bf16 %v4530_v22 }
  0x18   : > { %249 = vst.msk [vmem:[#allocation2 + $0x1a0] sm:$0xff] %vm226_vm0, %v5981_v0  ;;  %250 = vst.msk [vmem:[#allocation2 + $0x1c0] sm:$0xff] %vm226_vm0, %v5981_v0  ;;  %v4533_v29 = vld [vmem:[%s6204_s24 + $0x50] sm:$0xff]   ;;  %v4534_v30 = vld [vmem:[%s6204_s24 + $0x58] sm:$0xff]   ;;  %4688 = vrot.lane.b32.xlu0 %v4687_v18, %s5982_s25  ;;  %v4430_v33 = vunpack.c.l.bf16 %v4531_v23  ;;  %v4431_v34 = vunpack.c.h.bf16 %v4531_v23  ;;  %v4434_v35 = vunpack.c.l.bf16 %v4532_v24  ;;  %v4435_v38 = vunpack.c.h.bf16 %v4532_v24 }
  0x19   : > { %251 = vst.msk [vmem:[#allocation2 + $0x1e0] sm:$0xff] %vm226_vm0, %v5981_v0  ;;  %252 = vst.msk [vmem:[#allocation2 + $0x200] sm:$0xff] %vm226_vm0, %v5981_v0  ;;  %v4535_v31 = vld [vmem:[%s6204_s24 + $0x60] sm:$0xff]   ;;  %v4536_v36 = vld [vmem:[%s6204_s24 + $0x68] sm:$0xff]   ;;  %v4438_v39 = vunpack.c.l.bf16 %v4533_v29  ;;  %v4439_v40 = vunpack.c.h.bf16 %v4533_v29  ;;  %v4442_v41 = vunpack.c.l.bf16 %v4534_v30  ;;  %v4443_v43 = vunpack.c.h.bf16 %v4534_v30 }
  0x1a   : > { %253 = vst.msk [vmem:[#allocation2 + $0x38] sm:$0xff] %vm226_vm0, %v5981_v0  ;;  %254 = vst.msk [vmem:[#allocation2 + $0x58] sm:$0xff] %vm226_vm0, %v5981_v0  ;;  %v4537_v37 = vld [vmem:[%s6204_s24 + $0x70] sm:$0xff]   ;;  %v4538_v42 = vld [vmem:[%s6204_s24 + $0x78] sm:$0xff]   ;;  %v4446_v44 = vunpack.c.l.bf16 %v4535_v31  ;;  %v4447_v45 = vunpack.c.h.bf16 %v4535_v31  ;;  %v4450_v46 = vunpack.c.l.bf16 %v4536_v36  ;;  %v4451_v47 = vunpack.c.h.bf16 %v4536_v36 }
  0x1b   : > { %255 = vst.msk [vmem:[#allocation2 + $0x78] sm:$0xff] %vm226_vm0, %v5981_v0  ;;  %256 = vst.msk [vmem:[#allocation2 + $0x98] sm:$0xff] %vm226_vm0, %v5981_v0  ;;  %v4454_v48 = vunpack.c.l.bf16 %v4537_v37  ;;  %v4455_v49 = vunpack.c.h.bf16 %v4537_v37  ;;  %v4458_v50 = vunpack.c.l.bf16 %v4538_v42  ;;  %v4459_v51 = vunpack.c.h.bf16 %v4538_v42 }
  0x1c   : > { %257 = vst.msk [vmem:[#allocation2 + $0xb8] sm:$0xff] %vm226_vm0, %v5981_v0  ;;  %258 = vst.msk [vmem:[#allocation2 + $0xd8] sm:$0xff] %vm226_vm0, %v5981_v0 }
  0x1d   : > { %259 = vst.msk [vmem:[#allocation2 + $0xf8] sm:$0xff] %vm226_vm0, %v5981_v0  ;;  %260 = vst.msk [vmem:[#allocation2 + $0x118] sm:$0xff] %vm226_vm0, %v5981_v0 }
  0x1e   : > { %261 = vst.msk [vmem:[#allocation2 + $0x138] sm:$0xff] %vm226_vm0, %v5981_v0  ;;  %262 = vst.msk [vmem:[#allocation2 + $0x158] sm:$0xff] %vm226_vm0, %v5981_v0 }
  0x1f   : > { %263 = vst.msk [vmem:[#allocation2 + $0x178] sm:$0xff] %vm226_vm0, %v5981_v0  ;;  %264 = vst.msk [vmem:[#allocation2 + $0x198] sm:$0xff] %vm226_vm0, %v5981_v0 }
  0x20   : > { %265 = vst.msk [vmem:[#allocation2 + $0x1b8] sm:$0xff] %vm226_vm0, %v5981_v0  ;;  %266 = vst.msk [vmem:[#allocation2 + $0x1d8] sm:$0xff] %vm226_vm0, %v5981_v0 }
  0x21   : > { %267 = vst.msk [vmem:[#allocation2 + $0x1f8] sm:$0xff] %vm226_vm0, %v5981_v0  ;;  %268 = vst.msk [vmem:[#allocation2 + $0x218] sm:$0xff] %vm226_vm0, %v5981_v0 }
  0x22   : > { %2230 = vst.msk [vmem:[#allocation3] sm:$0xff] %vm226_vm0, %v5981_v0  ;;  %2231 = vst.msk [vmem:[#allocation3 + $0x8] sm:$0xff] %vm226_vm0, %v5981_v0 }
  0x23   : > { %2232 = vst.msk [vmem:[#allocation3 + $0x10] sm:$0xff] %vm226_vm0, %v5981_v0  ;;  %2233 = vst.msk [vmem:[#allocation3 + $0x18] sm:$0xff] %vm226_vm0, %v5981_v0 }
  0x24   : > { %2235 = vst.msk [vmem:[#allocation3 + $0x220] sm:$0xff] %vm226_vm0, %v5981_v0  ;;  %2236 = vst.msk [vmem:[#allocation3 + $0x228] sm:$0xff] %vm226_vm0, %v5981_v0 }
  0x25   : > { %2237 = vst.msk [vmem:[#allocation3 + $0x230] sm:$0xff] %vm226_vm0, %v5981_v0  ;;  %2238 = vst.msk [vmem:[#allocation3 + $0x238] sm:$0xff] %vm226_vm0, %v5981_v0 }
  0x26   : > { %2240 = vst.msk [vmem:[#allocation3 + $0x20] sm:$0xff] %vm226_vm0, %v5981_v0  ;;  %2241 = vst.msk [vmem:[#allocation3 + $0x40] sm:$0xff] %vm226_vm0, %v5981_v0 }
  0x27   : > { %2242 = vst.msk [vmem:[#allocation3 + $0x60] sm:$0xff] %vm226_vm0, %v5981_v0  ;;  %2243 = vst.msk [vmem:[#allocation3 + $0x80] sm:$0xff] %vm226_vm0, %v5981_v0 }
  0x28   : > { %2244 = vst.msk [vmem:[#allocation3 + $0xa0] sm:$0xff] %vm226_vm0, %v5981_v0  ;;  %2245 = vst.msk [vmem:[#allocation3 + $0xc0] sm:$0xff] %vm226_vm0, %v5981_v0 }
  0x29   : > { %2246 = vst.msk [vmem:[#allocation3 + $0xe0] sm:$0xff] %vm226_vm0, %v5981_v0  ;;  %2247 = vst.msk [vmem:[#allocation3 + $0x100] sm:$0xff] %vm226_vm0, %v5981_v0 }
  0x2a   : > { %2248 = vst.msk [vmem:[#allocation3 + $0x120] sm:$0xff] %vm226_vm0, %v5981_v0  ;;  %2249 = vst.msk [vmem:[#allocation3 + $0x140] sm:$0xff] %vm226_vm0, %v5981_v0 }
  0x2b   : > { %2250 = vst.msk [vmem:[#allocation3 + $0x160] sm:$0xff] %vm226_vm0, %v5981_v0  ;;  %2251 = vst.msk [vmem:[#allocation3 + $0x180] sm:$0xff] %vm226_vm0, %v5981_v0 }
  0x2c   : > { %2252 = vst.msk [vmem:[#allocation3 + $0x1a0] sm:$0xff] %vm226_vm0, %v5981_v0  ;;  %2253 = vst.msk [vmem:[#allocation3 + $0x1c0] sm:$0xff] %vm226_vm0, %v5981_v0 }
  0x2d   : > { %2254 = vst.msk [vmem:[#allocation3 + $0x1e0] sm:$0xff] %vm226_vm0, %v5981_v0  ;;  %2255 = vst.msk [vmem:[#allocation3 + $0x200] sm:$0xff] %vm226_vm0, %v5981_v0 }
  0x2e   : > { %2256 = vst.msk [vmem:[#allocation3 + $0x38] sm:$0xff] %vm226_vm0, %v5981_v0  ;;  %2257 = vst.msk [vmem:[#allocation3 + $0x58] sm:$0xff] %vm226_vm0, %v5981_v0 }
  0x2f   : > { %2258 = vst.msk [vmem:[#allocation3 + $0x78] sm:$0xff] %vm226_vm0, %v5981_v0  ;;  %2259 = vst.msk [vmem:[#allocation3 + $0x98] sm:$0xff] %vm226_vm0, %v5981_v0 }
  0x30   : > { %2260 = vst.msk [vmem:[#allocation3 + $0xb8] sm:$0xff] %vm226_vm0, %v5981_v0  ;;  %2261 = vst.msk [vmem:[#allocation3 + $0xd8] sm:$0xff] %vm226_vm0, %v5981_v0 }
  0x31   : > { %2262 = vst.msk [vmem:[#allocation3 + $0xf8] sm:$0xff] %vm226_vm0, %v5981_v0  ;;  %2263 = vst.msk [vmem:[#allocation3 + $0x118] sm:$0xff] %vm226_vm0, %v5981_v0 }
  0x32   : > { %2264 = vst.msk [vmem:[#allocation3 + $0x138] sm:$0xff] %vm226_vm0, %v5981_v0  ;;  %2265 = vst.msk [vmem:[#allocation3 + $0x158] sm:$0xff] %vm226_vm0, %v5981_v0 }
  0x33   : > { %2266 = vst.msk [vmem:[#allocation3 + $0x178] sm:$0xff] %vm226_vm0, %v5981_v0  ;;  %2267 = vst.msk [vmem:[#allocation3 + $0x198] sm:$0xff] %vm226_vm0, %v5981_v0 }
  0x34   : > { %2268 = vst.msk [vmem:[#allocation3 + $0x1b8] sm:$0xff] %vm226_vm0, %v5981_v0  ;;  %2269 = vst.msk [vmem:[#allocation3 + $0x1d8] sm:$0xff] %vm226_vm0, %v5981_v0 }
  0x35   : > { %2270 = vst.msk [vmem:[#allocation3 + $0x1f8] sm:$0xff] %vm226_vm0, %v5981_v0  ;;  %2271 = vst.msk [vmem:[#allocation3 + $0x218] sm:$0xff] %vm226_vm0, %v5981_v0 }
  0x36   : > { %335 = vst.msk [vmem:[#allocation2 + $0x48] sm:$0xff] %vm226_vm0, %v4402_v4  ;;  %336 = vst.msk [vmem:[#allocation2 + $0x50] sm:$0xff] %vm226_vm0, %v4403_v5 }
  0x37   : > { %333 = vst.msk [vmem:[#allocation2 + $0x28] sm:$0xff] %vm226_vm0, %v4398_v6  ;;  %334 = vst.msk [vmem:[#allocation2 + $0x30] sm:$0xff] %vm226_vm0, %v4399_v7 }
  0x38   : > { %337 = vst.msk [vmem:[#allocation2 + $0x68] sm:$0xff] %vm226_vm0, %v4406_v13  ;;  %338 = vst.msk [vmem:[#allocation2 + $0x70] sm:$0xff] %vm226_vm0, %v4407_v14 }
  0x39   : > { %339 = vst.msk [vmem:[#allocation2 + $0x88] sm:$0xff] %vm226_vm0, %v4410_v15  ;;  %340 = vst.msk [vmem:[#allocation2 + $0x90] sm:$0xff] %vm226_vm0, %v4411_v16 }
  0x3a   : > { %341 = vst.msk [vmem:[#allocation2 + $0xa8] sm:$0xff] %vm226_vm0, %v4414_v19  ;;  %342 = vst.msk [vmem:[#allocation2 + $0xb0] sm:$0xff] %vm226_vm0, %v4415_v20 }
  0x3b   : > { %343 = vst.msk [vmem:[#allocation2 + $0xc8] sm:$0xff] %vm226_vm0, %v4418_v21  ;;  %344 = vst.msk [vmem:[#allocation2 + $0xd0] sm:$0xff] %vm226_vm0, %v4419_v25 }
  0x3c   : > { %345 = vst.msk [vmem:[#allocation2 + $0xe8] sm:$0xff] %vm226_vm0, %v4422_v26  ;;  %346 = vst.msk [vmem:[#allocation2 + $0xf0] sm:$0xff] %vm226_vm0, %v4423_v27 }
  0x3d   : > { %347 = vst.msk [vmem:[#allocation2 + $0x108] sm:$0xff] %vm226_vm0, %v4426_v28  ;;  %348 = vst.msk [vmem:[#allocation2 + $0x110] sm:$0xff] %vm226_vm0, %v4427_v32  ;;  %v401_v52 = vld [vmem:[#allocation2 + $0x48] sm:$0xff]  ;;  %v402_v53 = vld [vmem:[#allocation2 + $0x50] sm:$0xff] }
  0x3e   : > { %349 = vst.msk [vmem:[#allocation2 + $0x128] sm:$0xff] %vm226_vm0, %v4430_v33  ;;  %350 = vst.msk [vmem:[#allocation2 + $0x130] sm:$0xff] %vm226_vm0, %v4431_v34  ;;  %v399_v54 = vld [vmem:[#allocation2 + $0x28] sm:$0xff]  ;;  %v6253_v55 = vpack.i.bf16 %v402_v53, %v401_v52  ;;  %v400_v56 = vld [vmem:[#allocation2 + $0x30] sm:$0xff] }
  0x3f   : > { %351 = vst.msk [vmem:[#allocation2 + $0x148] sm:$0xff] %vm226_vm0, %v4434_v35  ;;  %352 = vst.msk [vmem:[#allocation2 + $0x150] sm:$0xff] %vm226_vm0, %v4435_v38  ;;  %v403_v57 = vld [vmem:[#allocation2 + $0x68] sm:$0xff]  ;;  %v404_v58 = vld [vmem:[#allocation2 + $0x70] sm:$0xff]  ;;  %v6257_v59 = vpack.i.bf16 %v400_v56, %v399_v54 }
  0x40   : > { %353 = vst.msk [vmem:[#allocation2 + $0x168] sm:$0xff] %vm226_vm0, %v4438_v39  ;;  %354 = vst.msk [vmem:[#allocation2 + $0x170] sm:$0xff] %vm226_vm0, %v4439_v40  ;;  %v405_v60 = vld [vmem:[#allocation2 + $0x88] sm:$0xff]  ;;  %v406_v61 = vld [vmem:[#allocation2 + $0x90] sm:$0xff]  ;;  %4698 = vrot.lane.b32.xlu1 %v6253_v55, %s5982_s25  ;;  %v6261_v62 = vpack.i.bf16 %v404_v58, %v403_v57 }
  0x41   : > { %355 = vst.msk [vmem:[#allocation2 + $0x188] sm:$0xff] %vm226_vm0, %v4442_v41  ;;  %356 = vst.msk [vmem:[#allocation2 + $0x190] sm:$0xff] %vm226_vm0, %v4443_v43  ;;  %4693 = vrot.lane.b32.xlu0 %v6257_v59, %s5982_s25  ;;  %v6265_v63 = vpack.i.bf16 %v406_v61, %v405_v60  ;;  %v407_v0 = vld [vmem:[#allocation2 + $0xa8] sm:$0xff]  ;;  %v408_v1 = vld [vmem:[#allocation2 + $0xb0] sm:$0xff] }
  0x42   : > { %357 = vst.msk [vmem:[#allocation2 + $0x1a8] sm:$0xff] %vm226_vm0, %v4446_v44  ;;  %358 = vst.msk [vmem:[#allocation2 + $0x1b0] sm:$0xff] %vm226_vm0, %v4447_v45  ;;  %v409_v2 = vld [vmem:[#allocation2 + $0xc8] sm:$0xff]  ;;  %v410_v3 = vld [vmem:[#allocation2 + $0xd0] sm:$0xff]  ;;  %v6269_v4 = vpack.i.bf16 %v408_v1, %v407_v0 }
  0x43   : > { %359 = vst.msk [vmem:[#allocation2 + $0x1c8] sm:$0xff] %vm226_vm0, %v4450_v46  ;;  %360 = vst.msk [vmem:[#allocation2 + $0x1d0] sm:$0xff] %vm226_vm0, %v4451_v47  ;;  %v6273_v5 = vpack.i.bf16 %v410_v3, %v409_v2  ;;  %v411_v6 = vld [vmem:[#allocation2 + $0xe8] sm:$0xff]  ;;  %v412_v7 = vld [vmem:[#allocation2 + $0xf0] sm:$0xff] }
  0x44   : > { %361 = vst.msk [vmem:[#allocation2 + $0x1e8] sm:$0xff] %vm226_vm0, %v4454_v48  ;;  %362 = vst.msk [vmem:[#allocation2 + $0x1f0] sm:$0xff] %vm226_vm0, %v4455_v49  ;;  %4703 = vrot.lane.b32.xlu1 %v6261_v62, %s5982_s25  ;;  %v413_v8 = vld [vmem:[#allocation2 + $0x108] sm:$0xff]  ;;  %v414_v9 = vld [vmem:[#allocation2 + $0x110] sm:$0xff]  ;;  %v6277_v10 = vpack.i.bf16 %v412_v7, %v411_v6 }
  0x45   : > { %363 = vst.msk [vmem:[#allocation2 + $0x208] sm:$0xff] %vm226_vm0, %v4458_v50  ;;  %364 = vst.msk [vmem:[#allocation2 + $0x210] sm:$0xff] %vm226_vm0, %v4459_v51  ;;  %4708 = vrot.lane.b32.xlu0 %v6265_v63, %s5982_s25  ;;  %v6281_v11 = vpack.i.bf16 %v414_v9, %v413_v8  ;;  %v415_v12 = vld [vmem:[#allocation2 + $0x128] sm:$0xff]  ;;  %v416_v13 = vld [vmem:[#allocation2 + $0x130] sm:$0xff] }
  0x46   : > { %v417_v14 = vld [vmem:[#allocation2 + $0x148] sm:$0xff]  ;;  %v418_v15 = vld [vmem:[#allocation2 + $0x150] sm:$0xff]  ;;  %v6285_v16 = vpack.i.bf16 %v416_v13, %v415_v12 }
  0x47   : > { %v6289_v17 = vpack.i.bf16 %v418_v15, %v417_v14  ;;  %v419_v18 = vld [vmem:[#allocation2 + $0x168] sm:$0xff]  ;;  %v420_v19 = vld [vmem:[#allocation2 + $0x170] sm:$0xff] }
  0x48   : > { %4713 = vrot.lane.b32.xlu1 %v6269_v4, %s5982_s25  ;;  %v421_v20 = vld [vmem:[#allocation2 + $0x188] sm:$0xff]  ;;  %v422_v21 = vld [vmem:[#allocation2 + $0x190] sm:$0xff]  ;;  %v6293_v22 = vpack.i.bf16 %v420_v19, %v419_v18 }
  0x49   : > { %4718 = vrot.lane.b32.xlu0 %v6273_v5, %s5982_s25  ;;  %v6297_v23 = vpack.i.bf16 %v422_v21, %v421_v20  ;;  %v423_v24 = vld [vmem:[#allocation2 + $0x1a8] sm:$0xff]  ;;  %v424_v25 = vld [vmem:[#allocation2 + $0x1b0] sm:$0xff] }
  0x4a   : > { %v425_v26 = vld [vmem:[#allocation2 + $0x1c8] sm:$0xff]  ;;  %v426_v27 = vld [vmem:[#allocation2 + $0x1d0] sm:$0xff]  ;;  %v6301_v28 = vpack.i.bf16 %v424_v25, %v423_v24 }
  0x4b   : > { %v6305_v29 = vpack.i.bf16 %v426_v27, %v425_v26  ;;  %v427_v30 = vld [vmem:[#allocation2 + $0x1e8] sm:$0xff]  ;;  %v428_v31 = vld [vmem:[#allocation2 + $0x1f0] sm:$0xff] }
  0x4c   : > { %4723 = vrot.lane.b32.xlu1 %v6277_v10, %s5982_s25  ;;  %v429_v32 = vld [vmem:[#allocation2 + $0x9] sm:$0xff]  ;;  %v430_v33 = vld [vmem:[#allocation2 + $0x11] sm:$0xff]  ;;  %v6309_v34 = vpack.i.bf16 %v428_v31, %v427_v30 }
  0x4d   : > { %4728 = vrot.lane.b32.xlu0 %v6281_v11, %s5982_s25  ;;  %v4767_v35 = vpack.i.bf16 %v430_v33, %v429_v32  ;;  %v431_v36 = vld [vmem:[#allocation2 + $0x29] sm:$0xff]  ;;  %v432_v37 = vld [vmem:[#allocation2 + $0x31] sm:$0xff] }
  0x4e   : > { %v433_v38 = vld [vmem:[#allocation2 + $0x49] sm:$0xff]  ;;  %v434_v39 = vld [vmem:[#allocation2 + $0x51] sm:$0xff]  ;;  %v6315_v40 = vpack.i.bf16 %v432_v37, %v431_v36 }
  0x4f   : > { %v6318_v41 = vpack.i.bf16 %v434_v39, %v433_v38  ;;  %v435_v42 = vld [vmem:[#allocation2 + $0x69] sm:$0xff]  ;;  %v436_v43 = vld [vmem:[#allocation2 + $0x71] sm:$0xff] }
  0x50   : > { %4733 = vrot.lane.b32.xlu1 %v6285_v16, %s5982_s25  ;;  %v437_v44 = vld [vmem:[#allocation2 + $0x89] sm:$0xff]  ;;  %v438_v45 = vld [vmem:[#allocation2 + $0x91] sm:$0xff]  ;;  %v6322_v46 = vpack.i.bf16 %v436_v43, %v435_v42 }
  0x51   : > { %4738 = vrot.lane.b32.xlu0 %v6289_v17, %s5982_s25  ;;  %v6326_v47 = vpack.i.bf16 %v438_v45, %v437_v44  ;;  %v439_v48 = vld [vmem:[#allocation2 + $0xa9] sm:$0xff]  ;;  %v440_v49 = vld [vmem:[#allocation2 + $0xb1] sm:$0xff] }
  0x52   : > { %v441_v50 = vld [vmem:[#allocation2 + $0xc9] sm:$0xff]  ;;  %v442_v51 = vld [vmem:[#allocation2 + $0xd1] sm:$0xff]  ;;  %v6330_v52 = vpack.i.bf16 %v440_v49, %v439_v48 }
  0x53   : > { %v6334_v53 = vpack.i.bf16 %v442_v51, %v441_v50  ;;  %v443_v54 = vld [vmem:[#allocation2 + $0xe9] sm:$0xff]  ;;  %v444_v56 = vld [vmem:[#allocation2 + $0xf1] sm:$0xff] }
  0x54   : > { %4743 = vrot.lane.b32.xlu1 %v6293_v22, %s5982_s25  ;;  %v445_v57 = vld [vmem:[#allocation2 + $0x109] sm:$0xff]  ;;  %v446_v58 = vld [vmem:[#allocation2 + $0x111] sm:$0xff]  ;;  %v6338_v60 = vpack.i.bf16 %v444_v56, %v443_v54 }
  0x55   : > { %4748 = vrot.lane.b32.xlu0 %v6297_v23, %s5982_s25  ;;  %v6342_v61 = vpack.i.bf16 %v446_v58, %v445_v57  ;;  %v447_v0 = vld [vmem:[#allocation2 + $0x129] sm:$0xff]  ;;  %v448_v1 = vld [vmem:[#allocation2 + $0x131] sm:$0xff] }
  0x56   : > { %v449_v2 = vld [vmem:[#allocation2 + $0x149] sm:$0xff]  ;;  %v450_v3 = vld [vmem:[#allocation2 + $0x151] sm:$0xff]  ;;  %v6346_v6 = vpack.i.bf16 %v448_v1, %v447_v0 }
  0x57   : > { %v6350_v7 = vpack.i.bf16 %v450_v3, %v449_v2  ;;  %v451_v8 = vld [vmem:[#allocation2 + $0x169] sm:$0xff]  ;;  %v452_v9 = vld [vmem:[#allocation2 + $0x171] sm:$0xff] }
  0x58   : > { %4753 = vrot.lane.b32.xlu1 %v6301_v28, %s5982_s25  ;;  %v453_v12 = vld [vmem:[#allocation2 + $0x189] sm:$0xff]  ;;  %v454_v13 = vld [vmem:[#allocation2 + $0x191] sm:$0xff]  ;;  %v6354_v14 = vpack.i.bf16 %v452_v9, %v451_v8 }
  0x59   : > { %4758 = vrot.lane.b32.xlu0 %v6305_v29, %s5982_s25  ;;  %v6358_v15 = vpack.i.bf16 %v454_v13, %v453_v12  ;;  %v455_v18 = vld [vmem:[#allocation2 + $0x1a9] sm:$0xff]  ;;  %v456_v19 = vld [vmem:[#allocation2 + $0x1b1] sm:$0xff] }
  0x5a   : > { %v457_v20 = vld [vmem:[#allocation2 + $0x1c9] sm:$0xff]  ;;  %v458_v21 = vld [vmem:[#allocation2 + $0x1d1] sm:$0xff]  ;;  %v6362_v24 = vpack.i.bf16 %v456_v19, %v455_v18 }
  0x5b   : > { %v6366_v25 = vpack.i.bf16 %v458_v21, %v457_v20  ;;  %v459_v26 = vld [vmem:[#allocation2 + $0x1e9] sm:$0xff]  ;;  %v460_v27 = vld [vmem:[#allocation2 + $0x1f1] sm:$0xff] }
  0x5c   : > { %4763 = vrot.lane.b32.xlu1 %v6309_v34, %s5982_s25  ;;  %v6368_v30 = vld [vmem:[#allocation2 + $0x27] sm:$0xff]  ;;  %v6370_v31 = vld [vmem:[#allocation2 + $0x2f] sm:$0xff]  ;;  %v6374_v32 = vpack.i.bf16 %v460_v27, %v459_v26 }
  0x5d   : > { %4768 = vrot.lane.b32.xlu0 %v4767_v35, %s5983_s26  ;;  %v4847_v33 = vpack.i.bf16 %v6370_v31, %v6368_v30  ;;  %v6380_v35 = vld [vmem:[#allocation2 + $0x47] sm:$0xff]  ;;  %v6382_v36 = vld [vmem:[#allocation2 + $0x4f] sm:$0xff] }
  0x5e   : > { %v6384_v37 = vld [vmem:[#allocation2 + $0x67] sm:$0xff]  ;;  %v6386_v38 = vld [vmem:[#allocation2 + $0x6f] sm:$0xff]  ;;  %v6392_v39 = vpack.i.bf16 %v6382_v36, %v6380_v35 }
  0x5f   : > { %v6397_v42 = vpack.i.bf16 %v6386_v38, %v6384_v37  ;;  %v6399_v43 = vld [vmem:[#allocation2 + $0x87] sm:$0xff]  ;;  %v6401_v44 = vld [vmem:[#allocation2 + $0x8f] sm:$0xff] }
  0x60   : > { %4773 = vrot.lane.b32.xlu1 %v6315_v40, %s5983_s26  ;;  %v6403_v45 = vld [vmem:[#allocation2 + $0xa7] sm:$0xff]  ;;  %v6405_v48 = vld [vmem:[#allocation2 + $0xaf] sm:$0xff]  ;;  %v6411_v49 = vpack.i.bf16 %v6401_v44, %v6399_v43 }
  0x61   : > { %4778 = vrot.lane.b32.xlu0 %v6318_v41, %s5983_s26  ;;  %v6417_v50 = vpack.i.bf16 %v6405_v48, %v6403_v45  ;;  %v6419_v51 = vld [vmem:[#allocation2 + $0xc7] sm:$0xff]  ;;  %v6421_v54 = vld [vmem:[#allocation2 + $0xcf] sm:$0xff] }
  0x62   : > { %v6423_v56 = vld [vmem:[#allocation2 + $0xe7] sm:$0xff]  ;;  %v6425_v57 = vld [vmem:[#allocation2 + $0xef] sm:$0xff]  ;;  %v6431_v58 = vpack.i.bf16 %v6421_v54, %v6419_v51 }
  0x63   : > { %8862 = vst [vmem:[#allocation4_spill] sm:$0xff] %v6423_v56  ;;  %v6437_v0 = vpack.i.bf16 %v6425_v57, %v6423_v56  ;;  %v6439_v1 = vld [vmem:[#allocation2 + $0x107] sm:$0xff]  ;;  %v6441_v2 = vld [vmem:[#allocation2 + $0x10f] sm:$0xff] }
  0x64   : > { %4783 = vrot.lane.b32.xlu1 %v6322_v46, %s5983_s26  ;;  %8863 = vst [vmem:[#allocation5_spill] sm:$0xff] %v6439_v1  ;;  %8864 = vst [vmem:[#allocation6_spill] sm:$0xff] %v6441_v2  ;;  %v6443_v3 = vld [vmem:[#allocation2 + $0x127] sm:$0xff]  ;;  %v6445_v8 = vld [vmem:[#allocation2 + $0x12f] sm:$0xff]  ;;  %v6451_v9 = vpack.i.bf16 %v6441_v2, %v6439_v1 }
  0x65   : > { %4788 = vrot.lane.b32.xlu0 %v6326_v47, %s5983_s26  ;;  %8865 = vst [vmem:[#allocation7_spill] sm:$0xff] %v6443_v3  ;;  %8866 = vst [vmem:[#allocation8_spill] sm:$0xff] %v6445_v8  ;;  %v6457_v12 = vpack.i.bf16 %v6445_v8, %v6443_v3  ;;  %v6459_v13 = vld [vmem:[#allocation2 + $0x147] sm:$0xff]  ;;  %v6461_v18 = vld [vmem:[#allocation2 + $0x14f] sm:$0xff] }
  0x66   : > { %8867 = vst [vmem:[#allocation9_spill] sm:$0xff] %v6459_v13  ;;  %8868 = vst [vmem:[#allocation10_spill] sm:$0xff] %v6461_v18  ;;  %v6463_v19 = vld [vmem:[#allocation2 + $0x167] sm:$0xff]  ;;  %v6465_v20 = vld [vmem:[#allocation2 + $0x16f] sm:$0xff]  ;;  %v6471_v21 = vpack.i.bf16 %v6461_v18, %v6459_v13 }
  0x67   : > { %8869 = vst [vmem:[#allocation11_spill] sm:$0xff] %v6463_v19  ;;  %8870 = vst [vmem:[#allocation12_spill] sm:$0xff] %v6465_v20  ;;  %v6477_v26 = vpack.i.bf16 %v6465_v20, %v6463_v19  ;;  %v6479_v27 = vld [vmem:[#allocation2 + $0x187] sm:$0xff]  ;;  %v6485_v8 = vld [vmem:[#allocation2 + $0x1af] sm:$0xff] }
  0x68   : > { %4793 = vrot.lane.b32.xlu1 %v6330_v52, %s5983_s26  ;;  %8871 = vst [vmem:[#allocation13_spill] sm:$0xff] %v6479_v27  ;;  %v6483_v3 = vld [vmem:[#allocation2 + $0x1a7] sm:$0xff]  ;;  %8874 = vst [vmem:[#allocation16_spill] sm:$0xff] %v6485_v8  ;;  %v6501_v18 = vld [vmem:[#allocation2 + $0x1cf] sm:$0xff] }
  0x69   : > { %4798 = vrot.lane.b32.xlu0 %v6334_v53, %s5983_s26  ;;  %8873 = vst [vmem:[#allocation15_spill] sm:$0xff] %v6483_v3  ;;  %v6497_v19 = vpack.i.bf16 %v6485_v8, %v6483_v3  ;;  %v6499_v20 = vld [vmem:[#allocation2 + $0x1c7] sm:$0xff]  ;;  %v6505_v2 = vld [vmem:[#allocation2 + $0x1ef] sm:$0xff] }
  0x6a   : > { %v6503_v1 = vld [vmem:[#allocation2 + $0x1e7] sm:$0xff] }
  0x6b   : > { %v6517_v3 = vpack.i.bf16 %v6505_v2, %v6503_v1  ;;  %v491_v8 = vld [vmem:[#allocation2 + $0x207] sm:$0xff] }
  0x6c   : > { %4803 = vrot.lane.b32.xlu1 %v6338_v60, %s5983_s26 }
  0x6d   : > { %4808 = vrot.lane.b32.xlu0 %v6342_v61, %s5983_s26 }
  0x70   : > { %4813 = vrot.lane.b32.xlu1 %v6346_v6, %s5983_s26 }
  0x71   : > { %4818 = vrot.lane.b32.xlu0 %v6350_v7, %s5983_s26 }
  0x74   : > { %4823 = vrot.lane.b32.xlu1 %v6354_v14, %s5983_s26 }
  0x75   : > { %4828 = vrot.lane.b32.xlu0 %v6358_v15, %s5983_s26 }
  0x78   : > { %4833 = vrot.lane.b32.xlu1 %v6362_v24, %s5983_s26 }
  0x79   : > { %4838 = vrot.lane.b32.xlu0 %v6366_v25, %s5983_s26 }
  0x7c   : > { %4843 = vrot.lane.b32.xlu1 %v6374_v32, %s5983_s26 }
  0x7d   : > { %4848 = vrot.lane.b32.xlu0 %v4847_v33, %s5984_s27  ;;  %v6481_v33 = vld [vmem:[#allocation2 + $0x18f] sm:$0xff] }
  0x7e   : > { %8872 = vst [vmem:[#allocation14_spill] sm:$0xff] %v6481_v33  ;;  %v6491_v13 = vpack.i.bf16 %v6481_v33, %v6479_v27  ;;  %v6511_v27 = vpack.i.bf16 %v6501_v18, %v6499_v20  ;;  %v492_v33 = vld [vmem:[#allocation2 + $0x20f] sm:$0xff] }
  0x7f   : > { %v6521_v56 = vpack.i.bf16 %v492_v33, %v491_v8 }
  0x80   : > { %4853 = vrot.lane.b32.xlu1 %v6392_v39, %s5984_s27 }
  0x81   : > { %4858 = vrot.lane.b32.xlu0 %v6397_v42, %s5984_s27 }
  0x84   : > { %4863 = vrot.lane.b32.xlu1 %v6411_v49, %s5984_s27 }
  0x85   : > { %4868 = vrot.lane.b32.xlu0 %v6417_v50, %s5984_s27 }
  0x88   : > { %4873 = vrot.lane.b32.xlu1 %v6431_v58, %s5984_s27 }
  0x89   : > { %4878 = vrot.lane.b32.xlu0 %v6437_v0, %s5984_s27 }
  0x8c   : > { %4883 = vrot.lane.b32.xlu1 %v6451_v9, %s5984_s27 }
  0x8d   : > { %4888 = vrot.lane.b32.xlu0 %v6457_v12, %s5984_s27 }
  0x90   : > { %4893 = vrot.lane.b32.xlu1 %v6471_v21, %s5984_s27 }
  0x91   : > { %4898 = vrot.lane.b32.xlu0 %v6477_v26, %s5984_s27 }
  0x94   : > { %4903 = vrot.lane.b32.xlu1 %v6491_v13, %s5984_s27 }
  0x95   : > { %4908 = vrot.lane.b32.xlu0 %v6497_v19, %s5984_s27 }
  0x98   : > { %4913 = vrot.lane.b32.xlu1 %v6511_v27, %s5984_s27 }
  0x99   : > { %4918 = vrot.lane.b32.xlu0 %v6517_v3, %s5984_s27 }
  0x9c   : > { %4923 = vrot.lane.b32.xlu1 %v6521_v56, %s5984_s27 }
  0x9d   : > { %4928 = vrot.lane.b32.xlu0 %v6257_v59, %s5985_s28 }
  0xa0   : > { %4933 = vrot.lane.b32.xlu1 %v6253_v55, %s5985_s28  ;;  %v6545_v55 = vpop.permute.xlu0 %4688 }
  0xa1   : > { %4938 = vrot.lane.b32.xlu0 %v6261_v62, %s5985_s28 }
  0xa4   : > { %4943 = vrot.lane.b32.xlu1 %v6265_v63, %s5985_s28  ;;  %v523_v63 = vld [vmem:[#allocation2 + $0x208] sm:$0xff] }
  0xa5   : > { %4948 = vrot.lane.b32.xlu0 %v6269_v4, %s5985_s28  ;;  %v524_v4 = vld [vmem:[#allocation2 + $0x210] sm:$0xff] }
  0xa8   : > { %4953 = vrot.lane.b32.xlu1 %v6273_v5, %s5985_s28 }
  0xa9   : > { %4958 = vrot.lane.b32.xlu0 %v6277_v10, %s5985_s28 }
  0xac   : > { %4963 = vrot.lane.b32.xlu1 %v6281_v11, %s5985_s28  ;;  %v5002_v11 = vpack.i.bf16 %v524_v4, %v523_v63 }
  0xad   : > { %4968 = vrot.lane.b32.xlu0 %v6285_v16, %s5985_s28 }
  0xb0   : > { %4973 = vrot.lane.b32.xlu1 %v6289_v17, %s5985_s28 }
  0xb1   : > { %4978 = vrot.lane.b32.xlu0 %v6293_v22, %s5985_s28 }
  0xb2   : > { %v6551_v59 = vpop.permute.xlu1 %4698 }
  0xb3   : > { %v6553_v62 = vpop.permute.xlu0 %4693 }
  0xb4   : > { %4983 = vrot.lane.b32.xlu1 %v6297_v23, %s5985_s28 }
  0xb5   : > { %4988 = vrot.lane.b32.xlu0 %v6301_v28, %s5985_s28 }
  0xb6   : > { %v6559_v5 = vpop.permute.xlu1 %4703 }
  0xb7   : > { %v6561_v10 = vpop.permute.xlu0 %4708 }
  0xb8   : > { %4993 = vrot.lane.b32.xlu1 %v6305_v29, %s5985_s28 }
  0xb9   : > { %4998 = vrot.lane.b32.xlu0 %v6309_v34, %s5985_s28 }
  0xba   : > { %v6567_v16 = vpop.permute.xlu1 %4713 }
  0xbb   : > { %v6569_v17 = vpop.permute.xlu0 %4718 }
  0xbc   : > { %5003 = vrot.lane.b32.xlu1 %v5002_v11, %s5985_s28  ;;  %v589_v11 = vld [vmem:[#allocation2 + $0x22f] sm:$0xff] }
  0xbd   : > { %5008 = vrot.lane.b32.xlu0 %v6315_v40, %s5986_s29 }
  0xbe   : > { %v6574_v22 = vpop.permute.xlu1 %4723 }
  0xbf   : > { %v6576_v23 = vpop.permute.xlu0 %4728 }
  0xc0   : > { %5013 = vrot.lane.b32.xlu1 %v6318_v41, %s5986_s29 }
  0xc1   : > { %5018 = vrot.lane.b32.xlu0 %v6322_v46, %s5986_s29 }
  0xc2   : > { %v6582_v28 = vpop.permute.xlu1 %4733 }
  0xc3   : > { %v6584_v29 = vpop.permute.xlu0 %4738 }
  0xc4   : > { %5023 = vrot.lane.b32.xlu1 %v6326_v47, %s5986_s29 }
  0xc5   : > { %5028 = vrot.lane.b32.xlu0 %v6330_v52, %s5986_s29 }
  0xc6   : > { %v6590_v34 = vpop.permute.xlu1 %4743 }
  0xc7   : > { %v6592_v40 = vpop.permute.xlu0 %4748 }
  0xc8   : > { %5033 = vrot.lane.b32.xlu1 %v6334_v53, %s5986_s29 }
  0xc9   : > { %5038 = vrot.lane.b32.xlu0 %v6338_v60, %s5986_s29 }
  0xca   : > { %v6598_v41 = vpop.permute.xlu1 %4753 }
  0xcb   : > { %v6600_v46 = vpop.permute.xlu0 %4758 }
  0xcc   : > { %5043 = vrot.lane.b32.xlu1 %v6342_v61, %s5986_s29  ;;  %v555_v61 = vld [vmem:[#allocation2 + $0x209] sm:$0xff] }
  0xcd   : > { %5048 = vrot.lane.b32.xlu0 %v6346_v6, %s5986_s29  ;;  %v556_v6 = vld [vmem:[#allocation2 + $0x211] sm:$0xff] }
  0xce   : > { %v6606_v47 = vpop.permute.xlu1 %4763 }
  0xcf   : > { %v6608_v52 = vpop.permute.xlu0 %4768 }
  0xd0   : > { %5053 = vrot.lane.b32.xlu1 %v6350_v7, %s5986_s29  ;;  %v6628_v7 = vpack.i.bf16 %v556_v6, %v555_v61  ;;  %v590_v61 = vld [vmem:[#allocation2 + $0x48] sm:$0xff]  ;;  %v591_v6 = vld [vmem:[#allocation2 + $0x50] sm:$0xff] }
  0xd1   : > { %5058 = vrot.lane.b32.xlu0 %v6354_v14, %s5986_s29 }
  0xd2   : > { %v6614_v53 = vpop.permute.xlu1 %4773 }
  0xd3   : > { %v6616_v60 = vpop.permute.xlu0 %4778 }
  0xd4   : > { %5063 = vrot.lane.b32.xlu1 %v6358_v15, %s5986_s29 }
  0xd5   : > { %5068 = vrot.lane.b32.xlu0 %v6362_v24, %s5986_s29 }
  0xd6   : > { %v6622_v8 = vpop.permute.xlu1 %4783 }
  0xd7   : > { %v6624_v33 = vpop.permute.xlu0 %4788 }
  0xd8   : > { %5073 = vrot.lane.b32.xlu1 %v6366_v25, %s5986_s29 }
  0xd9   : > { %5078 = vrot.lane.b32.xlu0 %v6374_v32, %s5986_s29 }
  0xda   : > { %v6632_v14 = vpop.permute.xlu1 %4793 }
  0xdb   : > { %v6634_v15 = vpop.permute.xlu0 %4798 }
  0xdc   : > { %5083 = vrot.lane.b32.xlu1 %v6628_v7, %s5986_s29 }
  0xdd   : > { %5088 = vrot.lane.b32.xlu0 %v6392_v39, %s5987_s30 }
  0xde   : > { %v6640_v24 = vpop.permute.xlu1 %4803 }
  0xdf   : > { %8875 = vst [vmem:[#allocation17_spill] sm:$0xff] %v6640_v24  ;;  %v6642_v63 = vpop.permute.xlu0 %4808 }
  0xe0   : > { %8876 = vst [vmem:[#allocation18_spill] sm:$0xff] %v6642_v63  ;;  %5093 = vrot.lane.b32.xlu1 %v6397_v42, %s5987_s30  ;;  %v621_v63 = vld [vmem:[#allocation2 + $0x230] sm:$0xff] }
  0xe1   : > { %5098 = vrot.lane.b32.xlu0 %v6411_v49, %s5987_s30 }
  0xe2   : > { %v6648_v25 = vpop.permute.xlu1 %4813 }
  0xe3   : > { %8877 = vst [vmem:[#allocation19_spill] sm:$0xff] %v6648_v25  ;;  %v6650_v32 = vpop.permute.xlu0 %4818  ;;  %v4710_v25 = vunpack.i.l.bf16 %v6561_v10 }
  0xe4   : > { %8878 = vst [vmem:[#allocation20_spill] sm:$0xff] %v6650_v32  ;;  %5103 = vrot.lane.b32.xlu1 %v6417_v50, %s5987_s30  ;;  %v4696_v32 = vunpack.i.h.bf16 %v6553_v62 }
  0xe5   : > { %5108 = vrot.lane.b32.xlu0 %v6431_v58, %s5987_s30 }
  0xe6   : > { %v6656_v39 = vpop.permute.xlu1 %4823 }
  0xe7   : > { %8879 = vst [vmem:[#allocation21_spill] sm:$0xff] %v6656_v39  ;;  %v6658_v4 = vpop.permute.xlu0 %4828 }
  0xe8   : > { %8880 = vst [vmem:[#allocation22_spill] sm:$0xff] %v6658_v4  ;;  %5113 = vrot.lane.b32.xlu1 %v6437_v0, %s5987_s30  ;;  %v5967_v0 = vld [vmem:[%s8786_s1] sm:$0xff]   ;;  %v617_v4 = vld [vmem:[#allocation2 + $0x1f0] sm:$0xff] }
  0xe9   : > { %5118 = vrot.lane.b32.xlu0 %v6451_v9, %s5987_s30  ;;  %4592 = vmatprep.subr.bf16.mxu0 %v5967_v0 }
  0xea   : > { %v6664_v42 = vpop.permute.xlu1 %4833  ;;  %4593 = vmatpush3.bf16.msra.mxu0 %v5967_v0 }
  0xeb   : > { %8881 = vst [vmem:[#allocation23_spill] sm:$0xff] %v6664_v42  ;;  %v6666_v49 = vpop.permute.xlu0 %4838 }
  0xec   : > { %8882 = vst [vmem:[#allocation24_spill] sm:$0xff] %v6666_v49  ;;  %5123 = vrot.lane.b32.xlu1 %v6457_v12, %s5987_s30 }
  0xed   : > { %5128 = vrot.lane.b32.xlu0 %v6471_v21, %s5987_s30  ;;  %v5968_v21 = vld [vmem:[%s8786_s1 + $0x8] sm:$0xff]  }
  0xee   : > { %v6672_v50 = vpop.permute.xlu1 %4843  ;;  %4594 = vmatprep.subr.bf16.mxu0 %v5968_v21 }
  0xef   : > { %8883 = vst [vmem:[#allocation25_spill] sm:$0xff] %v6672_v50  ;;  %v6674_v58 = vpop.permute.xlu0 %4848  ;;  %4595 = vmatpush3.bf16.msra.mxu0 %v5968_v21  ;;  %v623_v50 = vld [vmem:[#allocation2 + $0x51] sm:$0xff] }
  0xf0   : > { %8884 = vst [vmem:[#allocation26_spill] sm:$0xff] %v6674_v58  ;;  %5133 = vrot.lane.b32.xlu1 %v6477_v26, %s5987_s30  ;;  %v588_v26 = vld [vmem:[#allocation2 + $0x227] sm:$0xff] }
  0xf1   : > { %5138 = vrot.lane.b32.xlu0 %v6491_v13, %s5987_s30  ;;  %v622_v58 = vld [vmem:[#allocation2 + $0x49] sm:$0xff] }
  0xf2   : > { %v6683_v9 = vpop.permute.xlu1 %4853 }
  0xf3   : > { %8885 = vst [vmem:[#allocation27_spill] sm:$0xff] %v6683_v9  ;;  %v6685_v12 = vpop.permute.xlu0 %4858  ;;  %v592_v9 = vld [vmem:[#allocation2 + $0x68] sm:$0xff] }
  0xf4   : > { %8886 = vst [vmem:[#allocation28_spill] sm:$0xff] %v6685_v12  ;;  %5143 = vrot.lane.b32.xlu1 %v6497_v19, %s5987_s30  ;;  %v5969_v12 = vld [vmem:[%s8786_s1 + $0x10] ss:$0 sps:$4 sm:$0x33]   ;;  %v5162_v19 = vpack.i.bf16 %v589_v11, %v588_v26  ;;  %v625_v11 = vld [vmem:[#allocation2 + $0x71] sm:$0xff] }
  0xf5   : > { %5148 = vrot.lane.b32.xlu0 %v6511_v27, %s5987_s30  ;;  %v5167_v27 = vpack.i.bf16 %v591_v6, %v590_v61  ;;  %4668 = vmatprep.subr.msk.bf16.mxu0 %vm2033_vm1, %v5969_v12  ;;  %v2035_v21 = vsel %vm2033_vm1, %v5969_v12, 0  ;;  %v624_v26 = vld [vmem:[#allocation2 + $0x69] sm:$0xff] }
  0xf6   : > { %v6694_v13 = vpop.permute.xlu1 %4863  ;;  %4597 = vmatpush3.bf16.msra.mxu0 %v2035_v21  ;;  %v594_v6 = vld [vmem:[#allocation2 + $0x88] sm:$0xff]  ;;  %v595_v12 = vld [vmem:[#allocation2 + $0x90] sm:$0xff]  ;;  %v5182_v21 = vpack.i.bf16 %v625_v11, %v624_v26 }
  0xf7   : > { %8887 = vst [vmem:[#allocation29_spill] sm:$0xff] %v6694_v13  ;;  %v6696_v0 = vpop.permute.xlu0 %4868  ;;  %v593_v13 = vld [vmem:[#allocation2 + $0x70] sm:$0xff] }
  0xf8   : > { %8888 = vst [vmem:[#allocation30_spill] sm:$0xff] %v6696_v0  ;;  %5153 = vrot.lane.b32.xlu1 %v6517_v3, %s5987_s30  ;;  %v5172_v3 = vpack.i.bf16 %v593_v13, %v592_v9  ;;  %v596_v9 = vld [vmem:[#allocation2 + $0xa8] sm:$0xff]  ;;  %v597_v13 = vld [vmem:[#allocation2 + $0xb0] sm:$0xff] }
  0xf9   : > { %5158 = vrot.lane.b32.xlu0 %v6521_v56, %s5987_s30  ;;  %v5177_v56 = vpack.i.bf16 %v623_v50, %v622_v58  ;;  %v626_v50 = vld [vmem:[#allocation2 + $0x89] sm:$0xff]  ;;  %v627_v58 = vld [vmem:[#allocation2 + $0x91] sm:$0xff] }
  0xfa   : > { %v6707_v0 = vpop.permute.xlu1 %4873  ;;  %v629_v26 = vld [vmem:[#allocation2 + $0xb1] sm:$0xff] }
  0xfb   : > { %8889 = vst [vmem:[#allocation31_spill] sm:$0xff] %v6707_v0  ;;  %v6709_v49 = vpop.permute.xlu0 %4878  ;;  %v600_v0 = vld [vmem:[#allocation2 + $0xe8] sm:$0xff] }
  0xfc   : > { %8890 = vst [vmem:[#allocation32_spill] sm:$0xff] %v6709_v49  ;;  %5163 = vrot.lane.b32.xlu1 %v5162_v19, %s5987_s30  ;;  %v5187_v19 = vpack.i.bf16 %v595_v12, %v594_v6  ;;  %v599_v6 = vld [vmem:[#allocation2 + $0xd0] sm:$0xff] }
  0xfd   : > { %5168 = vrot.lane.b32.xlu0 %v5167_v27, %s5988_s12 }
  0xfe   : > { %v6713_v61 = vpop.permute.xlu1 %4883 }
  0xff   : > { %8891 = vst [vmem:[#allocation33_spill] sm:$0xff] %v6713_v61  ;;  %v6715_v42 = vpop.permute.xlu0 %4888  ;;  %v5192_v61 = vpack.i.bf16 %v597_v13, %v596_v9  ;;  %v631_v13 = vld [vmem:[#allocation2 + $0xd1] sm:$0xff] }
 0x100   : > { %8892 = vst [vmem:[#allocation34_spill] sm:$0xff] %v6715_v42  ;;  %5173 = vrot.lane.b32.xlu1 %v5172_v3, %s5988_s12  ;;  %v5197_v42 = vpack.i.bf16 %v627_v58, %v626_v50  ;;  %v628_v3 = vld [vmem:[#allocation2 + $0xa9] sm:$0xff] }
 0x101   : > { %5178 = vrot.lane.b32.xlu0 %v5177_v56, %s5989_s13  ;;  %v598_v56 = vld [vmem:[#allocation2 + $0xc8] sm:$0xff] }
 0x102   : > { %v6719_v49 = vpop.permute.xlu1 %4893 }
 0x103   : > { %8893 = vst [vmem:[#allocation35_spill] sm:$0xff] %v6719_v49  ;;  %v6721_v27 = vpop.permute.xlu0 %4898  ;;  %v5202_v49 = vpack.i.bf16 %v629_v26, %v628_v3  ;;  %v603_v26 = vld [vmem:[#allocation2 + $0x110] sm:$0xff] }
 0x104   : > { %8894 = vst [vmem:[#allocation36_spill] sm:$0xff] %v6721_v27  ;;  %5183 = vrot.lane.b32.xlu1 %v5182_v21, %s5989_s13  ;;  %v5207_v27 = vpack.i.bf16 %v599_v6, %v598_v56  ;;  %v601_v21 = vld [vmem:[#allocation2 + $0xf0] sm:$0xff] }
 0x105   : > { %5188 = vrot.lane.b32.xlu0 %v5187_v19, %s5988_s12  ;;  %v630_v19 = vld [vmem:[#allocation2 + $0xc9] sm:$0xff]  ;;  %v5212_v58 = vpack.i.bf16 %v601_v21, %v600_v0  ;;  %v635_v21 = vld [vmem:[#allocation2 + $0x111] sm:$0xff] }
 0x106   : > { %v6725_v11 = vpop.permute.xlu1 %4903 }
 0x107   : > { %8895 = vst [vmem:[#allocation37_spill] sm:$0xff] %v6725_v11  ;;  %v6727_v12 = vpop.permute.xlu0 %4908  ;;  %v632_v11 = vld [vmem:[#allocation2 + $0xe9] sm:$0xff] }
 0x108   : > { %8896 = vst [vmem:[#allocation38_spill] sm:$0xff] %v6727_v12  ;;  %5193 = vrot.lane.b32.xlu1 %v5192_v61, %s5988_s12  ;;  %v5217_v12 = vpack.i.bf16 %v631_v13, %v630_v19  ;;  %v633_v61 = vld [vmem:[#allocation2 + $0xf1] sm:$0xff] }
 0x109   : > { %5198 = vrot.lane.b32.xlu0 %v5197_v42, %s5989_s13  ;;  %v602_v42 = vld [vmem:[#allocation2 + $0x108] sm:$0xff]  ;;  %v5222_v6 = vpack.i.bf16 %v633_v61, %v632_v11  ;;  %v607_v61 = vld [vmem:[#allocation2 + $0x150] sm:$0xff] }
 0x10a   : > { %v6731_v9 = vpop.permute.xlu1 %4913 }
 0x10b   : > { %8897 = vst [vmem:[#allocation39_spill] sm:$0xff] %v6731_v9  ;;  %v6733_v50 = vpop.permute.xlu0 %4918  ;;  %v604_v9 = vld [vmem:[#allocation2 + $0x128] sm:$0xff] }
 0x10c   : > { %8898 = vst [vmem:[#allocation40_spill] sm:$0xff] %v6733_v50  ;;  %5203 = vrot.lane.b32.xlu1 %v5202_v49, %s5989_s13  ;;  %v5227_v50 = vpack.i.bf16 %v603_v26, %v602_v42  ;;  %v605_v49 = vld [vmem:[#allocation2 + $0x130] sm:$0xff] }
 0x10d   : > { %5208 = vrot.lane.b32.xlu0 %v5207_v27, %s5988_s12  ;;  %v634_v27 = vld [vmem:[#allocation2 + $0x109] sm:$0xff]  ;;  %v5232_v13 = vpack.i.bf16 %v605_v49, %v604_v9  ;;  %v639_v49 = vld [vmem:[#allocation2 + $0x151] sm:$0xff] }
 0x10e   : > { %v6737_v3 = vpop.permute.xlu1 %4923 }
 0x10f   : > { %8899 = vst [vmem:[#allocation41_spill] sm:$0xff] %v6737_v3  ;;  %v6739_v56 = vpop.permute.xlu0 %4928  ;;  %v636_v3 = vld [vmem:[#allocation2 + $0x129] sm:$0xff] }
 0x110   : > { %8900 = vst [vmem:[#allocation42_spill] sm:$0xff] %v6739_v56  ;;  %5213 = vrot.lane.b32.xlu1 %v5212_v58, %s5988_s12  ;;  %v5237_v56 = vpack.i.bf16 %v635_v21, %v634_v27  ;;  %v637_v58 = vld [vmem:[#allocation2 + $0x131] sm:$0xff] }
 0x111   : > { %5218 = vrot.lane.b32.xlu0 %v5217_v12, %s5989_s13  ;;  %v606_v12 = vld [vmem:[#allocation2 + $0x148] sm:$0xff]  ;;  %v5242_v26 = vpack.i.bf16 %v637_v58, %v636_v3  ;;  %v611_v58 = vld [vmem:[#allocation2 + $0x190] sm:$0xff] }
 0x112   : > { %v6743_v0 = vpop.permute.xlu1 %4933 }
 0x113   : > { %8901 = vst [vmem:[#allocation43_spill] sm:$0xff] %v6743_v0  ;;  %v6745_v19 = vpop.permute.xlu0 %4938  ;;  %v608_v0 = vld [vmem:[#allocation2 + $0x168] sm:$0xff] }
 0x114   : > { %8902 = vst [vmem:[#allocation44_spill] sm:$0xff] %v6745_v19  ;;  %5223 = vrot.lane.b32.xlu1 %v5222_v6, %s5989_s13  ;;  %v5247_v19 = vpack.i.bf16 %v607_v61, %v606_v12  ;;  %v609_v6 = vld [vmem:[#allocation2 + $0x170] sm:$0xff] }
 0x115   : > { %5228 = vrot.lane.b32.xlu0 %v5227_v50, %s5988_s12  ;;  %v638_v50 = vld [vmem:[#allocation2 + $0x149] sm:$0xff]  ;;  %v5252_v21 = vpack.i.bf16 %v609_v6, %v608_v0  ;;  %v643_v6 = vld [vmem:[#allocation2 + $0x191] sm:$0xff] }
 0x116   : > { %v6749_v11 = vpop.permute.xlu1 %4943 }
 0x117   : > { %8903 = vst [vmem:[#allocation45_spill] sm:$0xff] %v6749_v11  ;;  %v6751_v42 = vpop.permute.xlu0 %4948  ;;  %v640_v11 = vld [vmem:[#allocation2 + $0x169] sm:$0xff] }
 0x118   : > { %8904 = vst [vmem:[#allocation46_spill] sm:$0xff] %v6751_v42  ;;  %5233 = vrot.lane.b32.xlu1 %v5232_v13, %s5988_s12  ;;  %v5257_v42 = vpack.i.bf16 %v639_v49, %v638_v50  ;;  %v641_v13 = vld [vmem:[#allocation2 + $0x171] sm:$0xff] }
 0x119   : > { %5238 = vrot.lane.b32.xlu0 %v5237_v56, %s5989_s13  ;;  %v610_v56 = vld [vmem:[#allocation2 + $0x188] sm:$0xff]  ;;  %v5262_v61 = vpack.i.bf16 %v641_v13, %v640_v11  ;;  %v615_v13 = vld [vmem:[#allocation2 + $0x1d0] sm:$0xff] }
 0x11a   : > { %v6755_v9 = vpop.permute.xlu1 %4953 }
 0x11b   : > { %8905 = vst [vmem:[#allocation47_spill] sm:$0xff] %v6755_v9  ;;  %v6757_v27 = vpop.permute.xlu0 %4958  ;;  %v612_v9 = vld [vmem:[#allocation2 + $0x1a8] sm:$0xff] }
 0x11c   : > { %8906 = vst [vmem:[#allocation48_spill] sm:$0xff] %v6757_v27  ;;  %5243 = vrot.lane.b32.xlu1 %v5242_v26, %s5989_s13  ;;  %v5267_v27 = vpack.i.bf16 %v611_v58, %v610_v56  ;;  %v613_v26 = vld [vmem:[#allocation2 + $0x1b0] sm:$0xff] }
 0x11d   : > { %5248 = vrot.lane.b32.xlu0 %v5247_v19, %s5988_s12  ;;  %v642_v19 = vld [vmem:[#allocation2 + $0x189] sm:$0xff]  ;;  %v5272_v49 = vpack.i.bf16 %v613_v26, %v612_v9 }
 0x11e   : > { %v6761_v3 = vpop.permute.xlu1 %4963  ;;  %v646_v26 = vld [vmem:[#allocation2 + $0x1c9] sm:$0xff] }
 0x11f   : > { %8907 = vst [vmem:[#allocation49_spill] sm:$0xff] %v6761_v3  ;;  %v6763_v12 = vpop.permute.xlu0 %4968  ;;  %v644_v3 = vld [vmem:[#allocation2 + $0x1a9] sm:$0xff] }
 0x120   : > { %8908 = vst [vmem:[#allocation50_spill] sm:$0xff] %v6763_v12  ;;  %5253 = vrot.lane.b32.xlu1 %v5252_v21, %s5988_s12  ;;  %v5277_v12 = vpack.i.bf16 %v643_v6, %v642_v19  ;;  %v645_v21 = vld [vmem:[#allocation2 + $0x1b1] sm:$0xff]  ;;  %v4691_v6 = vunpack.i.h.bf16 %v6545_v55 }
 0x121   : > { %5258 = vrot.lane.b32.xlu0 %v5257_v42, %s5989_s13  ;;  %v614_v42 = vld [vmem:[#allocation2 + $0x1c8] sm:$0xff]  ;;  %v5282_v58 = vpack.i.bf16 %v645_v21, %v644_v3  ;;  %v647_v19 = vld [vmem:[#allocation2 + $0x1d1] sm:$0xff]  ;;  %v4701_v3 = vunpack.i.h.bf16 %v6551_v59  ;;  %v4700_v21 = vunpack.i.l.bf16 %v6551_v59  ;;  %v4711_v59 = vunpack.i.h.bf16 %v6561_v10 }
 0x122   : > { %v6767_v0 = vpop.permute.xlu1 %4973  ;;  %v5287_v9 = vpack.i.bf16 %v615_v13, %v614_v42  ;;  %v649_v42 = vld [vmem:[#allocation2 + $0x1f1] sm:$0xff]  ;;  %v618_v13 = vld [vmem:[#allocation2 + $0x208] sm:$0xff] }
 0x123   : > { %8909 = vst [vmem:[#allocation51_spill] sm:$0xff] %v6767_v0  ;;  %v6769_v50 = vpop.permute.xlu0 %4978  ;;  %v616_v0 = vld [vmem:[#allocation2 + $0x1e8] sm:$0xff]  ;;  %v6812_v10 = vsel %vm226_vm0, %v6382_v36, %v4701_v3  ;;  %v4730_v3 = vunpack.i.l.bf16 %v6576_v23 }
 0x124   : > { %8910 = vst [vmem:[#allocation52_spill] sm:$0xff] %v6769_v50  ;;  %5263 = vrot.lane.b32.xlu1 %v5262_v61, %s5989_s13  ;;  %v4690_v50 = vunpack.i.l.bf16 %v6545_v55 }
 0x125   : > { %5268 = vrot.lane.b32.xlu0 %v5267_v27, %s5988_s12  ;;  %v365_v27 = vld [vmem:[#allocation2 + $0x7] sm:$0xff] }
 0x126   : > { %v6773_v11 = vpop.permute.xlu1 %4983  ;;  %v6791_v55 = vsel %vm226_vm0, %v365_v27, %v4690_v50  ;;  %v4716_v50 = vunpack.i.h.bf16 %v6567_v16 }
 0x127   : > { %8911 = vst [vmem:[#allocation53_spill] sm:$0xff] %v6773_v11  ;;  %v6775_v56 = vpop.permute.xlu0 %4988  ;;  %v366_v11 = vld [vmem:[#allocation2 + $0xf] sm:$0xff] }
 0x128   : > { %8912 = vst [vmem:[#allocation54_spill] sm:$0xff] %v6775_v56  ;;  %5273 = vrot.lane.b32.xlu1 %v5272_v49, %s5988_s12  ;;  %v5292_v56 = vpack.i.bf16 %v617_v4, %v616_v0  ;;  %v648_v49 = vld [vmem:[#allocation2 + $0x1e9] sm:$0xff]  ;;  %v5297_v4 = vpack.i.bf16 %v647_v19, %v646_v26  ;;  %v4706_v0 = vunpack.i.h.bf16 %v6559_v5  ;;  %v6801_v24 = vsel %vm226_vm0, %v366_v11, %v4691_v6 }
 0x129   : > { %5278 = vrot.lane.b32.xlu0 %v5277_v12, %s5989_s13  ;;  %v4695_v12 = vunpack.i.l.bf16 %v6553_v62  ;;  %v6820_v11 = vsel %vm226_vm0, %v6370_v31, %v4696_v32  ;;  %v652_v6 = vld [vmem:[#allocation2 + $0x229] sm:$0xff]  ;;  %v6837_v32 = vsel %vm226_vm0, %v6401_v44, %v4711_v59  ;;  %v4731_v44 = vunpack.i.h.bf16 %v6576_v23 }
 0x12a   : > { %v6780_v61 = vpop.permute.xlu1 %4993  ;;  %v4741_v23 = vunpack.i.h.bf16 %v6584_v29  ;;  %v4750_v59 = vunpack.i.l.bf16 %v6592_v40 }
 0x12b   : > { %8913 = vst [vmem:[#allocation55_spill] sm:$0xff] %v6780_v61  ;;  %v6783_v39 = vpop.permute.xlu0 %4998  ;;  %v619_v61 = vld [vmem:[#allocation2 + $0x210] sm:$0xff]  ;;  %v6816_v19 = vsel %vm226_vm0, %v6368_v30, %v4695_v12  ;;  %v6829_v30 = vsel %vm226_vm0, %v6386_v38, %v4706_v0  ;;  %v4726_v38 = vunpack.i.h.bf16 %v6574_v22 }
 0x12c   : > { %8914 = vst [vmem:[#allocation56_spill] sm:$0xff] %v6783_v39  ;;  %5283 = vrot.lane.b32.xlu1 %v5282_v58, %s5989_s13  ;;  %v4705_v39 = vunpack.i.l.bf16 %v6559_v5  ;;  %v620_v58 = vld [vmem:[#allocation2 + $0x228] sm:$0xff]  ;;  %v5307_v26 = vpack.i.bf16 %v619_v61, %v618_v13  ;;  %v6808_v5 = vsel %vm226_vm0, %v6380_v35, %v4700_v21  ;;  %v653_v61 = vld [vmem:[#allocation2 + $0x231] sm:$0xff]  ;;  %v4721_v35 = vunpack.i.h.bf16 %v6569_v17 }
 0x12d   : > { %5288 = vrot.lane.b32.xlu0 %v5287_v9, %s5988_s12  ;;  %v5302_v9 = vpack.i.bf16 %v649_v42, %v648_v49  ;;  %v4715_v49 = vunpack.i.l.bf16 %v6567_v16  ;;  %v4720_v21 = vunpack.i.l.bf16 %v6569_v17  ;;  %v5312_v36 = vpack.i.bf16 %v621_v63, %v620_v58 }
 0x12e   : > { %v6798_v62 = vpop.permute.xlu1 %5003  ;;  %v6833_v31 = vsel %vm226_vm0, %v6384_v37, %v4705_v39  ;;  %v6841_v16 = vsel %vm226_vm0, %v6399_v43, %v4710_v25  ;;  %v6847_v63 = vsel %vm226_vm0, %v6405_v48, %v4716_v50  ;;  %v5322_v39 = vpack.i.bf16 %v653_v61, %v652_v6  ;;  %v8917_v50 = vld [vmem:[#allocation6_spill] sm:$0xff]  ;;  %v8920_v61 = vld [vmem:[#allocation7_spill] sm:$0xff] }
 0x12f   : > { %8915 = vst [vmem:[#allocation57_spill] sm:$0xff] %v6798_v62  ;;  %v6804_v27 = vpop.permute.xlu0 %5008  ;;  %v4736_v43 = vunpack.i.h.bf16 %v6582_v28  ;;  %v4735_v25 = vunpack.i.l.bf16 %v6582_v28  ;;  %v6860_v48 = vsel %vm226_vm0, %v6403_v45, %v4715_v49  ;;  %v6868_v12 = vsel %vm226_vm0, %v6419_v51, %v4720_v21  ;;  %v8916_v51 = vld [vmem:[#allocation4_spill] sm:$0xff] }
 0x130   : > { %5293 = vrot.lane.b32.xlu1 %v5292_v56, %s5988_s12  ;;  %v4725_v56 = vunpack.i.l.bf16 %v6574_v22  ;;  %v6864_v22 = vsel %vm226_vm0, %v6421_v54, %v4721_v35  ;;  %v4740_v28 = vunpack.i.l.bf16 %v6584_v29  ;;  %v4746_v42 = vunpack.i.h.bf16 %v6590_v34 }
 0x131   : > { %5298 = vrot.lane.b32.xlu0 %v5297_v4, %s5989_s13  ;;  %v4745_v45 = vunpack.i.l.bf16 %v6590_v34  ;;  %v4751_v13 = vunpack.i.h.bf16 %v6592_v40  ;;  %v6880_v54 = vsel %vm226_vm0, %v6425_v57, %v4726_v38  ;;  %v4756_v29 = vunpack.i.h.bf16 %v6598_v41  ;;  %v8919_v57 = vld [vmem:[#allocation8_spill] sm:$0xff]  ;;  %v8921_v40 = vld [vmem:[#allocation10_spill] sm:$0xff] }
 0x132   : > { %v6843_v17 = vpop.permute.xlu1 %5013  ;;  %v6884_v0 = vsel %vm226_vm0, %v8916_v51, %v4725_v56  ;;  %v6892_v34 = vsel %vm226_vm0, %v8917_v50, %v4731_v44  ;;  %v6900_v6 = vsel %vm226_vm0, %v8919_v57, %v4736_v43  ;;  %v6904_v49 = vsel %vm226_vm0, %v8920_v61, %v4735_v25  ;;  %v8922_v44 = vld [vmem:[#allocation9_spill] sm:$0xff]  ;;  %v8923_v43 = vld [vmem:[#allocation12_spill] sm:$0xff]  ;;  %v8924_v25 = vld [vmem:[#allocation11_spill] sm:$0xff] }
 0x133   : > { %v6851_v37 = vpop.permute.xlu0 %5018  ;;  %v6909_v35 = vsel %vm226_vm0, %v8921_v40, %v4741_v23  ;;  %v4755_v21 = vunpack.i.l.bf16 %v6598_v41  ;;  %v4761_v38 = vunpack.i.h.bf16 %v6600_v46  ;;  %v4760_v56 = vunpack.i.l.bf16 %v6600_v46  ;;  %v8925_v41 = vld [vmem:[#allocation14_spill] sm:$0xff]  ;;  %v8926_v50 = vld [vmem:[#allocation13_spill] sm:$0xff] }
 0x134   : > { %5303 = vrot.lane.b32.xlu1 %v5302_v9, %s5989_s13  ;;  %v8918_v9 = vld [vmem:[#allocation5_spill] sm:$0xff]  ;;  %v6926_v23 = vsel %vm226_vm0, %v8924_v25, %v4745_v45  ;;  %v6930_v51 = vsel %vm226_vm0, %v8925_v41, %v4751_v13  ;;  %v4765_v57 = vunpack.i.l.bf16 %v6606_v47  ;;  %v4771_v61 = vunpack.i.h.bf16 %v6608_v52 }
 0x135   : > { %5308 = vrot.lane.b32.xlu0 %v5307_v26, %s5988_s12  ;;  %v6896_v26 = vsel %vm226_vm0, %v8918_v9, %v4730_v3  ;;  %v6918_v3 = vsel %vm226_vm0, %v8922_v44, %v4740_v28  ;;  %v8927_v28 = vld [vmem:[#allocation16_spill] sm:$0xff]  ;;  %v4770_v13 = vunpack.i.l.bf16 %v6608_v52  ;;  %v4776_v40 = vunpack.i.h.bf16 %v6614_v53 }
 0x136   : > { %v6876_v4 = vpop.permute.xlu1 %5023  ;;  %v6940_v9 = vsel %vm226_vm0, %v8927_v28, %v4756_v29  ;;  %v4775_v44 = vunpack.i.l.bf16 %v6614_v53  ;;  %v4781_v52 = vunpack.i.h.bf16 %v6616_v60  ;;  %v4780_v25 = vunpack.i.l.bf16 %v6616_v60 }
 0x137   : > { %v6888_v58 = vpop.permute.xlu0 %5028  ;;  %v4786_v53 = vunpack.i.h.bf16 %v6622_v8  ;;  %v4790_v41 = vunpack.i.l.bf16 %v6624_v33  ;;  %v4796_v60 = vunpack.i.h.bf16 %v6632_v14  ;;  %v4795_v28 = vunpack.i.l.bf16 %v6632_v14 }
 0x138   : > { %5313 = vrot.lane.b32.xlu1 %v5312_v36, %s5988_s12  ;;  %v6922_v36 = vsel %vm226_vm0, %v8923_v43, %v4746_v42  ;;  %v4766_v42 = vunpack.i.h.bf16 %v6606_v47  ;;  %v6957_v43 = vsel %vm226_vm0, %v6501_v18, %v4761_v38  ;;  %v6961_v47 = vsel %vm226_vm0, %v6499_v20, %v4760_v56 }
 0x139   : > { %5318 = vrot.lane.b32.xlu0 %v6628_v7, %s5989_s13  ;;  %v6936_v7 = vsel %vm226_vm0, %v8926_v50, %v4750_v59  ;;  %v8928_v59 = vld [vmem:[#allocation15_spill] sm:$0xff]  ;;  %v6976_v20 = vsel %vm226_vm0, %v6503_v1, %v4765_v57  ;;  %v4791_v38 = vunpack.i.h.bf16 %v6624_v33  ;;  %v6988_v50 = vsel %vm1710_vm2, %v6791_v55, %v4770_v13  ;;  %v8934_v13 = vld [vmem:[#allocation18_spill] sm:$0xff] }
 0x13a   : > { %v6932_v46 = vpop.permute.xlu1 %5033  ;;  %v6953_v29 = vsel %vm226_vm0, %v8928_v59, %v4755_v21  ;;  %v6972_v18 = vsel %vm226_vm0, %v6505_v2, %v4766_v42  ;;  %v6992_v2 = vsel %vm1710_vm2, %v6816_v19, %v4775_v44  ;;  %v6996_v1 = vsel %vm1710_vm2, %v6820_v11, %v4776_v40  ;;  %v8935_v44 = vld [vmem:[#allocation19_spill] sm:$0xff] }
 0x13b   : > { %v6944_v45 = vpop.permute.xlu0 %5038  ;;  %v7000_v33 = vsel %vm1710_vm2, %v6812_v10, %v4781_v52  ;;  %v4800_v42 = vunpack.i.l.bf16 %v6634_v15  ;;  %v7007_v55 = vsel %vm1710_vm2, %v6808_v5, %v4780_v25  ;;  %v7011_v19 = vsel %vm1710_vm2, %v6829_v30, %v4786_v53  ;;  %v8932_v30 = vld [vmem:[#allocation17_spill] sm:$0xff]  ;;  %v8936_v53 = vld [vmem:[#allocation20_spill] sm:$0xff] }
 0x13c   : > { %5323 = vrot.lane.b32.xlu1 %v5322_v39, %s5989_s13  ;;  %v4785_v39 = vunpack.i.l.bf16 %v6622_v8  ;;  %v6984_v8 = vsel %vm1710_vm2, %v6801_v24, %v4771_v61  ;;  %v4801_v24 = vunpack.i.h.bf16 %v6634_v15  ;;  %v7019_v10 = vsel %vm1710_vm2, %v6841_v16, %v4790_v41 }
 0x13d   : > { %v7025_v15 = vsel %vm1710_vm2, %v6837_v32, %v4791_v38  ;;  %v7029_v5 = vsel %vm1710_vm2, %v6847_v63, %v4796_v60  ;;  %v4806_v57 = vunpack.i.h.bf16 %v8932_v30  ;;  %v4805_v61 = vunpack.i.l.bf16 %v8932_v30  ;;  %v8937_v38 = vld [vmem:[#allocation21_spill] sm:$0xff] }
 0x13e   : > { %v6968_v21 = vpop.permute.xlu1 %5043  ;;  %v7015_v11 = vsel %vm1710_vm2, %v6833_v31, %v4785_v39  ;;  %v4811_v40 = vunpack.i.h.bf16 %v8934_v13  ;;  %v4810_v16 = vunpack.i.l.bf16 %v8934_v13  ;;  %v4816_v59 = vunpack.i.h.bf16 %v8935_v44  ;;  %v8938_v13 = vld [vmem:[#allocation22_spill] sm:$0xff] }
 0x13f   : > { %8929 = vst [vmem:[#allocation4_spill] sm:$0xff] %v6968_v21  ;;  %v6980_v56 = vpop.permute.xlu0 %5048  ;;  %v4815_v52 = vunpack.i.l.bf16 %v8935_v44  ;;  %v7041_v32 = vsel %vm1710_vm2, %v6860_v48, %v4795_v28  ;;  %v7045_v63 = vsel %vm1710_vm2, %v6868_v12, %v4800_v42  ;;  %v7049_v25 = vsel %vm1710_vm2, %v6864_v22, %v4801_v24  ;;  %v8940_v42 = vld [vmem:[#allocation23_spill] sm:$0xff] }
 0x140   : > { %8930 = vst [vmem:[#allocation6_spill] sm:$0xff] %v6980_v56  ;;  %v4820_v39 = vunpack.i.l.bf16 %v8936_v53  ;;  %v4821_v41 = vunpack.i.h.bf16 %v8936_v53  ;;  %v4826_v60 = vunpack.i.h.bf16 %v8937_v38  ;;  %v4825_v30 = vunpack.i.l.bf16 %v8937_v38 }
 0x141   : > { %v4830_v48 = vunpack.i.l.bf16 %v8938_v13  ;;  %v7060_v12 = vsel %vm1710_vm2, %v6880_v54, %v4806_v57  ;;  %v7064_v22 = vsel %vm1710_vm2, %v6884_v0, %v4805_v61  ;;  %v4831_v24 = vunpack.i.h.bf16 %v8938_v13 }
 0x142   : > { %v7021_v14 = vpop.permute.xlu1 %5053  ;;  %v4836_v44 = vunpack.i.h.bf16 %v8940_v42  ;;  %v7072_v38 = vsel %vm1710_vm2, %v6896_v26, %v4810_v16  ;;  %v7080_v54 = vsel %vm1710_vm2, %v6900_v6, %v4816_v59  ;;  %v7084_v0 = vsel %vm1710_vm2, %v6904_v49, %v4815_v52  ;;  %v8942_v26 = vld [vmem:[#allocation24_spill] sm:$0xff] }
 0x143   : > { %8931 = vst [vmem:[#allocation5_spill] sm:$0xff] %v7021_v14  ;;  %v7033_v31 = vpop.permute.xlu0 %5058  ;;  %v7088_v57 = vsel %vm1710_vm2, %v6918_v3, %v4820_v39  ;;  %v4835_v61 = vunpack.i.l.bf16 %v8940_v42  ;;  %v4841_v16 = vunpack.i.h.bf16 %v8942_v26  ;;  %v4840_v13 = vunpack.i.l.bf16 %v8942_v26  ;;  %v8959_v14 = vld [vmem:[#allocation38_spill] sm:$0xff] }
 0x144   : > { %8933 = vst [vmem:[#allocation8_spill] sm:$0xff] %v7033_v31  ;;  %v7099_v6 = vsel %vm1710_vm2, %v6922_v36, %v4826_v60  ;;  %v7103_v49 = vsel %vm1710_vm2, %v6926_v23, %v4825_v30  ;;  %v7107_v3 = vsel %vm1710_vm2, %v6936_v7, %v4830_v48  ;;  %v7113_v59 = vsel %vm1710_vm2, %v6930_v51, %v4831_v24  ;;  %v8944_v36 = vld [vmem:[#allocation25_spill] sm:$0xff]  ;;  %v8947_v30 = vld [vmem:[#allocation27_spill] sm:$0xff] }
 0x145   : > { %v4846_v52 = vunpack.i.h.bf16 %v8944_v36  ;;  %v4845_v39 = vunpack.i.l.bf16 %v8944_v36  ;;  %v4856_v48 = vunpack.i.h.bf16 %v8947_v30  ;;  %v4855_v42 = vunpack.i.l.bf16 %v8947_v30 }
 0x146   : > { %v7056_v28 = vpop.permute.xlu1 %5063  ;;  %v7129_v51 = vsel %vm1710_vm2, %v6953_v29, %v4835_v61  ;;  %v7137_v24 = vsel %vm1710_vm2, %v6957_v43, %v4841_v16  ;;  %v8952_v16 = vld [vmem:[#allocation31_spill] sm:$0xff] }
 0x147   : > { %8939 = vst [vmem:[#allocation7_spill] sm:$0xff] %v7056_v28  ;;  %v7068_v53 = vpop.permute.xlu0 %5068  ;;  %v7076_v28 = vsel %vm1710_vm2, %v6892_v34, %v4811_v40  ;;  %v7095_v34 = vsel %vm1710_vm2, %v6909_v35, %v4821_v41  ;;  %v7117_v35 = vsel %vm1710_vm2, %v6940_v9, %v4836_v44  ;;  %v8946_v41 = vld [vmem:[#allocation26_spill] sm:$0xff]  ;;  %v7133_v9 = vsel %vm1710_vm2, %v6961_v47, %v4840_v13  ;;  %v8948_v44 = vld [vmem:[#allocation28_spill] sm:$0xff] }
 0x148   : > { %8941 = vst [vmem:[#allocation10_spill] sm:$0xff] %v7068_v53  ;;  %v4851_v60 = vunpack.i.h.bf16 %v8946_v41  ;;  %v4850_v7 = vunpack.i.l.bf16 %v8946_v41  ;;  %v4860_v26 = vunpack.i.l.bf16 %v8948_v44  ;;  %v4861_v36 = vunpack.i.h.bf16 %v8948_v44  ;;  %v8949_v41 = vld [vmem:[#allocation29_spill] sm:$0xff] }
 0x149   : > { %v4865_v30 = vunpack.i.l.bf16 %v8949_v41  ;;  %v7148_v47 = vsel %vm1710_vm2, %v6972_v18, %v4846_v52  ;;  %v7152_v43 = vsel %vm1710_vm2, %v6976_v20, %v4845_v39  ;;  %v4875_v13 = vunpack.i.l.bf16 %v8952_v16 }
 0x14a   : > { %v7109_v40 = vpop.permute.xlu1 %5073  ;;  %v7168_v18 = vsel %vm1743_vm3, %v6992_v2, %v4855_v42  ;;  %v7172_v20 = vsel %vm1743_vm3, %v6996_v1, %v4856_v48  ;;  %v4876_v52 = vunpack.i.h.bf16 %v8952_v16 }
 0x14b   : > { %8943 = vst [vmem:[#allocation9_spill] sm:$0xff] %v7109_v40  ;;  %v7121_v23 = vpop.permute.xlu0 %5078  ;;  %v8950_v40 = vld [vmem:[#allocation30_spill] sm:$0xff]  ;;  %v7187_v2 = vsel %vm1743_vm3, %v7015_v11, %v4865_v30  ;;  %v8954_v11 = vld [vmem:[#allocation33_spill] sm:$0xff] }
 0x14c   : > { %8945 = vst [vmem:[#allocation12_spill] sm:$0xff] %v7121_v23  ;;  %v4866_v23 = vunpack.i.h.bf16 %v8949_v41  ;;  %v4870_v53 = vunpack.i.l.bf16 %v8950_v40  ;;  %v4871_v61 = vunpack.i.h.bf16 %v8950_v40  ;;  %v7160_v41 = vsel %vm1743_vm3, %v6988_v50, %v4850_v7  ;;  %v8953_v50 = vld [vmem:[#allocation32_spill] sm:$0xff] }
 0x14d   : > { %v7176_v40 = vsel %vm1743_vm3, %v7007_v55, %v4860_v26  ;;  %v4881_v39 = vunpack.i.h.bf16 %v8953_v50  ;;  %v4880_v7 = vunpack.i.l.bf16 %v8953_v50  ;;  %v4886_v42 = vunpack.i.h.bf16 %v8954_v11 }
 0x14e   : > { %v7144_v29 = vpop.permute.xlu1 %5083  ;;  %v7191_v1 = vsel %vm1743_vm3, %v7011_v19, %v4866_v23  ;;  %v7195_v55 = vsel %vm1743_vm3, %v7019_v10, %v4870_v53  ;;  %v7201_v48 = vsel %vm1743_vm3, %v7025_v15, %v4871_v61  ;;  %v4885_v26 = vunpack.i.l.bf16 %v8954_v11  ;;  %v8955_v23 = vld [vmem:[#allocation34_spill] sm:$0xff]  ;;  %v8956_v53 = vld [vmem:[#allocation35_spill] sm:$0xff] }
 0x14f   : > { %8951 = vst [vmem:[#allocation11_spill] sm:$0xff] %v7144_v29  ;;  %v7156_v44 = vpop.permute.xlu0 %5088  ;;  %v7164_v29 = vsel %vm1743_vm3, %v6984_v8, %v4851_v60  ;;  %v7183_v8 = vsel %vm1743_vm3, %v7000_v33, %v4861_v36  ;;  %v7205_v33 = vsel %vm1743_vm3, %v7041_v32, %v4875_v13  ;;  %v4891_v36 = vunpack.i.h.bf16 %v8955_v23  ;;  %v8957_v13 = vld [vmem:[#allocation36_spill] sm:$0xff] }
 0x150   : > { %v4890_v10 = vunpack.i.l.bf16 %v8955_v23  ;;  %v4896_v30 = vunpack.i.h.bf16 %v8956_v53  ;;  %v4895_v16 = vunpack.i.l.bf16 %v8956_v53  ;;  %v7217_v15 = vsel %vm1743_vm3, %v7029_v5, %v4876_v52  ;;  %v8958_v23 = vld [vmem:[#allocation37_spill] sm:$0xff] }
 0x151   : > { %v7221_v32 = vsel %vm1743_vm3, %v7045_v63, %v4880_v7  ;;  %v7225_v61 = vsel %vm1743_vm3, %v7049_v25, %v4881_v39  ;;  %v4900_v50 = vunpack.i.l.bf16 %v8957_v13  ;;  %v4901_v11 = vunpack.i.h.bf16 %v8957_v13  ;;  %v8960_v7 = vld [vmem:[#allocation39_spill] sm:$0xff] }
 0x152   : > { %v7197_v60 = vpop.permute.xlu1 %5093  ;;  %v4906_v31 = vunpack.i.h.bf16 %v8958_v23  ;;  %v4905_v53 = vunpack.i.l.bf16 %v8958_v23  ;;  %v4910_v5 = vunpack.i.l.bf16 %v8959_v14  ;;  %v7236_v63 = vsel %vm1743_vm3, %v7064_v22, %v4885_v26 }
 0x153   : > { %v7209_v19 = vpop.permute.xlu0 %5098  ;;  %v7240_v25 = vsel %vm1743_vm3, %v7060_v12, %v4886_v42  ;;  %v4911_v39 = vunpack.i.h.bf16 %v8959_v14  ;;  %v4915_v13 = vunpack.i.l.bf16 %v8960_v7  ;;  %v7248_v23 = vsel %vm1743_vm3, %v7072_v38, %v4890_v10  ;;  %v8962_v38 = vld [vmem:[#allocation40_spill] sm:$0xff] }
 0x154   : > { %v7252_v21 = vsel %vm1743_vm3, %v7076_v28, %v4891_v36  ;;  %v7256_v22 = vsel %vm1743_vm3, %v7084_v0, %v4895_v16  ;;  %v7260_v12 = vsel %vm1743_vm3, %v7080_v54, %v4896_v30  ;;  %v7264_v14 = vsel %vm1743_vm3, %v7088_v57, %v4900_v50 }
 0x155   : > { %v4916_v42 = vunpack.i.h.bf16 %v8960_v7  ;;  %v4921_v26 = vunpack.i.h.bf16 %v8962_v38  ;;  %v4920_v10 = vunpack.i.l.bf16 %v8962_v38  ;;  %v7271_v28 = vsel %vm1743_vm3, %v7095_v34, %v4901_v11 }
 0x156   : > { %v7232_v52 = vpop.permute.xlu1 %5103  ;;  %v7275_v0 = vsel %vm1743_vm3, %v7103_v49, %v4905_v53  ;;  %v7279_v54 = vsel %vm1743_vm3, %v7099_v6, %v4906_v31  ;;  %v7283_v57 = vsel %vm1743_vm3, %v7107_v3, %v4910_v5  ;;  %v7289_v30 = vsel %vm1743_vm3, %v7113_v59, %v4911_v39  ;;  %v8964_v49 = vld [vmem:[#allocation41_spill] sm:$0xff]  ;;  %v8966_v6 = vld [vmem:[#allocation42_spill] sm:$0xff]  ;;  %v8967_v53 = vld [vmem:[#allocation43_spill] sm:$0xff] }
 0x157   : > { %v7244_v56 = vpop.permute.xlu0 %5108  ;;  %v7293_v34 = vsel %vm1743_vm3, %v7129_v51, %v4915_v13  ;;  %v4926_v16 = vunpack.i.h.bf16 %v8964_v49  ;;  %v4925_v50 = vunpack.i.l.bf16 %v8964_v49  ;;  %v4931_v11 = vunpack.i.h.bf16 %v8966_v6  ;;  %v8968_v13 = vld [vmem:[#allocation44_spill] sm:$0xff] }
 0x158   : > { %8961 = vst [vmem:[#allocation14_spill] sm:$0xff] %v7244_v56  ;;  %v4930_v3 = vunpack.i.l.bf16 %v8966_v6  ;;  %v4936_v5 = vunpack.i.h.bf16 %v8967_v53  ;;  %v4935_v7 = vunpack.i.l.bf16 %v8967_v53  ;;  %v7305_v59 = vsel %vm1743_vm3, %v7117_v35, %v4916_v42  ;;  %v8969_v6 = vld [vmem:[#allocation45_spill] sm:$0xff] }
 0x159   : > { %v7309_v51 = vsel %vm1743_vm3, %v7133_v9, %v4920_v10  ;;  %v7313_v39 = vsel %vm1743_vm3, %v7137_v24, %v4921_v26  ;;  %v4940_v38 = vunpack.i.l.bf16 %v8968_v13  ;;  %v4941_v49 = vunpack.i.h.bf16 %v8968_v13  ;;  %v8974_v26 = vld [vmem:[#allocation47_spill] sm:$0xff] }
 0x15a   : > { %v7285_v36 = vpop.permute.xlu1 %5113  ;;  %v4945_v53 = vunpack.i.l.bf16 %v8969_v6  ;;  %v7324_v9 = vsel %vm1743_vm3, %v7152_v43, %v4925_v50  ;;  %v7328_v24 = vsel %vm1743_vm3, %v7148_v47, %v4926_v16  ;;  %v4955_v10 = vunpack.i.l.bf16 %v8974_v26 }
 0x15b   : > { %8963 = vst [vmem:[#allocation13_spill] sm:$0xff] %v7285_v36  ;;  %v7297_v31 = vpop.permute.xlu0 %5118  ;;  %v8970_v36 = vld [vmem:[#allocation46_spill] sm:$0xff]  ;;  %8972 = vst [vmem:[#allocation17_spill] sm:$0xff] %v7324_v9  ;;  %v7344_v43 = vsel %vm1776_vm4, %v7168_v18, %v4935_v7  ;;  %v7348_v47 = vsel %vm1776_vm4, %v7172_v20, %v4936_v5  ;;  %v4956_v16 = vunpack.i.h.bf16 %v8974_v26 }
 0x15c   : > { %8965 = vst [vmem:[#allocation16_spill] sm:$0xff] %v7297_v31  ;;  %v4946_v31 = vunpack.i.h.bf16 %v8969_v6  ;;  %v4950_v56 = vunpack.i.l.bf16 %v8970_v36  ;;  %8973 = vst [vmem:[#allocation18_spill] sm:$0xff] %v7328_v24  ;;  %v4951_v42 = vunpack.i.h.bf16 %v8970_v36  ;;  %v7336_v6 = vsel %vm1776_vm4, %v7160_v41, %v4930_v3  ;;  %v8975_v41 = vld [vmem:[#allocation48_spill] sm:$0xff]  ;;  %v8982_v9 = vld [vmem:[#allocation54_spill] sm:$0xff] }
 0x15d   : > { %v7352_v36 = vsel %vm1776_vm4, %v7176_v40, %v4940_v38  ;;  %v4961_v50 = vunpack.i.h.bf16 %v8975_v41  ;;  %v4960_v3 = vunpack.i.l.bf16 %v8975_v41  ;;  %v7363_v18 = vsel %vm1776_vm4, %v7187_v2, %v4945_v53  ;;  %v8976_v2 = vld [vmem:[#allocation49_spill] sm:$0xff] }
 0x15e   : > { %v7320_v35 = vpop.permute.xlu1 %5123  ;;  %v7367_v20 = vsel %vm1776_vm4, %v7191_v1, %v4946_v31  ;;  %v7371_v40 = vsel %vm1776_vm4, %v7195_v55, %v4950_v56  ;;  %v7377_v5 = vsel %vm1776_vm4, %v7201_v48, %v4951_v42  ;;  %v4966_v7 = vunpack.i.h.bf16 %v8976_v2  ;;  %v8978_v31 = vld [vmem:[#allocation50_spill] sm:$0xff]  ;;  %v8979_v55 = vld [vmem:[#allocation51_spill] sm:$0xff] }
 0x15f   : > { %8971 = vst [vmem:[#allocation15_spill] sm:$0xff] %v7320_v35  ;;  %v7332_v13 = vpop.permute.xlu0 %5128  ;;  %v7340_v35 = vsel %vm1776_vm4, %v7164_v29, %v4931_v11  ;;  %v7359_v29 = vsel %vm1776_vm4, %v7183_v8, %v4941_v49  ;;  %v7381_v8 = vsel %vm1776_vm4, %v7205_v33, %v4955_v10  ;;  %v4965_v38 = vunpack.i.l.bf16 %v8976_v2  ;;  %v8980_v10 = vld [vmem:[#allocation52_spill] sm:$0xff] }
 0x160   : > { %v4971_v49 = vunpack.i.h.bf16 %v8978_v31  ;;  %v4970_v56 = vunpack.i.l.bf16 %v8978_v31  ;;  %v4976_v53 = vunpack.i.h.bf16 %v8979_v55  ;;  %v4975_v26 = vunpack.i.l.bf16 %v8979_v55  ;;  %v8981_v31 = vld [vmem:[#allocation53_spill] sm:$0xff] }
 0x161   : > { %v7393_v48 = vsel %vm1776_vm4, %v7217_v15, %v4956_v16  ;;  %v7397_v33 = vsel %vm1776_vm4, %v7221_v32, %v4960_v3  ;;  %v7401_v42 = vsel %vm1776_vm4, %v7225_v61, %v4961_v50  ;;  %v4980_v41 = vunpack.i.l.bf16 %v8980_v10  ;;  %v8984_v50 = vld [vmem:[#allocation55_spill] sm:$0xff] }
 0x162   : > { %v7373_v11 = vpop.permute.xlu1 %5133  ;;  %v4981_v2 = vunpack.i.h.bf16 %v8980_v10  ;;  %v4986_v24 = vunpack.i.h.bf16 %v8981_v31  ;;  %v4985_v55 = vunpack.i.l.bf16 %v8981_v31  ;;  %v7412_v32 = vsel %vm1776_vm4, %v7236_v63, %v4965_v38 }
 0x163   : > { %v7385_v1 = vpop.permute.xlu0 %5138  ;;  %v7416_v61 = vsel %vm1776_vm4, %v7240_v25, %v4966_v7  ;;  %v4991_v16 = vunpack.i.h.bf16 %v8982_v9  ;;  %v4995_v3 = vunpack.i.l.bf16 %v8984_v50  ;;  %v7424_v31 = vsel %vm1776_vm4, %v7248_v23, %v4970_v56  ;;  %v8985_v7 = vld [vmem:[#allocation56_spill] sm:$0xff] }
 0x164   : > { %8977 = vst [vmem:[#allocation19_spill] sm:$0xff] %v7385_v1  ;;  %v4990_v1 = vunpack.i.l.bf16 %v8982_v9  ;;  %v7432_v63 = vsel %vm1776_vm4, %v7256_v22, %v4975_v26  ;;  %v7436_v25 = vsel %vm1776_vm4, %v7260_v12, %v4976_v53  ;;  %v7440_v9 = vsel %vm1776_vm4, %v7264_v14, %v4980_v41 }
 0x165   : > { %v4996_v23 = vunpack.i.h.bf16 %v8984_v50  ;;  %v5001_v38 = vunpack.i.h.bf16 %v8985_v7  ;;  %v7451_v22 = vsel %vm1776_vm4, %v7275_v0, %v4985_v55  ;;  %v7455_v12 = vsel %vm1776_vm4, %v7279_v54, %v4986_v24 }
 0x166   : > { %v7408_v15 = vpop.permute.xlu1 %5143  ;;  %v7459_v14 = vsel %vm1776_vm4, %v7283_v57, %v4990_v1  ;;  %v7465_v53 = vsel %vm1776_vm4, %v7289_v30, %v4991_v16  ;;  %v5011_v0 = vunpack.i.h.bf16 %v6804_v27  ;;  %v5010_v54 = vunpack.i.l.bf16 %v6804_v27 }
 0x167   : > { %8983 = vst [vmem:[#allocation20_spill] sm:$0xff] %v7408_v15  ;;  %v7420_v10 = vpop.permute.xlu0 %5148  ;;  %v7428_v15 = vsel %vm1776_vm4, %v7252_v21, %v4971_v49  ;;  %v5000_v21 = vunpack.i.l.bf16 %v8985_v7  ;;  %v7447_v49 = vsel %vm1776_vm4, %v7271_v28, %v4981_v2  ;;  %v7469_v28 = vsel %vm1776_vm4, %v7293_v34, %v4995_v3 }
 0x168   : > { %v5016_v57 = vunpack.i.h.bf16 %v6843_v17  ;;  %v5015_v1 = vunpack.i.l.bf16 %v6843_v17  ;;  %v5021_v26 = vunpack.i.h.bf16 %v6851_v37  ;;  %v5020_v30 = vunpack.i.l.bf16 %v6851_v37 }
 0x169   : > { %v7481_v41 = vsel %vm1776_vm4, %v7305_v59, %v4996_v23  ;;  %v7485_v34 = vsel %vm1776_vm4, %v7309_v51, %v5000_v21  ;;  %v7489_v27 = vsel %vm1776_vm4, %v7313_v39, %v5001_v38  ;;  %v5025_v2 = vunpack.i.l.bf16 %v6876_v4 }
 0x16a   : > { %v7461_v56 = vpop.permute.xlu1 %5153  ;;  %v5026_v37 = vunpack.i.h.bf16 %v6876_v4  ;;  %v5030_v16 = vunpack.i.l.bf16 %v6888_v58  ;;  %v1810_v51 = vsel %vm1809_vm5, %v7336_v6, %v5010_v54  ;;  %v1811_v39 = vsel %vm1809_vm5, %v7340_v35, %v5011_v0 }
 0x16b   : > { %v7473_v24 = vpop.permute.xlu0 %5158  ;;  %v5091_v50 = vunpack.i.h.bf16 %v7156_v44  ;;  %v5090_v3 = vunpack.i.l.bf16 %v7156_v44  ;;  %v1812_v7 = vsel %vm1809_vm5, %v7344_v43, %v5015_v1  ;;  %v1813_v4 = vsel %vm1809_vm5, %v7348_v47, %v5016_v57 }
 0x16c   : > { %v1814_v38 = vsel %vm1809_vm5, %v7352_v36, %v5020_v30  ;;  %v1815_v6 = vsel %vm1809_vm5, %v7359_v29, %v5021_v26  ;;  %v1816_v35 = vsel %vm1809_vm5, %v7363_v18, %v5025_v2  ;;  %v5031_v21 = vunpack.i.h.bf16 %v6888_v58 }
 0x16d   : > { %v1817_v54 = vsel %vm1809_vm5, %v7367_v20, %v5026_v37  ;;  %v7519_v43 = vsel %vm1809_vm5, %v7371_v40, %v5030_v16  ;;  %v5036_v47 = vunpack.i.h.bf16 %v6932_v46  ;;  %v5095_v36 = vunpack.i.l.bf16 %v7197_v60 }
 0x16e   : > { %v7496_v59 = vpop.permute.xlu1 %5163  ;;  %v5035_v29 = vunpack.i.l.bf16 %v6932_v46  ;;  %v5096_v18 = vunpack.i.h.bf16 %v7197_v60  ;;  %v1843_v58 = vsel %vm1842_vm6, %v1810_v51, %v5090_v3  ;;  %v1844_v26 = vsel %vm1842_vm6, %v1811_v39, %v5091_v50 }
 0x16f   : > { %v5169_v23 = vpop.permute.xlu0 %5168  ;;  %v5040_v40 = vunpack.i.l.bf16 %v6944_v45  ;;  %v5101_v16 = vunpack.i.h.bf16 %v7209_v19  ;;  %v1845_v46 = vsel %vm1842_vm6, %v1812_v7, %v5095_v36  ;;  %v5100_v60 = vunpack.i.l.bf16 %v7209_v19 }
 0x170   : > { %v5171_v0 = vunpack.i.h.bf16 %v5169_v23  ;;  %v5170_v44 = vunpack.i.l.bf16 %v5169_v23  ;;  %v1846_v50 = vsel %vm1842_vm6, %v1813_v4, %v5096_v18 }
 0x171   : > { %v7551_v18 = vsel %vm1809_vm5, %v7397_v33, %v5040_v40 }
 0x172   : > { %v5174_v57 = vpop.permute.xlu1 %5173  ;;  %v1876_v23 = vsel %vm1875_vm7, %v1843_v58, %v5170_v44  ;;  %v1877_v17 = vsel %vm1875_vm7, %v1844_v26, %v5171_v0  ;;  %v1819_v44 = vsel %vm1809_vm5, %v7377_v5, %v5031_v21  ;;  %v5041_v0 = vunpack.i.h.bf16 %v6944_v45 }
 0x173   : > { %v5179_v1 = vpop.permute.xlu0 %5178  ;;  %v5176_v30 = vunpack.i.h.bf16 %v5174_v57  ;;  %v5175_v20 = vunpack.i.l.bf16 %v5174_v57  ;;  %v1821_v5 = vsel %vm1809_vm5, %v7393_v48, %v5036_v47  ;;  %v5105_v45 = vunpack.i.l.bf16 %v7232_v52  ;;  %v8986_v48 = vld [vmem:[#allocation4_spill] sm:$0xff] }
 0x174   : > { %v5181_v2 = vunpack.i.h.bf16 %v5179_v1  ;;  %v5180_v37 = vunpack.i.l.bf16 %v5179_v1  ;;  %v5045_v47 = vunpack.i.l.bf16 %v8986_v48 }
 0x175   : > { %v1878_v7 = vsel %vm1875_vm7, %v1845_v46, %v5175_v20  ;;  %v1879_v19 = vsel %vm1875_vm7, %v1846_v50, %v5176_v30  ;;  %v1847_v30 = vsel %vm1842_vm6, %v1814_v38, %v5100_v60  ;;  %v1848_v20 = vsel %vm1842_vm6, %v1815_v6, %v5101_v16  ;;  %v8987_v46 = vld [vmem:[#allocation14_spill] sm:$0xff] }
 0x176   : > { %v5184_v55 = vpop.permute.xlu1 %5183  ;;  %v1909_v51 = vsel %vm1908_vm8, %v1876_v23, %v5180_v37  ;;  %v1910_v39 = vsel %vm1908_vm8, %v1877_v17, %v5181_v2  ;;  %v1849_v38 = vsel %vm1842_vm6, %v1816_v35, %v5105_v45  ;;  %v5110_v6 = vunpack.i.l.bf16 %v8987_v46 }
 0x177   : > { %v5186_v3 = vunpack.i.h.bf16 %v5184_v55  ;;  %v5185_v57 = vunpack.i.l.bf16 %v5184_v55  ;;  %v5189_v1 = vpop.permute.xlu0 %5188  ;;  %v1941_v62 = vpack.c.bf16 %v1910_v39, %v1909_v51  ;;  %v1820_v55 = vsel %vm1809_vm5, %v7381_v8, %v5035_v29 }
 0x178   : > { %v5191_v17 = vunpack.i.h.bf16 %v5189_v1  ;;  %v5190_v26 = vunpack.i.l.bf16 %v5189_v1  ;;  %v5111_v51 = vunpack.i.h.bf16 %v8987_v46 }
 0x179   : > { %v1911_v36 = vsel %vm1908_vm8, %v1878_v7, %v5185_v57  ;;  %v1912_v58 = vsel %vm1908_vm8, %v1879_v19, %v5186_v3  ;;  %4598 = vmatprep.mubr.msk.bf16.mxu0 %vm1984_vm9, %v1941_v62  ;;  %v5106_v62 = vunpack.i.h.bf16 %v7232_v52  ;;  %v1823_v7 = vsel %vm1809_vm5, %v7401_v42, %v5041_v0 }
 0x17a   : > { %v5194_v4 = vpop.permute.xlu1 %5193  ;;  %v1942_v21 = vpack.c.bf16 %v1912_v58, %v1911_v36  ;;  %v1880_v33 = vsel %vm1875_vm7, %v1847_v30, %v5190_v26  ;;  %v1881_v40 = vsel %vm1875_vm7, %v1848_v20, %v5191_v17  ;;  %v5046_v19 = vunpack.i.h.bf16 %v8986_v48  ;;  %v8989_v30 = vld [vmem:[#allocation13_spill] sm:$0xff] }
 0x17b   : > { %v5199_v2 = vpop.permute.xlu0 %5198  ;;  %v5196_v37 = vunpack.i.h.bf16 %v5194_v4  ;;  %v5195_v8 = vunpack.i.l.bf16 %v5194_v4  ;;  %v1850_v39 = vsel %vm1842_vm6, %v1817_v54, %v5106_v62  ;;  %v8988_v54 = vld [vmem:[#allocation6_spill] sm:$0xff]  ;;  %v5115_v42 = vunpack.i.l.bf16 %v8989_v30 }
 0x17c   : > { %v5201_v29 = vunpack.i.h.bf16 %v5199_v2  ;;  %v5200_v23 = vunpack.i.l.bf16 %v5199_v2  ;;  %4599 = vmatmul.mubr.msk.bf16.vlgmr.msra.gmra.mrb[0].mxu0 %vm1984_vm9, %v1942_v21  ;;  %v5051_v4 = vunpack.i.h.bf16 %v8988_v54  ;;  %v5050_v21 = vunpack.i.l.bf16 %v8988_v54 }
 0x17d   : > { %v1882_v35 = vsel %vm1875_vm7, %v1849_v38, %v5195_v8  ;;  %v1883_v36 = vsel %vm1875_vm7, %v1850_v39, %v5196_v37  ;;  %v1824_v62 = vsel %vm1809_vm5, %v7412_v32, %v5045_v47  ;;  %v1851_v2 = vsel %vm1842_vm6, %v7519_v43, %v5110_v6  ;;  %v8990_v38 = vld [vmem:[#allocation16_spill] sm:$0xff] }
 0x17e   : > { %v1913_v52 = vsel %vm1908_vm8, %v1880_v33, %v5200_v23  ;;  %v1914_v16 = vsel %vm1908_vm8, %v1881_v40, %v5201_v29  ;;  %v5204_v60 = vpop.permute.xlu1 %5203  ;;  %v1852_v37 = vsel %vm1842_vm6, %v1819_v44, %v5111_v51  ;;  %v5116_v8 = vunpack.i.h.bf16 %v8989_v30 }
 0x17f   : > { %v5206_v50 = vunpack.i.h.bf16 %v5204_v60  ;;  %v5205_v3 = vunpack.i.l.bf16 %v5204_v60  ;;  %v5209_v57 = vpop.permute.xlu0 %5208  ;;  %v1943_v1 = vpack.c.bf16 %v1914_v16, %v1913_v52  ;;  %v1825_v40 = vsel %vm1809_vm5, %v7416_v61, %v5046_v19 }
 0x180   : > { %v5211_v26 = vunpack.i.h.bf16 %v5209_v57  ;;  %v5210_v45 = vunpack.i.l.bf16 %v5209_v57  ;;  %v5121_v52 = vunpack.i.h.bf16 %v8990_v38  ;;  %v1853_v44 = vsel %vm1842_vm6, %v1820_v55, %v5115_v42 }
 0x181   : > { %v1915_v58 = vsel %vm1908_vm8, %v1882_v35, %v5205_v3  ;;  %v1916_v17 = vsel %vm1908_vm8, %v1883_v36, %v5206_v50  ;;  %4602 = vmatprep.mubr.msk.bf16.mxu0 %vm1984_vm9, %v1943_v1  ;;  %v5120_v47 = vunpack.i.l.bf16 %v8990_v38  ;;  %v1854_v60 = vsel %vm1842_vm6, %v1821_v5, %v5116_v8 }
 0x182   : > { %v5214_v0 = vpop.permute.xlu1 %5213  ;;  %v1944_v20 = vpack.c.bf16 %v1916_v17, %v1915_v58  ;;  %v1884_v32 = vsel %vm1875_vm7, %v1851_v2, %v5210_v45  ;;  %v1885_v43 = vsel %vm1875_vm7, %v1852_v37, %v5211_v26  ;;  %v1826_v57 = vsel %vm1809_vm5, %v7424_v31, %v5050_v21  ;;  %v8991_v17 = vld [vmem:[#allocation5_spill] sm:$0xff]  ;;  %v8992_v31 = vld [vmem:[#allocation15_spill] sm:$0xff] }
 0x183   : > { %v5219_v29 = vpop.permute.xlu0 %5218  ;;  %v5216_v23 = vunpack.i.h.bf16 %v5214_v0  ;;  %v5215_v48 = vunpack.i.l.bf16 %v5214_v0  ;;  %v1827_v1 = vsel %vm1809_vm5, %v7428_v15, %v5051_v4  ;;  %v5056_v26 = vunpack.i.h.bf16 %v8991_v17  ;;  %v8993_v4 = vld [vmem:[#allocation8_spill] sm:$0xff] }
 0x184   : > { %v5221_v46 = vunpack.i.h.bf16 %v5219_v29  ;;  %v5220_v33 = vunpack.i.l.bf16 %v5219_v29  ;;  %4603 = vmatmul.mubr.msk.bf16.gmra.mrb[4].mxu0 %vm1984_vm9, %v1944_v20  ;;  %v5055_v45 = vunpack.i.l.bf16 %v8991_v17  ;;  %v5125_v54 = vunpack.i.l.bf16 %v8992_v31 }
 0x185   : > { %v1886_v55 = vsel %vm1875_vm7, %v1853_v44, %v5215_v48  ;;  %v1887_v19 = vsel %vm1875_vm7, %v1854_v60, %v5216_v23  ;;  %v5061_v30 = vunpack.i.h.bf16 %v8993_v4  ;;  %v1855_v42 = vsel %vm1842_vm6, %v7551_v18, %v5120_v47 }
 0x186   : > { %v1917_v51 = vsel %vm1908_vm8, %v1884_v32, %v5220_v33  ;;  %v1918_v6 = vsel %vm1908_vm8, %v1885_v43, %v5221_v46  ;;  %v5224_v16 = vpop.permute.xlu1 %5223  ;;  %v1856_v0 = vsel %vm1842_vm6, %v1823_v7, %v5121_v52  ;;  %v5126_v20 = vunpack.i.h.bf16 %v8992_v31 }
 0x187   : > { %v5226_v39 = vunpack.i.h.bf16 %v5224_v16  ;;  %v5225_v50 = vunpack.i.l.bf16 %v5224_v16  ;;  %v5229_v61 = vpop.permute.xlu0 %5228  ;;  %v1945_v3 = vpack.c.bf16 %v1918_v6, %v1917_v51  ;;  %v5060_v48 = vunpack.i.l.bf16 %v8993_v4 }
 0x188   : > { %v5231_v58 = vunpack.i.h.bf16 %v5229_v61  ;;  %v5230_v5 = vunpack.i.l.bf16 %v5229_v61  ;;  %v5131_v46 = vunpack.i.h.bf16 %v7332_v13  ;;  %v1857_v18 = vsel %vm1842_vm6, %v1824_v62, %v5125_v54 }
 0x189   : > { %v1919_v35 = vsel %vm1908_vm8, %v1886_v55, %v5225_v50  ;;  %v1920_v36 = vsel %vm1908_vm8, %v1887_v19, %v5226_v39  ;;  %4606 = vmatprep.mubr.msk.bf16.mxu0 %vm1984_vm9, %v1945_v3  ;;  %v5130_v7 = vunpack.i.l.bf16 %v7332_v13  ;;  %v1858_v44 = vsel %vm1842_vm6, %v1825_v40, %v5126_v20  ;;  %v8994_v19 = vld [vmem:[#allocation7_spill] sm:$0xff] }
 0x18a   : > { %v5234_v21 = vpop.permute.xlu1 %5233  ;;  %v1946_v15 = vpack.c.bf16 %v1920_v36, %v1919_v35  ;;  %v1888_v33 = vsel %vm1875_vm7, %v1855_v42, %v5230_v5  ;;  %v1889_v38 = vsel %vm1875_vm7, %v1856_v0, %v5231_v58  ;;  %v1828_v60 = vsel %vm1809_vm5, %v7432_v63, %v5055_v45  ;;  %v8996_v0 = vld [vmem:[#allocation19_spill] sm:$0xff] }
 0x18b   : > { %v5239_v2 = vpop.permute.xlu0 %5238  ;;  %v5236_v37 = vunpack.i.h.bf16 %v5234_v21  ;;  %v5235_v8 = vunpack.i.l.bf16 %v5234_v21  ;;  %v1829_v39 = vsel %vm1809_vm5, %v7436_v25, %v5056_v26  ;;  %v1830_v55 = vsel %vm1809_vm5, %v7440_v9, %v5060_v48  ;;  %v8995_v9 = vld [vmem:[#allocation10_spill] sm:$0xff] }
 0x18c   : > { %v5241_v29 = vunpack.i.h.bf16 %v5239_v2  ;;  %v5240_v23 = vunpack.i.l.bf16 %v5239_v2  ;;  %4607 = vmatmul.mubr.msk.bf16.gmra.mrb[8].mxu0 %vm1984_vm9, %v1946_v15  ;;  %v5066_v63 = vunpack.i.h.bf16 %v8994_v19  ;;  %v5135_v35 = vunpack.i.l.bf16 %v7373_v11 }
 0x18d   : > { %v1890_v62 = vsel %vm1875_vm7, %v1857_v18, %v5235_v8  ;;  %v1891_v13 = vsel %vm1875_vm7, %v1858_v44, %v5236_v37  ;;  %v5065_v58 = vunpack.i.l.bf16 %v8994_v19  ;;  %v1859_v5 = vsel %vm1842_vm6, %v1826_v57, %v5130_v7 }
 0x18e   : > { %v1921_v52 = vsel %vm1908_vm8, %v1888_v33, %v5240_v23  ;;  %v1922_v32 = vsel %vm1908_vm8, %v1889_v38, %v5241_v29  ;;  %v5244_v43 = vpop.permute.xlu1 %5243  ;;  %v1860_v17 = vsel %vm1842_vm6, %v1827_v1, %v5131_v46  ;;  %v5136_v26 = vunpack.i.h.bf16 %v7373_v11 }
 0x18f   : > { %v5246_v47 = vunpack.i.h.bf16 %v5244_v43  ;;  %v5245_v51 = vunpack.i.l.bf16 %v5244_v43  ;;  %v5249_v6 = vpop.permute.xlu0 %5248  ;;  %v1947_v16 = vpack.c.bf16 %v1922_v32, %v1921_v52  ;;  %v5070_v42 = vunpack.i.l.bf16 %v8995_v9 }
 0x190   : > { %v5251_v3 = vunpack.i.h.bf16 %v5249_v6  ;;  %v5250_v40 = vunpack.i.l.bf16 %v5249_v6  ;;  %v5141_v20 = vunpack.i.h.bf16 %v8996_v0  ;;  %v1861_v57 = vsel %vm1842_vm6, %v1828_v60, %v5135_v35 }
 0x191   : > { %v1923_v50 = vsel %vm1908_vm8, %v1890_v62, %v5245_v51  ;;  %v1924_v61 = vsel %vm1908_vm8, %v1891_v13, %v5246_v47  ;;  %4610 = vmatprep.mubr.msk.bf16.mxu0 %vm1984_vm9, %v1947_v16  ;;  %v5140_v1 = vunpack.i.l.bf16 %v8996_v0  ;;  %v1862_v23 = vsel %vm1842_vm6, %v1829_v39, %v5136_v26 }
 0x192   : > { %v5254_v25 = vpop.permute.xlu1 %5253  ;;  %v1948_v36 = vpack.c.bf16 %v1924_v61, %v1923_v50  ;;  %v1892_v2 = vsel %vm1875_vm7, %v1859_v5, %v5250_v40  ;;  %v1893_v37 = vsel %vm1875_vm7, %v1860_v17, %v5251_v3  ;;  %v1831_v18 = vsel %vm1809_vm5, %v7447_v49, %v5061_v30  ;;  %v8997_v30 = vld [vmem:[#allocation20_spill] sm:$0xff] }
 0x193   : > { %v5259_v45 = vpop.permute.xlu0 %5258  ;;  %v5256_v31 = vunpack.i.h.bf16 %v5254_v25  ;;  %v5255_v54 = vunpack.i.l.bf16 %v5254_v25  ;;  %v5071_v7 = vunpack.i.h.bf16 %v8995_v9  ;;  %v1832_v4 = vsel %vm1809_vm5, %v7451_v22, %v5065_v58 }
 0x194   : > { %v5261_v21 = vunpack.i.h.bf16 %v5259_v45  ;;  %v5260_v15 = vunpack.i.l.bf16 %v5259_v45  ;;  %4611 = vmatmul.mubr.msk.bf16.gmra.mrb[12].mxu0 %vm1984_vm9, %v1948_v36  ;;  %v1833_v49 = vsel %vm1809_vm5, %v7455_v12, %v5066_v63  ;;  %v5145_v6 = vunpack.i.l.bf16 %v8997_v30  ;;  %v8998_v12 = vld [vmem:[#allocation9_spill] sm:$0xff] }
 0x195   : > { %v1894_v52 = vsel %vm1875_vm7, %v1861_v57, %v5255_v54  ;;  %v1895_v32 = vsel %vm1875_vm7, %v1862_v23, %v5256_v31  ;;  %v1834_v39 = vsel %vm1809_vm5, %v7459_v14, %v5070_v42  ;;  %v1863_v62 = vsel %vm1842_vm6, %v1830_v55, %v5140_v1  ;;  %v8999_v57 = vld [vmem:[#allocation12_spill] sm:$0xff] }
 0x196   : > { %v1925_v11 = vsel %vm1908_vm8, %v1892_v2, %v5260_v15  ;;  %v1926_v8 = vsel %vm1908_vm8, %v1893_v37, %v5261_v21  ;;  %v5264_v29 = vpop.permute.xlu1 %5263  ;;  %v1864_v13 = vsel %vm1842_vm6, %v1831_v18, %v5141_v20  ;;  %v5146_v50 = vunpack.i.h.bf16 %v8997_v30 }
 0x197   : > { %v5266_v48 = vunpack.i.h.bf16 %v5264_v29  ;;  %v5265_v46 = vunpack.i.l.bf16 %v5264_v29  ;;  %v5269_v33 = vpop.permute.xlu0 %5268  ;;  %v1949_v38 = vpack.c.bf16 %v1926_v8, %v1925_v11  ;;  %v5075_v63 = vunpack.i.l.bf16 %v8998_v12 }
 0x198   : > { %v5271_v47 = vunpack.i.h.bf16 %v5269_v33  ;;  %v5270_v51 = vunpack.i.l.bf16 %v5269_v33  ;;  %v5151_v35 = vunpack.i.h.bf16 %v7420_v10  ;;  %v1865_v55 = vsel %vm1842_vm6, %v1832_v4, %v5145_v6 }
 0x199   : > { %v1927_v43 = vsel %vm1908_vm8, %v1894_v52, %v5265_v46  ;;  %v1928_v44 = vsel %vm1908_vm8, %v1895_v32, %v5266_v48  ;;  %4614 = vmatprep.mubr.msk.bf16.mxu0 %vm1984_vm9, %v1949_v38  ;;  %v5150_v36 = vunpack.i.l.bf16 %v7420_v10  ;;  %v1866_v26 = vsel %vm1842_vm6, %v1833_v49, %v5146_v50 }
 0x19a   : > { %v5274_v16 = vpop.permute.xlu1 %5273  ;;  %v1950_v60 = vpack.c.bf16 %v1928_v44, %v1927_v43  ;;  %v1896_v25 = vsel %vm1875_vm7, %v1863_v62, %v5270_v51  ;;  %v1897_v14 = vsel %vm1875_vm7, %v1864_v13, %v5271_v47  ;;  %v1835_v15 = vsel %vm1809_vm5, %v7465_v53, %v5071_v7  ;;  %v9000_v13 = vld [vmem:[#allocation11_spill] sm:$0xff] }
 0x19b   : > { %v5279_v61 = vpop.permute.xlu0 %5278  ;;  %v5276_v3 = vunpack.i.h.bf16 %v5274_v16  ;;  %v5275_v40 = vunpack.i.l.bf16 %v5274_v16  ;;  %v5076_v9 = vunpack.i.h.bf16 %v8998_v12  ;;  %v5081_v1 = vunpack.i.h.bf16 %v8999_v57 }
 0x19c   : > { %v5281_v22 = vunpack.i.h.bf16 %v5279_v61  ;;  %v5280_v19 = vunpack.i.l.bf16 %v5279_v61  ;;  %4615 = vmatmul.mubr.msk.bf16.gmra.mrb[16].mxu0 %vm1984_vm9, %v1950_v60  ;;  %v5080_v11 = vunpack.i.l.bf16 %v8999_v57  ;;  %v5155_v53 = vunpack.i.l.bf16 %v7461_v56 }
 0x19d   : > { %v1898_v42 = vsel %vm1875_vm7, %v1865_v55, %v5275_v40  ;;  %v1899_v10 = vsel %vm1875_vm7, %v1866_v26, %v5276_v3  ;;  %v1836_v23 = vsel %vm1809_vm5, %v7469_v28, %v5075_v63  ;;  %v1867_v48 = vsel %vm1842_vm6, %v1834_v39, %v5150_v36  ;;  %v9003_v36 = vld [vmem:[#allocation17_spill] sm:$0xff] }
 0x19e   : > { %v1929_v58 = vsel %vm1908_vm8, %v1896_v25, %v5280_v19  ;;  %v1930_v5 = vsel %vm1908_vm8, %v1897_v14, %v5281_v22  ;;  %v5284_v17 = vpop.permute.xlu1 %5283  ;;  %v1868_v46 = vsel %vm1842_vm6, %v1835_v15, %v5151_v35  ;;  %v5156_v33 = vunpack.i.h.bf16 %v7461_v56  ;;  %v9001_v14 = vld [vmem:[#allocation57_spill] sm:$0xff] }
 0x19f   : > { %v5286_v45 = vunpack.i.h.bf16 %v5284_v17  ;;  %v5285_v31 = vunpack.i.l.bf16 %v5284_v17  ;;  %v5289_v54 = vpop.permute.xlu0 %5288  ;;  %v1951_v21 = vpack.c.bf16 %v1930_v5, %v1929_v58  ;;  %v1837_v43 = vsel %vm1809_vm5, %v7481_v41, %v5076_v9  ;;  %v9005_v9 = vld [vmem:[#allocation18_spill] sm:$0xff] }
 0x1a0   : > { %v5291_v2 = vunpack.i.h.bf16 %v5289_v54  ;;  %v5290_v37 = vunpack.i.l.bf16 %v5289_v54  ;;  %v5161_v44 = vunpack.i.h.bf16 %v7473_v24  ;;  %v1869_v51 = vsel %vm1842_vm6, %v1836_v23, %v5155_v53 }
 0x1a1   : > { %v1931_v0 = vsel %vm1908_vm8, %v1898_v42, %v5285_v31  ;;  %v1932_v20 = vsel %vm1908_vm8, %v1899_v10, %v5286_v45  ;;  %4618 = vmatprep.mubr.msk.bf16.mxu0 %vm1984_vm9, %v1951_v21  ;;  %v5160_v56 = vunpack.i.l.bf16 %v7473_v24  ;;  %v1870_v6 = vsel %vm1842_vm6, %v1837_v43, %v5156_v33  ;;  %v2369_v43 = vld [vmem:[#allocation3 + $0x11] sm:$0xff] }
 0x1a2   : > { %v5294_v8 = vpop.permute.xlu1 %5293  ;;  %v1952_v29 = vpack.c.bf16 %v1932_v20, %v1931_v0  ;;  %v1900_v28 = vsel %vm1875_vm7, %v1867_v48, %v5290_v37  ;;  %v1901_v47 = vsel %vm1875_vm7, %v1868_v46, %v5291_v2  ;;  %v1838_v62 = vsel %vm1809_vm5, %v7485_v34, %v5080_v11 }
 0x1a3   : > { %v5299_v38 = vpop.permute.xlu0 %5298  ;;  %v5296_v18 = vunpack.i.h.bf16 %v5294_v8  ;;  %v5295_v7 = vunpack.i.l.bf16 %v5294_v8  ;;  %v5085_v50 = vunpack.i.l.bf16 %v9000_v13  ;;  %v1839_v12 = vsel %vm1809_vm5, %v7489_v27, %v5081_v1 }
 0x1a4   : > { %v5301_v52 = vunpack.i.h.bf16 %v5299_v38  ;;  %v5300_v32 = vunpack.i.l.bf16 %v5299_v38  ;;  %4619 = vmatmul.mubr.msk.bf16.gmra.mrb[20].mxu0 %vm1984_vm9, %v1952_v29  ;;  %v5086_v63 = vunpack.i.h.bf16 %v9000_v13  ;;  %v5165_v34 = vunpack.i.l.bf16 %v7496_v59 }
 0x1a5   : > { %v1902_v61 = vsel %vm1875_vm7, %v1869_v51, %v5295_v7  ;;  %v1903_v24 = vsel %vm1875_vm7, %v1870_v6, %v5296_v18  ;;  %v9002_v55 = vunpack.i.l.bf16 %v9001_v14  ;;  %v1871_v5 = vsel %vm1842_vm6, %v1838_v62, %v5160_v56  ;;  %v2336_v18 = vld [vmem:[#allocation3 + $0x8] sm:$0xff]  ;;  %v2337_v7 = vld [vmem:[#allocation3 + $0x10] sm:$0xff] }
 0x1a6   : > { %v1933_v4 = vsel %vm1908_vm8, %v1900_v28, %v5300_v32  ;;  %v1934_v49 = vsel %vm1908_vm8, %v1901_v47, %v5301_v52  ;;  %v5304_v30 = vpop.permute.xlu1 %5303  ;;  %v1872_v17 = vsel %vm1842_vm6, %v1839_v12, %v5161_v44  ;;  %v5166_v26 = vunpack.i.h.bf16 %v7496_v59  ;;  %v2368_v32 = vld [vmem:[#allocation3 + $0x9] sm:$0xff]  ;;  %v7748_v28 = vld [vmem:[%s8787_s2] ss:$0 sm:$0xff] }
 0x1a7   : > { %v5306_v16 = vunpack.i.h.bf16 %v5304_v30  ;;  %v5305_v60 = vunpack.i.l.bf16 %v5304_v30  ;;  %v5309_v41 = vpop.permute.xlu0 %5308  ;;  %v1953_v39 = vpack.c.bf16 %v1934_v49, %v1933_v4  ;;  %v1807_v58 = vsel %vm1776_vm4, %v9003_v36, %v9002_v55 }
 0x1a8   : > { %v5311_v22 = vunpack.i.h.bf16 %v5309_v41  ;;  %v5310_v19 = vunpack.i.l.bf16 %v5309_v41  ;;  %v9004_v15 = vunpack.i.h.bf16 %v9001_v14  ;;  %v1840_v10 = vsel %vm1809_vm5, %v1807_v58, %v5085_v50 }
 0x1a9   : > { %v1935_v3 = vsel %vm1908_vm8, %v1902_v61, %v5305_v60  ;;  %v1936_v40 = vsel %vm1908_vm8, %v1903_v24, %v5306_v16  ;;  %4622 = vmatprep.mubr.msk.bf16.mxu0 %vm1984_vm9, %v1953_v39  ;;  %v1873_v2 = vsel %vm1842_vm6, %v1840_v10, %v5165_v34  ;;  %v5327_v52 = vpack.i.bf16 %v2337_v7, %v2336_v18 }
 0x1aa   : > { %v5314_v35 = vpop.permute.xlu1 %5313  ;;  %v1954_v25 = vpack.c.bf16 %v1936_v40, %v1935_v3  ;;  %v1808_v42 = vsel %vm1776_vm4, %v9005_v9, %v9004_v15  ;;  %v1904_v0 = vsel %vm1875_vm7, %v1871_v5, %v5310_v19  ;;  %v1905_v20 = vsel %vm1875_vm7, %v1872_v17, %v5311_v22 }
 0x1ab   : > { %v5319_v45 = vpop.permute.xlu0 %5318  ;;  %v5316_v31 = vunpack.i.h.bf16 %v5314_v35  ;;  %v5315_v27 = vunpack.i.l.bf16 %v5314_v35  ;;  %v1841_v59 = vsel %vm1809_vm5, %v1808_v42, %v5086_v63  ;;  %5328 = vrot.lane.b32.xlu0 %v5327_v52, %s5982_s25  ;;  %v5332_v44 = vpack.i.bf16 %v2369_v43, %v2368_v32 }
 0x1ac   : > { %v5321_v54 = vunpack.i.h.bf16 %v5319_v45  ;;  %v5320_v21 = vunpack.i.l.bf16 %v5319_v45  ;;  %4623 = vmatmul.mubr.msk.bf16.gmra.mrb[24].mxu0 %vm1984_vm9, %v1954_v25  ;;  %v1874_v11 = vsel %vm1842_vm6, %v1841_v59, %v5166_v26 }
 0x1ad   : > { %v1906_v23 = vsel %vm1875_vm7, %v1873_v2, %v5315_v27  ;;  %v1907_v48 = vsel %vm1875_vm7, %v1874_v11, %v5316_v31 }
 0x1ae   : > { %v1937_v37 = vsel %vm1908_vm8, %v1904_v0, %v5320_v21  ;;  %v1938_v57 = vsel %vm1908_vm8, %v1905_v20, %v5321_v54  ;;  %v5324_v1 = vpop.permute.xlu1 %5323 }
 0x1af   : > { %v5326_v53 = vunpack.i.h.bf16 %v5324_v1  ;;  %v5325_v8 = vunpack.i.l.bf16 %v5324_v1  ;;  %v1955_v29 = vpack.c.bf16 %v1938_v57, %v1937_v37  ;;  %5333 = vrot.lane.b32.xlu0 %v5332_v44, %s5983_s26 }
 0x1b1   : > { %v1939_v46 = vsel %vm1908_vm8, %v1906_v23, %v5325_v8  ;;  %v1940_v33 = vsel %vm1908_vm8, %v1907_v48, %v5326_v53  ;;  %4626 = vmatprep.mubr.msk.bf16.mxu0 %vm1984_vm9, %v1955_v29 }
 0x1b2   : > { %v1956_v38 = vpack.c.bf16 %v1940_v33, %v1939_v46 }
 0x1b4   : > { %4627 = vmatmul.mubr.msk.bf16.gmra.mrb[28].mxu0 %vm1984_vm9, %v1956_v38 }
 0x24f   : > { %v4600_v47 = vpop.f32.mrb[0].mxu0 }
 0x250   : > { %v2080_v51 = vadd.f32 %v4600_v47, %v7748_v28  ;;  %v2071_v56 = vpop.f32.mrb[1].mxu0 }
 0x251   : > { %v2072_v4 = vadd.f32 %v7748_v28, %v2071_v56  ;;  %v4601_v49 = vpop.f32.mrb[2].mxu0 }
 0x252   : > { %v2200_v30 = vmax.f32 %v2080_v51, 0.0  ;;  %v2083_v6 = vadd.f32 %v4601_v49, %v7748_v28  ;;  %v2074_v16 = vpop.f32.mrb[3].mxu0 }
 0x253   : > { %v2198_v60 = vmax.f32 %v2072_v4, 0.0  ;;  %v2075_v41 = vadd.f32 %v7748_v28, %v2074_v16 }
 0x254   : > { %2274 = vst.msk [vmem:[#allocation3 + $0x48] sm:$0xff] %vm226_vm0, %v2200_v30  ;;  %v2201_v39 = vmax.f32 %v2083_v6, 0.0 }
 0x255   : > { %2272 = vst.msk [vmem:[#allocation3 + $0x28] sm:$0xff] %vm226_vm0, %v2198_v60  ;;  %v2199_v62 = vmax.f32 %v2075_v41, 0.0 }
 0x256   : > { %2275 = vst.msk [vmem:[#allocation3 + $0x50] sm:$0xff] %vm226_vm0, %v2201_v39 }
 0x257   : > { %2273 = vst.msk [vmem:[#allocation3 + $0x30] sm:$0xff] %vm226_vm0, %v2199_v62  ;;  %v4604_v13 = vpop.f32.mrb[4].mxu0 }
 0x258   : > { %v2096_v50 = vadd.f32 %v4604_v13, %v7748_v28  ;;  %v2087_v61 = vpop.f32.mrb[5].mxu0 }
 0x259   : > { %v2088_v24 = vadd.f32 %v7748_v28, %v2087_v61  ;;  %v4605_v3 = vpop.f32.mrb[6].mxu0 }
 0x25a   : > { %v2204_v40 = vmax.f32 %v2096_v50, 0.0  ;;  %v2099_v22 = vadd.f32 %v4605_v3, %v7748_v28  ;;  %v2090_v19 = vpop.f32.mrb[7].mxu0 }
 0x25b   : > { %v2202_v12 = vmax.f32 %v2088_v24, 0.0  ;;  %v2091_v63 = vadd.f32 %v7748_v28, %v2090_v19  ;;  %v7763_v35 = vld [vmem:[#allocation3 + $0x47] sm:$0xff] }
 0x25c   : > { %2278 = vst.msk [vmem:[#allocation3 + $0x88] sm:$0xff] %vm226_vm0, %v2204_v40  ;;  %v2205_v34 = vmax.f32 %v2099_v22, 0.0  ;;  %v2340_v55 = vld [vmem:[#allocation3 + $0x48] sm:$0xff] }
 0x25d   : > { %2276 = vst.msk [vmem:[#allocation3 + $0x68] sm:$0xff] %vm226_vm0, %v2202_v12  ;;  %v2203_v25 = vmax.f32 %v2091_v63, 0.0  ;;  %v7766_v14 = vld [vmem:[#allocation3 + $0x4f] sm:$0xff]  ;;  %v7796_v52 = vld [vmem:[#allocation3 + $0x27] sm:$0xff] }
 0x25e   : > { %v2341_v36 = vld [vmem:[#allocation3 + $0x50] sm:$0xff]  ;;  %2279 = vst.msk [vmem:[#allocation3 + $0x90] sm:$0xff] %vm226_vm0, %v2205_v34  ;;  %v5347_v58 = vpack.i.bf16 %v7766_v14, %v7763_v35  ;;  %v2338_v32 = vld [vmem:[#allocation3 + $0x28] sm:$0xff] }
 0x25f   : > { %v5337_v5 = vpack.i.bf16 %v2341_v36, %v2340_v55  ;;  %2277 = vst.msk [vmem:[#allocation3 + $0x70] sm:$0xff] %vm226_vm0, %v2203_v25  ;;  %v4608_v17 = vpop.f32.mrb[8].mxu0  ;;  %v2372_v26 = vld [vmem:[#allocation3 + $0x49] sm:$0xff]  ;;  %v2373_v45 = vld [vmem:[#allocation3 + $0x51] sm:$0xff] }
 0x260   : > { %v2112_v31 = vadd.f32 %v4608_v17, %v7748_v28  ;;  %5348 = vrot.lane.b32.xlu1 %v5347_v58, %s5984_s27  ;;  %v2103_v27 = vpop.f32.mrb[9].mxu0  ;;  %v5342_v10 = vpack.i.bf16 %v2373_v45, %v2372_v26  ;;  %v7790_v33 = vld [vmem:[#allocation3 + $0x2f] sm:$0xff] }
 0x261   : > { %5338 = vrot.lane.b32.xlu0 %v5337_v5, %s5982_s25  ;;  %v2104_v54 = vadd.f32 %v7748_v28, %v2103_v27  ;;  %v4609_v21 = vpop.f32.mrb[10].mxu0  ;;  %v2339_v38 = vld [vmem:[#allocation3 + $0x30] sm:$0xff]  ;;  %v5387_v43 = vpack.i.bf16 %v7790_v33, %v7796_v52 }
 0x262   : > { %v2208_v15 = vmax.f32 %v2112_v31, 0.0  ;;  %v2115_v9 = vadd.f32 %v4609_v21, %v7748_v28  ;;  %v2106_v42 = vpop.f32.mrb[11].mxu0  ;;  %v5377_v44 = vpack.i.bf16 %v2339_v38, %v2338_v32  ;;  %v2370_v56 = vld [vmem:[#allocation3 + $0x29] sm:$0xff]  ;;  %v2371_v4 = vld [vmem:[#allocation3 + $0x31] sm:$0xff] }
 0x263   : > { %v2206_v0 = vmax.f32 %v2104_v54, 0.0  ;;  %v2107_v20 = vadd.f32 %v7748_v28, %v2106_v42  ;;  %v2344_v60 = vld [vmem:[#allocation3 + $0x88] sm:$0xff]  ;;  %v5382_v50 = vpack.i.bf16 %v2371_v4, %v2370_v56  ;;  %v5970_v54 = vld [vmem:[%s8788_s3] sm:$0xff]  }
 0x264   : > { %2282 = vst.msk [vmem:[#allocation3 + $0xc8] sm:$0xff] %vm226_vm0, %v2208_v15  ;;  %v2209_v59 = vmax.f32 %v2115_v9, 0.0  ;;  %5363 = vrot.lane.b32.xlu1 %v5347_v58, %s5987_s30  ;;  %v7836_v15 = vld [vmem:[#allocation3 + $0x87] sm:$0xff]  ;;  %4630 = vmatprep.subr.bf16.mxu1 %v5970_v54 }
 0x265   : > { %5343 = vrot.lane.b32.xlu0 %v5342_v10, %s5983_s26  ;;  %2280 = vst.msk [vmem:[#allocation3 + $0xa8] sm:$0xff] %vm226_vm0, %v2206_v0  ;;  %v2207_v2 = vmax.f32 %v2107_v20, 0.0  ;;  %v2345_v51 = vld [vmem:[#allocation3 + $0x90] sm:$0xff]  ;;  %4631 = vmatpush3.bf16.msra.mxu1 %v5970_v54  ;;  %v2531_v56 = vld [vmem:[#allocation3 + $0x68] sm:$0xff] }
 0x266   : > { %2283 = vst.msk [vmem:[#allocation3 + $0xd0] sm:$0xff] %vm226_vm0, %v2209_v59  ;;  %v7807_v13 = vpack.i.bf16 %v2345_v51, %v2344_v60  ;;  %v2376_v3 = vld [vmem:[#allocation3 + $0x89] sm:$0xff]  ;;  %v2377_v40 = vld [vmem:[#allocation3 + $0x91] sm:$0xff] }
 0x267   : > { %2281 = vst.msk [vmem:[#allocation3 + $0xb0] sm:$0xff] %vm226_vm0, %v2207_v2  ;;  %v4612_v37 = vpop.f32.mrb[12].mxu0  ;;  %v7816_v12 = vpack.i.bf16 %v2377_v40, %v2376_v3  ;;  %v7826_v31 = vld [vmem:[#allocation3 + $0x8f] sm:$0xff] }
 0x268   : > { %v2128_v57 = vadd.f32 %v4612_v37, %v7748_v28  ;;  %5368 = vrot.lane.b32.xlu1 %v5337_v5, %s5988_s12  ;;  %v2119_v1 = vpop.f32.mrb[13].mxu0  ;;  %v5412_v9 = vpack.i.bf16 %v7826_v31, %v7836_v15  ;;  %v5971_v59 = vld [vmem:[%s8788_s3 + $0x8] sm:$0xff]   ;;  %v2532_v32 = vld [vmem:[#allocation3 + $0x70] sm:$0xff] }
 0x269   : > { %5353 = vrot.lane.b32.xlu0 %v5337_v5, %s5985_s28  ;;  %v2120_v11 = vadd.f32 %v7748_v28, %v2119_v1  ;;  %v4613_v53 = vpop.f32.mrb[14].mxu0  ;;  %4632 = vmatprep.subr.bf16.mxu1 %v5971_v59 }
 0x26a   : > { %v2212_v8 = vmax.f32 %v2128_v57, 0.0  ;;  %v2131_v29 = vadd.f32 %v4613_v53, %v7748_v28  ;;  %v2122_v23 = vpop.f32.mrb[15].mxu0  ;;  %v7852_v57 = vld [vmem:[#allocation3 + $0x67] sm:$0xff]  ;;  %4633 = vmatpush3.bf16.msra.mxu1 %v5971_v59 }
 0x26b   : > { %v2210_v48 = vmax.f32 %v2120_v11, 0.0  ;;  %v2123_v46 = vadd.f32 %v7748_v28, %v2122_v23 }
 0x26c   : > { %2286 = vst.msk [vmem:[#allocation3 + $0x108] sm:$0xff] %vm226_vm0, %v2212_v8  ;;  %v2213_v18 = vmax.f32 %v2131_v29, 0.0  ;;  %5373 = vrot.lane.b32.xlu1 %v5342_v10, %s5989_s13 }
 0x26d   : > { %5358 = vrot.lane.b32.xlu0 %v5342_v10, %s5986_s29  ;;  %2284 = vst.msk [vmem:[#allocation3 + $0xe8] sm:$0xff] %vm226_vm0, %v2210_v48  ;;  %v2211_v7 = vmax.f32 %v2123_v46, 0.0  ;;  %v7842_v10 = vld [vmem:[#allocation3 + $0x6f] sm:$0xff] }
 0x26e   : > { %2287 = vst.msk [vmem:[#allocation3 + $0x110] sm:$0xff] %vm226_vm0, %v2213_v18  ;;  %v5452_v8 = vpack.i.bf16 %v7842_v10, %v7852_v57  ;;  %v5972_v46 = vld [vmem:[%s8788_s3 + $0x10] ss:$0 sps:$4 sm:$0x33]   ;;  %v2381_v40 = vld [vmem:[#allocation3 + $0xd1] sm:$0xff] }
 0x26f   : > { %2285 = vst.msk [vmem:[#allocation3 + $0xf0] sm:$0xff] %vm226_vm0, %v2211_v7  ;;  %v4616_v47 = vpop.f32.mrb[16].mxu0  ;;  %4669 = vmatprep.subr.msk.bf16.mxu1 %vm2033_vm1, %v5972_v46  ;;  %v3965_v18 = vsel %vm2033_vm1, %v5972_v46, 0  ;;  %v2380_v3 = vld [vmem:[#allocation3 + $0xc9] sm:$0xff] }
 0x270   : > { %v2144_v49 = vadd.f32 %v4616_v47, %v7748_v28  ;;  %v2135_v30 = vpop.f32.mrb[17].mxu0  ;;  %5378 = vrot.lane.b32.xlu1 %v5377_v44, %s5982_s25  ;;  %4635 = vmatpush3.bf16.msra.mxu1 %v3965_v18 }
 0x271   : > { %5388 = vrot.lane.b32.xlu0 %v5387_v43, %s5984_s27  ;;  %v2136_v6 = vadd.f32 %v7748_v28, %v2135_v30  ;;  %v4617_v16 = vpop.f32.mrb[18].mxu0 }
 0x272   : > { %v2216_v41 = vmax.f32 %v2144_v49, 0.0  ;;  %v2147_v39 = vadd.f32 %v4617_v16, %v7748_v28  ;;  %v2138_v62 = vpop.f32.mrb[19].mxu0 }
 0x273   : > { %v2214_v61 = vmax.f32 %v2136_v6, 0.0  ;;  %v2139_v24 = vadd.f32 %v7748_v28, %v2138_v62  ;;  %v5462_v6 = vpack.i.bf16 %v2532_v32, %v2531_v56  ;;  %v2352_v54 = vld [vmem:[#allocation3 + $0x108] sm:$0xff] }
 0x274   : > { %2290 = vst.msk [vmem:[#allocation3 + $0x148] sm:$0xff] %vm226_vm0, %v2216_v41  ;;  %v2217_v22 = vmax.f32 %v2147_v39, 0.0  ;;  %5383 = vrot.lane.b32.xlu1 %v5382_v50, %s5983_s26  ;;  %v2563_v41 = vld [vmem:[#allocation3 + $0x69] sm:$0xff]  ;;  %v2564_v39 = vld [vmem:[#allocation3 + $0x71] sm:$0xff] }
 0x275   : > { %5403 = vrot.lane.b32.xlu0 %v7807_v13, %s5982_s25  ;;  %2288 = vst.msk [vmem:[#allocation3 + $0x128] sm:$0xff] %vm226_vm0, %v2214_v61  ;;  %v2215_v19 = vmax.f32 %v2139_v24, 0.0  ;;  %v2349_v61 = vld [vmem:[#allocation3 + $0xd0] sm:$0xff]  ;;  %v7921_v59 = vld [vmem:[#allocation3 + $0x107] sm:$0xff] }
 0x276   : > { %2291 = vst.msk [vmem:[#allocation3 + $0x150] sm:$0xff] %vm226_vm0, %v2217_v22  ;;  %v5487_v22 = vpack.i.bf16 %v2381_v40, %v2380_v3  ;;  %v2572_v46 = vld [vmem:[#allocation3 + $0xf1] sm:$0xff] }
 0x277   : > { %2289 = vst.msk [vmem:[#allocation3 + $0x130] sm:$0xff] %vm226_vm0, %v2215_v19  ;;  %v4620_v63 = vpop.f32.mrb[20].mxu0  ;;  %v7889_v19 = vld [vmem:[#allocation3 + $0xcf] sm:$0xff] }
 0x278   : > { %v2160_v34 = vadd.f32 %v4620_v63, %v7748_v28  ;;  %v2151_v25 = vpop.f32.mrb[21].mxu0  ;;  %5393 = vrot.lane.b32.xlu1 %v5377_v44, %s5985_s28 }
 0x279   : > { %5408 = vrot.lane.b32.xlu0 %v7816_v12, %s5983_s26  ;;  %v2152_v55 = vadd.f32 %v7748_v28, %v2151_v25  ;;  %v4621_v36 = vpop.f32.mrb[22].mxu0  ;;  %v7901_v25 = vld [vmem:[#allocation3 + $0xa7] sm:$0xff] }
 0x27a   : > { %v2220_v58 = vmax.f32 %v2160_v34, 0.0  ;;  %v2163_v5 = vadd.f32 %v4621_v36, %v7748_v28  ;;  %v2154_v17 = vpop.f32.mrb[23].mxu0  ;;  %v7897_v34 = vld [vmem:[#allocation3 + $0xaf] sm:$0xff] }
 0x27b   : > { %v2218_v26 = vmax.f32 %v2152_v55, 0.0  ;;  %v2155_v45 = vadd.f32 %v7748_v28, %v2154_v17  ;;  %v5532_v55 = vpack.i.bf16 %v7897_v34, %v7901_v25  ;;  %v2536_v36 = vld [vmem:[#allocation3 + $0xb0] sm:$0xff]  ;;  %v2356_v32 = vld [vmem:[#allocation3 + $0x148] sm:$0xff] }
 0x27c   : > { %2294 = vst.msk [vmem:[#allocation3 + $0x188] sm:$0xff] %vm226_vm0, %v2220_v58  ;;  %v2221_v27 = vmax.f32 %v2163_v5, 0.0  ;;  %5398 = vrot.lane.b32.xlu1 %v5382_v50, %s5986_s29  ;;  %v5467_v50 = vpack.i.bf16 %v2564_v39, %v2563_v41  ;;  %v2535_v58 = vld [vmem:[#allocation3 + $0xa8] sm:$0xff] }
 0x27d   : > { %5418 = vrot.lane.b32.xlu0 %v7807_v13, %s5985_s28  ;;  %2292 = vst.msk [vmem:[#allocation3 + $0x168] sm:$0xff] %vm226_vm0, %v2218_v26  ;;  %v2219_v21 = vmax.f32 %v2155_v45, 0.0  ;;  %v5542_v5 = vpack.i.bf16 %v2536_v36, %v2535_v58  ;;  %v2567_v17 = vld [vmem:[#allocation3 + $0xa9] sm:$0xff]  ;;  %v2568_v26 = vld [vmem:[#allocation3 + $0xb1] sm:$0xff] }
 0x27e   : > { %2295 = vst.msk [vmem:[#allocation3 + $0x190] sm:$0xff] %vm226_vm0, %v2221_v27  ;;  %v5547_v45 = vpack.i.bf16 %v2568_v26, %v2567_v17  ;;  %v2353_v27 = vld [vmem:[#allocation3 + $0x110] sm:$0xff]  ;;  %v2543_v3 = vld [vmem:[#allocation3 + $0x128] sm:$0xff] }
 0x27f   : > { %2293 = vst.msk [vmem:[#allocation3 + $0x170] sm:$0xff] %vm226_vm0, %v2219_v21  ;;  %v4624_v42 = vpop.f32.mrb[24].mxu0  ;;  %v5562_v21 = vpack.i.bf16 %v2353_v27, %v2352_v54  ;;  %v2389_v56 = vld [vmem:[#allocation3 + $0x151] sm:$0xff]  ;;  %v2386_v36 = vld [vmem:[#allocation3 + $0x129] sm:$0xff] }
 0x280   : > { %v2176_v0 = vadd.f32 %v4624_v42, %v7748_v28  ;;  %v2167_v20 = vpop.f32.mrb[25].mxu0  ;;  %5413 = vrot.lane.b32.xlu1 %v5412_v9, %s5984_s27  ;;  %v2385_v42 = vld [vmem:[#allocation3 + $0x111] sm:$0xff] }
 0x281   : > { %5423 = vrot.lane.b32.xlu0 %v7816_v12, %s5986_s29  ;;  %v2168_v2 = vadd.f32 %v7748_v28, %v2167_v20  ;;  %v4625_v37 = vpop.f32.mrb[26].mxu0  ;;  %v7917_v20 = vld [vmem:[#allocation3 + $0x10f] sm:$0xff] }
 0x282   : > { %v2224_v1 = vmax.f32 %v2176_v0, 0.0  ;;  %v2179_v11 = vadd.f32 %v4625_v37, %v7748_v28  ;;  %v2170_v53 = vpop.f32.mrb[27].mxu0  ;;  %v2413_v37 = vld [vmem:[#allocation3 + $0xef] sm:$0xff] }
 0x283   : > { %v2222_v29 = vmax.f32 %v2168_v2, 0.0  ;;  %v2171_v23 = vadd.f32 %v7748_v28, %v2170_v53  ;;  %v5572_v2 = vpack.i.bf16 %v7917_v20, %v7921_v59  ;;  %v7929_v53 = vpop.permute.xlu0 %5328  ;;  %v2387_v58 = vld [vmem:[#allocation3 + $0x131] sm:$0xff] }
 0x284   : > { %2298 = vst.msk [vmem:[#allocation3 + $0x1c8] sm:$0xff] %vm226_vm0, %v2224_v1  ;;  %v2225_v48 = vmax.f32 %v2179_v11, 0.0  ;;  %5428 = vrot.lane.b32.xlu1 %v5412_v9, %s5987_s30  ;;  %v2384_v9 = vld [vmem:[#allocation3 + $0x109] sm:$0xff]  ;;  %v7992_v27 = vpack.i.bf16 %v2387_v58, %v2386_v36  ;;  %v5331_v54 = vunpack.i.h.bf16 %v7929_v53 }
 0x285   : > { %5453 = vrot.lane.b32.xlu0 %v5452_v8, %s5984_s27  ;;  %2296 = vst.msk [vmem:[#allocation3 + $0x1a8] sm:$0xff] %vm226_vm0, %v2222_v29  ;;  %v2223_v38 = vmax.f32 %v2171_v23, 0.0  ;;  %v5567_v0 = vpack.i.bf16 %v2385_v42, %v2384_v9  ;;  %v2412_v1 = vld [vmem:[#allocation3 + $0xe7] sm:$0xff]  ;;  %v2393_v42 = vld [vmem:[#allocation3 + $0x191] sm:$0xff] }
 0x286   : > { %2299 = vst.msk [vmem:[#allocation3 + $0x1d0] sm:$0xff] %vm226_vm0, %v2225_v48  ;;  %v5612_v11 = vpack.i.bf16 %v2413_v37, %v2412_v1  ;;  %v2539_v29 = vld [vmem:[#allocation3 + $0xe8] sm:$0xff] }
 0x287   : > { %2297 = vst.msk [vmem:[#allocation3 + $0x1b0] sm:$0xff] %vm226_vm0, %v2223_v38  ;;  %v4628_v7 = vpop.f32.mrb[28].mxu0  ;;  %v2571_v48 = vld [vmem:[#allocation3 + $0xe9] sm:$0xff]  ;;  %v7935_v38 = vpop.permute.xlu0 %5333 }
 0x288   : > { %v2192_v43 = vadd.f32 %v4628_v7, %v7748_v28  ;;  %v2183_v44 = vpop.f32.mrb[29].mxu0  ;;  %5433 = vrot.lane.b32.xlu1 %v7807_v13, %s5988_s12  ;;  %v5627_v18 = vpack.i.bf16 %v2572_v46, %v2571_v48  ;;  %v2357_v7 = vld [vmem:[#allocation3 + $0x150] sm:$0xff]  ;;  %v2358_v1 = vld [vmem:[#allocation3 + $0x168] sm:$0xff] }
 0x289   : > { %5458 = vrot.lane.b32.xlu0 %v5452_v8, %s5987_s30  ;;  %v2184_v47 = vadd.f32 %v7748_v28, %v2183_v44  ;;  %v4629_v51 = vpop.f32.mrb[30].mxu0  ;;  %v2540_v8 = vld [vmem:[#allocation3 + $0xf0] sm:$0xff] }
 0x28a   : > { %v2228_v4 = vmax.f32 %v2192_v43, 0.0  ;;  %v2195_v49 = vadd.f32 %v4629_v51, %v7748_v28  ;;  %v2186_v30 = vpop.f32.mrb[31].mxu0  ;;  %v5622_v23 = vpack.i.bf16 %v2540_v8, %v2539_v29  ;;  %v2388_v51 = vld [vmem:[#allocation3 + $0x149] sm:$0xff]  ;;  %v5335_v8 = vunpack.i.l.bf16 %v7935_v38 }
 0x28b   : > { %v2226_v16 = vmax.f32 %v2184_v47, 0.0  ;;  %v2187_v60 = vadd.f32 %v7748_v28, %v2186_v30  ;;  %v2348_v28 = vld [vmem:[#allocation3 + $0xc8] sm:$0xff]  ;;  %v7943_v47 = vpack.i.bf16 %v2357_v7, %v2356_v32  ;;  %v7952_v30 = vpack.i.bf16 %v2389_v56, %v2388_v51 }
 0x28c   : > { %2302 = vst.msk [vmem:[#allocation3 + $0x208] sm:$0xff] %vm226_vm0, %v2228_v4  ;;  %v2229_v62 = vmax.f32 %v2195_v49, 0.0  ;;  %5438 = vrot.lane.b32.xlu1 %v7816_v12, %s5989_s13  ;;  %v5482_v24 = vpack.i.bf16 %v2349_v61, %v2348_v28  ;;  %v7893_v12 = vld [vmem:[#allocation3 + $0xc7] sm:$0xff]  ;;  %v2305_v37 = vld [vmem:[#allocation3 + $0xf] sm:$0xff] }
 0x28d   : > { %5463 = vrot.lane.b32.xlu0 %v5462_v6, %s5988_s12  ;;  %2300 = vst.msk [vmem:[#allocation3 + $0x1e8] sm:$0xff] %vm226_vm0, %v2226_v16  ;;  %v2227_v13 = vmax.f32 %v2187_v60, 0.0  ;;  %v5492_v63 = vpack.i.bf16 %v7889_v19, %v7893_v12  ;;  %v2416_v16 = vld [vmem:[#allocation3 + $0x127] sm:$0xff]  ;;  %v3618_v46 = vsel %vm226_vm0, %v2305_v37, %v5331_v54  ;;  %v2421_v51 = vld [vmem:[#allocation3 + $0x16f] sm:$0xff] }
 0x28e   : > { %2303 = vst.msk [vmem:[#allocation3 + $0x210] sm:$0xff] %vm226_vm0, %v2229_v62  ;;  %v7961_v62 = vld [vmem:[#allocation3 + $0x14f] sm:$0xff] }
 0x28f   : > { %2301 = vst.msk [vmem:[#allocation3 + $0x1f0] sm:$0xff] %vm226_vm0, %v2227_v13  ;;  %v7965_v13 = vld [vmem:[#allocation3 + $0x147] sm:$0xff] }
 0x290   : > { %5443 = vrot.lane.b32.xlu1 %v5462_v6, %s5982_s25  ;;  %v7973_v28 = vpack.i.bf16 %v7961_v62, %v7965_v13  ;;  %v2392_v9 = vld [vmem:[#allocation3 + $0x189] sm:$0xff] }
 0x291   : > { %5468 = vrot.lane.b32.xlu0 %v5467_v50, %s5989_s13  ;;  %v2390_v56 = vld [vmem:[#allocation3 + $0x169] sm:$0xff] }
 0x294   : > { %5448 = vrot.lane.b32.xlu1 %v5467_v50, %s5983_s26 }
 0x295   : > { %5483 = vrot.lane.b32.xlu0 %v5482_v24, %s5982_s25 }
 0x298   : > { %5473 = vrot.lane.b32.xlu1 %v5462_v6, %s5985_s28  ;;  %v2417_v6 = vld [vmem:[#allocation3 + $0x12f] sm:$0xff] }
 0x299   : > { %5488 = vrot.lane.b32.xlu0 %v5487_v22, %s5983_s26  ;;  %v5667_v39 = vpack.i.bf16 %v2417_v6, %v2416_v16  ;;  %v2391_v6 = vld [vmem:[#allocation3 + $0x171] sm:$0xff] }
 0x29a   : > { %v8020_v58 = vpack.i.bf16 %v2391_v6, %v2390_v56 }
 0x29c   : > { %5478 = vrot.lane.b32.xlu1 %v5467_v50, %s5986_s29 }
 0x29d   : > { %5498 = vrot.lane.b32.xlu0 %v5482_v24, %s5985_s28 }
 0x2a0   : > { %5493 = vrot.lane.b32.xlu1 %v5492_v63, %s5984_s27 }
 0x2a1   : > { %5503 = vrot.lane.b32.xlu0 %v5487_v22, %s5986_s29 }
 0x2a4   : > { %5508 = vrot.lane.b32.xlu1 %v5492_v63, %s5987_s30 }
 0x2a5   : > { %5533 = vrot.lane.b32.xlu0 %v5532_v55, %s5984_s27 }
 0x2a8   : > { %5513 = vrot.lane.b32.xlu1 %v5482_v24, %s5988_s12  ;;  %v2544_v24 = vld [vmem:[#allocation3 + $0x130] sm:$0xff] }
 0x2a9   : > { %5538 = vrot.lane.b32.xlu0 %v5532_v55, %s5987_s30  ;;  %v7980_v63 = vpack.i.bf16 %v2544_v24, %v2543_v3  ;;  %v2361_v55 = vld [vmem:[#allocation3 + $0x190] sm:$0xff] }
 0x2ac   : > { %5518 = vrot.lane.b32.xlu1 %v5487_v22, %s5989_s13 }
 0x2ad   : > { %5543 = vrot.lane.b32.xlu0 %v5542_v5, %s5988_s12 }
 0x2b0   : > { %5523 = vrot.lane.b32.xlu1 %v5542_v5, %s5982_s25 }
 0x2b1   : > { %5548 = vrot.lane.b32.xlu0 %v5547_v45, %s5989_s13 }
 0x2b4   : > { %5528 = vrot.lane.b32.xlu1 %v5547_v45, %s5983_s26 }
 0x2b5   : > { %5563 = vrot.lane.b32.xlu0 %v5562_v21, %s5982_s25 }
 0x2b8   : > { %5553 = vrot.lane.b32.xlu1 %v5542_v5, %s5985_s28  ;;  %v2360_v5 = vld [vmem:[#allocation3 + $0x188] sm:$0xff] }
 0x2b9   : > { %5568 = vrot.lane.b32.xlu0 %v5567_v0, %s5983_s26 }
 0x2bc   : > { %5558 = vrot.lane.b32.xlu1 %v5547_v45, %s5986_s29  ;;  %v7990_v45 = vpack.i.bf16 %v2361_v55, %v2360_v5  ;;  %v2365_v5 = vld [vmem:[#allocation3 + $0x1d0] sm:$0xff] }
 0x2bd   : > { %5578 = vrot.lane.b32.xlu0 %v5562_v21, %s5985_s28 }
 0x2c0   : > { %5573 = vrot.lane.b32.xlu1 %v5572_v2, %s5984_s27 }
 0x2c1   : > { %5583 = vrot.lane.b32.xlu0 %v5567_v0, %s5986_s29 }
 0x2c4   : > { %5588 = vrot.lane.b32.xlu1 %v5572_v2, %s5987_s30  ;;  %v2304_v2 = vld [vmem:[#allocation3 + $0x7] sm:$0xff] }
 0x2c5   : > { %5613 = vrot.lane.b32.xlu0 %v5612_v11, %s5984_s27 }
 0x2c8   : > { %5593 = vrot.lane.b32.xlu1 %v5562_v21, %s5988_s12  ;;  %v5330_v21 = vunpack.i.l.bf16 %v7929_v53  ;;  %v8004_v53 = vpack.i.bf16 %v2393_v42, %v2392_v9 }
 0x2c9   : > { %5618 = vrot.lane.b32.xlu0 %v5612_v11, %s5987_s30  ;;  %v5336_v11 = vunpack.i.h.bf16 %v7935_v38  ;;  %v2420_v38 = vld [vmem:[#allocation3 + $0x167] sm:$0xff] }
 0x2cb   : > { %v3650_v3 = vsel %vm1710_vm2, %v3618_v46, %v5336_v11  ;;  %v2364_v11 = vld [vmem:[#allocation3 + $0x1c8] sm:$0xff] }
 0x2cc   : > { %5598 = vrot.lane.b32.xlu1 %v5567_v0, %s5989_s13  ;;  %v2359_v0 = vld [vmem:[#allocation3 + $0x170] sm:$0xff]  ;;  %v8034_v46 = vpack.i.bf16 %v2365_v5, %v2364_v11 }
 0x2cd   : > { %5623 = vrot.lane.b32.xlu0 %v5622_v23, %s5988_s12  ;;  %v8006_v48 = vpack.i.bf16 %v2359_v0, %v2358_v1 }
 0x2d0   : > { %5603 = vrot.lane.b32.xlu1 %v5622_v23, %s5982_s25 }
 0x2d1   : > { %5628 = vrot.lane.b32.xlu0 %v5627_v18, %s5989_s13 }
 0x2d2   : > { %v7939_v43 = vpop.permute.xlu1 %5348 }
 0x2d3   : > { %v7941_v44 = vpop.permute.xlu0 %5338  ;;  %v5351_v11 = vunpack.i.h.bf16 %v7939_v43 }
 0x2d4   : > { %5608 = vrot.lane.b32.xlu1 %v5627_v18, %s5983_s26 }
 0x2d5   : > { %5643 = vrot.lane.b32.xlu0 %v7943_v47, %s5982_s25 }
 0x2d6   : > { %v7948_v4 = vpop.permute.xlu1 %5363 }
 0x2d7   : > { %v7950_v49 = vpop.permute.xlu0 %5343  ;;  %v5366_v0 = vunpack.i.h.bf16 %v7948_v4 }
 0x2d8   : > { %5633 = vrot.lane.b32.xlu1 %v5622_v23, %s5985_s28 }
 0x2d9   : > { %5648 = vrot.lane.b32.xlu0 %v7952_v30, %s5983_s26 }
 0x2da   : > { %v7957_v60 = vpop.permute.xlu1 %5368 }
 0x2db   : > { %v7959_v41 = vpop.permute.xlu0 %5353 }
 0x2dc   : > { %5638 = vrot.lane.b32.xlu1 %v5627_v18, %s5986_s29  ;;  %v3617_v18 = vsel %vm226_vm0, %v2304_v2, %v5330_v21  ;;  %v5365_v2 = vunpack.i.l.bf16 %v7948_v4  ;;  %v5370_v4 = vunpack.i.l.bf16 %v7957_v60 }
 0x2dd   : > { %5668 = vrot.lane.b32.xlu0 %v5667_v39, %s5984_s27  ;;  %v3649_v24 = vsel %vm1710_vm2, %v3617_v18, %v5335_v8  ;;  %v5371_v18 = vunpack.i.h.bf16 %v7957_v60 }
 0x2de   : > { %v7967_v50 = vpop.permute.xlu1 %5373 }
 0x2df   : > { %v7969_v61 = vpop.permute.xlu0 %5358  ;;  %v5376_v6 = vunpack.i.h.bf16 %v7967_v50 }
 0x2e0   : > { %5653 = vrot.lane.b32.xlu1 %v7973_v28, %s5984_s27 }
 0x2e1   : > { %5673 = vrot.lane.b32.xlu0 %v5667_v39, %s5987_s30 }
 0x2e2   : > { %v7978_v22 = vpop.permute.xlu1 %5378 }
 0x2e3   : > { %v5389_v40 = vpop.permute.xlu0 %5388 }
 0x2e4   : > { %5658 = vrot.lane.b32.xlu1 %v7980_v63, %s5982_s25  ;;  %v5391_v7 = vunpack.i.h.bf16 %v5389_v40  ;;  %v5390_v32 = vunpack.i.l.bf16 %v5389_v40  ;;  %v8018_v40 = vpack.i.bf16 %v2421_v51, %v2420_v38  ;;  %v2397_v38 = vld [vmem:[#allocation3 + $0x1d1] sm:$0xff] }
 0x2e5   : > { %5678 = vrot.lane.b32.xlu0 %v7980_v63, %s5988_s12 }
 0x2e6   : > { %v7988_v26 = vpop.permute.xlu1 %5383  ;;  %v3682_v54 = vsel %vm1743_vm3, %v3650_v3, %v5391_v7  ;;  %v3681_v21 = vsel %vm1743_vm3, %v3649_v24, %v5390_v32  ;;  %v5381_v24 = vunpack.i.h.bf16 %v7978_v22  ;;  %v5380_v3 = vunpack.i.l.bf16 %v7978_v22 }
 0x2e7   : > { %v7986_v17 = vpop.permute.xlu0 %5403  ;;  %v5386_v5 = vunpack.i.h.bf16 %v7988_v26 }
 0x2e8   : > { %5663 = vrot.lane.b32.xlu1 %v7992_v27, %s5983_s26 }
 0x2e9   : > { %5683 = vrot.lane.b32.xlu0 %v7990_v45, %s5982_s25 }
 0x2ea   : > { %v5394_v23 = vpop.permute.xlu1 %5393 }
 0x2eb   : > { %v8002_v29 = vpop.permute.xlu0 %5408  ;;  %v5396_v16 = vunpack.i.h.bf16 %v5394_v23  ;;  %v5395_v39 = vunpack.i.l.bf16 %v5394_v23 }
 0x2ec   : > { %5693 = vrot.lane.b32.xlu1 %v8006_v48, %s5982_s25 }
 0x2ed   : > { %5688 = vrot.lane.b32.xlu0 %v8004_v53, %s5983_s26  ;;  %v3714_v37 = vsel %vm1776_vm4, %v3682_v54, %v5396_v16  ;;  %v3713_v1 = vsel %vm1776_vm4, %v3681_v21, %v5395_v39  ;;  %v5375_v16 = vunpack.i.l.bf16 %v7967_v50  ;;  %v2396_v39 = vld [vmem:[#allocation3 + $0x1c9] sm:$0xff]  ;;  %v5385_v50 = vunpack.i.l.bf16 %v7988_v26 }
 0x2ee   : > { %v5399_v36 = vpop.permute.xlu1 %5398  ;;  %v2363_v26 = vld [vmem:[#allocation3 + $0x1b0] sm:$0xff] }
 0x2ef   : > { %v8016_v55 = vpop.permute.xlu0 %5418  ;;  %v5401_v9 = vunpack.i.h.bf16 %v5399_v36  ;;  %v5400_v42 = vunpack.i.l.bf16 %v5399_v36 }
 0x2f0   : > { %5698 = vrot.lane.b32.xlu1 %v8020_v58, %s5983_s26 }
 0x2f1   : > { %5703 = vrot.lane.b32.xlu0 %v8018_v40, %s5984_s27  ;;  %v3745_v8 = vsel %vm1809_vm5, %v3713_v1, %v5400_v42  ;;  %v3746_v23 = vsel %vm1809_vm5, %v3714_v37, %v5401_v9 }
 0x2f2   : > { %v8040_v32 = vpop.permute.xlu1 %5413  ;;  %v3777_v51 = vsel %vm1842_vm6, %v3745_v8, %v5365_v2  ;;  %v3778_v56 = vsel %vm1842_vm6, %v3746_v23, %v5366_v0  ;;  %v8062_v0 = vpack.i.bf16 %v2397_v38, %v2396_v39  ;;  %v3620_v2 = vsel %vm226_vm0, %v7790_v33, %v5381_v24  ;;  %v2362_v33 = vld [vmem:[#allocation3 + $0x1a8] sm:$0xff] }
 0x2f3   : > { %v8038_v7 = vpop.permute.xlu0 %5423  ;;  %v3809_v60 = vsel %vm1875_vm7, %v3777_v51, %v5370_v4  ;;  %v3810_v36 = vsel %vm1875_vm7, %v3778_v56, %v5371_v18  ;;  %v3652_v1 = vsel %vm1710_vm2, %v3620_v2, %v5386_v5  ;;  %v8079_v18 = vpack.i.bf16 %v2363_v26, %v2362_v33  ;;  %v2394_v4 = vld [vmem:[#allocation3 + $0x1a9] sm:$0xff]  ;;  %v2395_v51 = vld [vmem:[#allocation3 + $0x1b1] sm:$0xff] }
 0x2f4   : > { %5723 = vrot.lane.b32.xlu1 %v7980_v63, %s5985_s28  ;;  %v3841_v54 = vsel %vm1908_vm8, %v3809_v60, %v5375_v16  ;;  %v3842_v21 = vsel %vm1908_vm8, %v3810_v36, %v5376_v6  ;;  %v3619_v63 = vsel %vm226_vm0, %v7796_v52, %v5380_v3  ;;  %v5350_v52 = vunpack.i.l.bf16 %v7939_v43 }
 0x2f5   : > { %5708 = vrot.lane.b32.xlu0 %v8034_v46, %s5982_s25  ;;  %v3873_v42 = vpack.c.bf16 %v3842_v21, %v3841_v54  ;;  %v3651_v37 = vsel %vm1710_vm2, %v3619_v63, %v5385_v50  ;;  %v3684_v6 = vsel %vm1743_vm3, %v3652_v1, %v5351_v11  ;;  %v5356_v16 = vunpack.i.h.bf16 %v7959_v41  ;;  %v2367_v50 = vld [vmem:[#allocation3 + $0x1f0] sm:$0xff] }
 0x2f6   : > { %v8060_v22 = vpop.permute.xlu1 %5428  ;;  %v3683_v56 = vsel %vm1743_vm3, %v3651_v37, %v5350_v52  ;;  %v5355_v39 = vunpack.i.l.bf16 %v7959_v41  ;;  %v8091_v24 = vpack.i.bf16 %v2395_v51, %v2394_v4  ;;  %v5360_v54 = vunpack.i.l.bf16 %v7969_v61  ;;  %v2398_v51 = vld [vmem:[#allocation3 + $0x1e9] sm:$0xff] }
 0x2f7   : > { %v8058_v9 = vpop.permute.xlu0 %5453  ;;  %4636 = vmatprep.mubr.msk.bf16.mxu1 %vm1984_vm9, %v3873_v42  ;;  %v3716_v5 = vsel %vm1776_vm4, %v3684_v6, %v5356_v16  ;;  %v2366_v42 = vld [vmem:[#allocation3 + $0x1e8] sm:$0xff] }
 0x2f8   : > { %5733 = vrot.lane.b32.xlu1 %v7992_v27, %s5986_s29  ;;  %v3715_v36 = vsel %vm1776_vm4, %v3683_v56, %v5355_v39  ;;  %v8105_v1 = vpack.i.bf16 %v2367_v50, %v2366_v42  ;;  %v2399_v56 = vld [vmem:[#allocation3 + $0x1f1] sm:$0xff]  ;;  %v5341_v50 = vunpack.i.h.bf16 %v7941_v44 }
 0x2f9   : > { %5713 = vrot.lane.b32.xlu0 %v8062_v0, %s5983_s26  ;;  %v3747_v63 = vsel %vm1809_vm5, %v3715_v36, %v5360_v54  ;;  %v5346_v54 = vunpack.i.h.bf16 %v7950_v49 }
 0x2fa   : > { %v8077_v23 = vpop.permute.xlu1 %5433 }
 0x2fb   : > { %v5459_v8 = vpop.permute.xlu0 %5458 }
 0x2fc   : > { %5743 = vrot.lane.b32.xlu1 %v8079_v18, %s5982_s25  ;;  %v5461_v3 = vunpack.i.h.bf16 %v5459_v8  ;;  %v5460_v60 = vunpack.i.l.bf16 %v5459_v8 }
 0x2fd   : > { %5718 = vrot.lane.b32.xlu0 %v7992_v27, %s5989_s13  ;;  %v5361_v27 = vunpack.i.h.bf16 %v7969_v61 }
 0x2fe   : > { %v8089_v38 = vpop.permute.xlu1 %5438  ;;  %v3779_v61 = vsel %vm1842_vm6, %v3747_v63, %v5460_v60  ;;  %v8119_v60 = vpack.i.bf16 %v2399_v56, %v2398_v51  ;;  %v5456_v63 = vunpack.i.h.bf16 %v8058_v9 }
 0x2ff   : > { %v5464_v43 = vpop.permute.xlu0 %5463  ;;  %v3748_v2 = vsel %vm1809_vm5, %v3716_v5, %v5361_v27  ;;  %v5340_v27 = vunpack.i.l.bf16 %v7941_v44 }
 0x300   : > { %v5466_v41 = vunpack.i.h.bf16 %v5464_v43  ;;  %v5465_v21 = vunpack.i.l.bf16 %v5464_v43  ;;  %5748 = vrot.lane.b32.xlu1 %v8091_v24, %s5983_s26  ;;  %v3780_v11 = vsel %vm1842_vm6, %v3748_v2, %v5461_v3  ;;  %v5455_v2 = vunpack.i.l.bf16 %v8058_v9 }
 0x301   : > { %5728 = vrot.lane.b32.xlu0 %v7943_v47, %s5985_s28 }
 0x302   : > { %v8103_v37 = vpop.permute.xlu1 %5443  ;;  %v3811_v33 = vsel %vm1875_vm7, %v3779_v61, %v5465_v21  ;;  %v3812_v4 = vsel %vm1875_vm7, %v3780_v11, %v5466_v41  ;;  %v5345_v41 = vunpack.i.l.bf16 %v7950_v49  ;;  %v3621_v49 = vsel %vm226_vm0, %v7763_v35, %v5340_v27 }
 0x303   : > { %v5469_v26 = vpop.permute.xlu0 %5468  ;;  %v5435_v27 = vunpack.i.l.bf16 %v8077_v23 }
 0x304   : > { %v5471_v52 = vunpack.i.h.bf16 %v5469_v26  ;;  %v5470_v8 = vunpack.i.l.bf16 %v5469_v26  ;;  %5753 = vrot.lane.b32.xlu1 %v8105_v1, %s5982_s25 }
 0x305   : > { %5738 = vrot.lane.b32.xlu0 %v7952_v30, %s5986_s29 }
 0x306   : > { %v3843_v6 = vsel %vm1908_vm8, %v3811_v33, %v5470_v8  ;;  %v3844_v16 = vsel %vm1908_vm8, %v3812_v4, %v5471_v52  ;;  %v8117_v43 = vpop.permute.xlu1 %5448  ;;  %v3622_v8 = vsel %vm226_vm0, %v7766_v14, %v5341_v50  ;;  %v5436_v50 = vunpack.i.h.bf16 %v8077_v23 }
 0x307   : > { %v5484_v39 = vpop.permute.xlu0 %5483  ;;  %v3874_v3 = vpack.c.bf16 %v3844_v16, %v3843_v6  ;;  %v5431_v16 = vunpack.i.h.bf16 %v8060_v22 }
 0x308   : > { %v5486_v36 = vunpack.i.h.bf16 %v5484_v39  ;;  %v5485_v5 = vunpack.i.l.bf16 %v5484_v39  ;;  %5758 = vrot.lane.b32.xlu1 %v8119_v60, %s5983_s26  ;;  %v5430_v39 = vunpack.i.l.bf16 %v8060_v22 }
 0x309   : > { %5768 = vrot.lane.b32.xlu0 %v8018_v40, %s5987_s30  ;;  %4637 = vmatmul.mubr.msk.bf16.vlgmr.msra.gmra.mrb[0].mxu1 %vm1984_vm9, %v3874_v3 }
 0x30a   : > { %v5474_v42 = vpop.permute.xlu1 %5473  ;;  %v3630_v61 = vsel %vm226_vm0, %v7889_v19, %v5486_v36  ;;  %v3629_v44 = vsel %vm226_vm0, %v7893_v12, %v5485_v5  ;;  %v3653_v19 = vsel %vm1710_vm2, %v3621_v49, %v5345_v41  ;;  %v3654_v12 = vsel %vm1710_vm2, %v3622_v8, %v5346_v54  ;;  %v8194_v49 = vld [vmem:[#allocation3 + $0x187] sm:$0xff] }
 0x30b   : > { %v5489_v21 = vpop.permute.xlu0 %5488  ;;  %v5476_v11 = vunpack.i.h.bf16 %v5474_v42  ;;  %v5475_v52 = vunpack.i.l.bf16 %v5474_v42  ;;  %v3686_v35 = vsel %vm1743_vm3, %v3654_v12, %v5456_v63  ;;  %v3685_v14 = vsel %vm1743_vm3, %v3653_v19, %v5455_v2 }
 0x30c   : > { %v5491_v40 = vunpack.i.h.bf16 %v5489_v21  ;;  %v5490_v26 = vunpack.i.l.bf16 %v5489_v21  ;;  %5763 = vrot.lane.b32.xlu1 %v7973_v28, %s5987_s30  ;;  %v5441_v42 = vunpack.i.h.bf16 %v8089_v38  ;;  %v5440_v63 = vunpack.i.l.bf16 %v8089_v38 }
 0x30d   : > { %5778 = vrot.lane.b32.xlu0 %v8006_v48, %s5988_s12  ;;  %v3718_v3 = vsel %vm1776_vm4, %v3686_v35, %v5476_v11  ;;  %v3717_v28 = vsel %vm1776_vm4, %v3685_v14, %v5475_v52  ;;  %v5446_v2 = vunpack.i.h.bf16 %v8103_v37  ;;  %v5415_v35 = vunpack.i.l.bf16 %v8040_v32 }
 0x30e   : > { %v8143_v9 = vsel %vm1710_vm2, %v3629_v44, %v5490_v26  ;;  %v8146_v33 = vsel %vm1710_vm2, %v3630_v61, %v5491_v40  ;;  %v5479_v51 = vpop.permute.xlu1 %5478  ;;  %v8182_v26 = vld [vmem:[#allocation3 + $0x18f] sm:$0xff]  ;;  %v5451_v61 = vunpack.i.h.bf16 %v8117_v43  ;;  %v5450_v44 = vunpack.i.l.bf16 %v8117_v43 }
 0x30f   : > { %v8152_v4 = vpop.permute.xlu0 %5498  ;;  %v5481_v56 = vunpack.i.h.bf16 %v5479_v51  ;;  %v5480_v6 = vunpack.i.l.bf16 %v5479_v51  ;;  %v5792_v8 = vpack.i.bf16 %v8182_v26, %v8194_v49  ;;  %v3624_v43 = vsel %vm226_vm0, %v7842_v10, %v5446_v2 }
 0x310   : > { %5773 = vrot.lane.b32.xlu1 %v7943_v47, %s5988_s12  ;;  %v5445_v47 = vunpack.i.l.bf16 %v8103_v37  ;;  %v3656_v12 = vsel %vm1710_vm2, %v3624_v43, %v5451_v61  ;;  %v5416_v51 = vunpack.i.h.bf16 %v8040_v32 }
 0x311   : > { %5788 = vrot.lane.b32.xlu0 %v8020_v58, %s5989_s13  ;;  %v3749_v36 = vsel %vm1809_vm5, %v3717_v28, %v5480_v6  ;;  %v3750_v5 = vsel %vm1809_vm5, %v3718_v3, %v5481_v56  ;;  %v5420_v6 = vunpack.i.l.bf16 %v8016_v55 }
 0x312   : > { %v3781_v22 = vsel %vm1842_vm6, %v3749_v36, %v5430_v39  ;;  %v3782_v54 = vsel %vm1842_vm6, %v3750_v5, %v5431_v16  ;;  %v8172_v21 = vpop.permute.xlu1 %5493  ;;  %v3688_v56 = vsel %vm1743_vm3, %v3656_v12, %v5416_v51  ;;  %v8223_v5 = vld [vmem:[#allocation3 + $0x1af] sm:$0xff]  ;;  %v5406_v51 = vunpack.i.h.bf16 %v7986_v17 }
 0x313   : > { %v8170_v41 = vpop.permute.xlu0 %5503  ;;  %v3813_v23 = vsel %vm1875_vm7, %v3781_v22, %v5435_v27  ;;  %v3814_v40 = vsel %vm1875_vm7, %v3782_v54, %v5436_v50  ;;  %v5426_v50 = vunpack.i.h.bf16 %v8038_v7  ;;  %v5425_v27 = vunpack.i.l.bf16 %v8038_v7  ;;  %v8231_v54 = vld [vmem:[#allocation3 + $0x1a7] sm:$0xff] }
 0x314   : > { %5783 = vrot.lane.b32.xlu1 %v7952_v30, %s5989_s13  ;;  %v3845_v38 = vsel %vm1908_vm8, %v3813_v23, %v5440_v63  ;;  %v3846_v37 = vsel %vm1908_vm8, %v3814_v40, %v5441_v42  ;;  %v3623_v30 = vsel %vm226_vm0, %v7852_v57, %v5445_v47  ;;  %v5822_v7 = vpack.i.bf16 %v8223_v5, %v8231_v54 }
 0x315   : > { %5798 = vrot.lane.b32.xlu0 %v8006_v48, %s5985_s28  ;;  %v3875_v52 = vpack.c.bf16 %v3846_v37, %v3845_v38  ;;  %v3655_v19 = vsel %vm1710_vm2, %v3623_v30, %v5450_v44 }
 0x316   : > { %v8192_v48 = vpop.permute.xlu1 %5508  ;;  %v3687_v57 = vsel %vm1743_vm3, %v3655_v19, %v5415_v35  ;;  %v5411_v35 = vunpack.i.h.bf16 %v8002_v29 }
 0x317   : > { %v8190_v11 = vpop.permute.xlu0 %5533  ;;  %4640 = vmatprep.mubr.msk.bf16.mxu1 %vm1984_vm9, %v3875_v52  ;;  %v3719_v28 = vsel %vm1776_vm4, %v3687_v57, %v5420_v6 }
 0x318   : > { %5793 = vrot.lane.b32.xlu1 %v5792_v8, %s5984_s27  ;;  %v3751_v42 = vsel %vm1809_vm5, %v3719_v28, %v5425_v27  ;;  %v5535_v6 = vunpack.i.l.bf16 %v8190_v11 }
 0x319   : > { %5808 = vrot.lane.b32.xlu0 %v8020_v58, %s5986_s29  ;;  %v5421_v58 = vunpack.i.h.bf16 %v8016_v55 }
 0x31a   : > { %v8210_v10 = vpop.permute.xlu1 %5513 }
 0x31b   : > { %v5539_v14 = vpop.permute.xlu0 %5538  ;;  %v3720_v36 = vsel %vm1776_vm4, %v3688_v56, %v5421_v58  ;;  %v5536_v58 = vunpack.i.h.bf16 %v8190_v11 }
 0x31c   : > { %5803 = vrot.lane.b32.xlu1 %v7990_v45, %s5985_s28  ;;  %v5541_v32 = vunpack.i.h.bf16 %v5539_v14  ;;  %v5540_v3 = vunpack.i.l.bf16 %v5539_v14  ;;  %v3752_v63 = vsel %vm1809_vm5, %v3720_v36, %v5426_v50  ;;  %v5410_v14 = vunpack.i.l.bf16 %v8002_v29 }
 0x31d   : > { %5818 = vrot.lane.b32.xlu0 %v5792_v8, %s5987_s30  ;;  %v3626_v29 = vsel %vm226_vm0, %v7826_v31, %v5406_v51 }
 0x31e   : > { %v8219_v39 = vpop.permute.xlu1 %5518  ;;  %v3783_v23 = vsel %vm1842_vm6, %v3751_v42, %v5540_v3  ;;  %v3784_v40 = vsel %vm1842_vm6, %v3752_v63, %v5541_v32  ;;  %v8260_v3 = vld [vmem:[#allocation3 + $0x1cf] sm:$0xff] }
 0x31f   : > { %v5544_v16 = vpop.permute.xlu0 %5543 }
 0x320   : > { %v5546_v22 = vunpack.i.h.bf16 %v5544_v16  ;;  %v5545_v55 = vunpack.i.l.bf16 %v5544_v16  ;;  %5813 = vrot.lane.b32.xlu1 %v8004_v53, %s5986_s29 }
 0x321   : > { %5828 = vrot.lane.b32.xlu0 %v7990_v45, %s5988_s12 }
 0x322   : > { %v8235_v47 = vpop.permute.xlu1 %5523  ;;  %v3815_v44 = vsel %vm1875_vm7, %v3783_v23, %v5545_v55  ;;  %v3816_v38 = vsel %vm1875_vm7, %v3784_v40, %v5546_v22  ;;  %v5511_v23 = vunpack.i.h.bf16 %v8192_v48  ;;  %v5510_v40 = vunpack.i.l.bf16 %v8192_v48 }
 0x323   : > { %v5549_v2 = vpop.permute.xlu0 %5548  ;;  %v5526_v51 = vunpack.i.h.bf16 %v8235_v47 }
 0x324   : > { %v5551_v45 = vunpack.i.h.bf16 %v5549_v2  ;;  %v5550_v61 = vunpack.i.l.bf16 %v5549_v2  ;;  %5823 = vrot.lane.b32.xlu1 %v5822_v7, %s5987_s30 }
 0x325   : > { %5838 = vrot.lane.b32.xlu0 %v8004_v53, %s5989_s13  ;;  %v5405_v53 = vunpack.i.l.bf16 %v7986_v17 }
 0x326   : > { %v3847_v37 = vsel %vm1908_vm8, %v3815_v44, %v5550_v61  ;;  %v3848_v52 = vsel %vm1908_vm8, %v3816_v38, %v5551_v45  ;;  %v8248_v30 = vpop.permute.xlu1 %5528 }
 0x327   : > { %v3876_v8 = vpack.c.bf16 %v3848_v52, %v3847_v37  ;;  %v5564_v43 = vpop.permute.xlu0 %5563  ;;  %v3625_v11 = vsel %vm226_vm0, %v7836_v15, %v5405_v53  ;;  %v5516_v37 = vunpack.i.h.bf16 %v8210_v10  ;;  %v5515_v52 = vunpack.i.l.bf16 %v8210_v10 }
 0x328   : > { %v5566_v19 = vunpack.i.h.bf16 %v5564_v43  ;;  %v5565_v12 = vunpack.i.l.bf16 %v5564_v43  ;;  %5833 = vrot.lane.b32.xlu1 %v8079_v18, %s5988_s12  ;;  %v5525_v53 = vunpack.i.l.bf16 %v8235_v47 }
 0x329   : > { %5848 = vrot.lane.b32.xlu0 %v5822_v7, %s5984_s27  ;;  %4641 = vmatmul.mubr.msk.bf16.gmra.mrb[4].mxu1 %vm1984_vm9, %v3876_v8 }
 0x32a   : > { %v5554_v56 = vpop.permute.xlu1 %5553  ;;  %v3634_v17 = vsel %vm226_vm0, %v7917_v20, %v5566_v19  ;;  %v3633_v28 = vsel %vm226_vm0, %v7921_v59, %v5565_v12  ;;  %v8280_v20 = vld [vmem:[#allocation3 + $0x1c7] sm:$0xff]  ;;  %v3657_v59 = vsel %vm1710_vm2, %v3625_v11, %v5410_v14  ;;  %v5520_v12 = vunpack.i.l.bf16 %v8219_v39 }
 0x32b   : > { %v5569_v57 = vpop.permute.xlu0 %5568  ;;  %v5556_v36 = vunpack.i.h.bf16 %v5554_v56  ;;  %v5555_v50 = vunpack.i.l.bf16 %v5554_v56  ;;  %v5852_v15 = vpack.i.bf16 %v8260_v3, %v8280_v20  ;;  %v3689_v42 = vsel %vm1743_vm3, %v3657_v59, %v5535_v6 }
 0x32c   : > { %v5571_v16 = vunpack.i.h.bf16 %v5569_v57  ;;  %v5570_v32 = vunpack.i.l.bf16 %v5569_v57  ;;  %5843 = vrot.lane.b32.xlu1 %v8091_v24, %s5989_s13  ;;  %v5531_v14 = vunpack.i.h.bf16 %v8248_v30  ;;  %v5530_v57 = vunpack.i.l.bf16 %v8248_v30  ;;  %v8331_v30 = vld [vmem:[#allocation3 + $0x1ef] sm:$0xff] }
 0x32d   : > { %5858 = vrot.lane.b32.xlu0 %v8079_v18, %s5985_s28  ;;  %v3658_v18 = vsel %vm1710_vm2, %v3626_v29, %v5411_v35  ;;  %v3721_v61 = vsel %vm1776_vm4, %v3689_v42, %v5555_v50  ;;  %v8341_v29 = vld [vmem:[#allocation3 + $0x1e7] sm:$0xff] }
 0x32e   : > { %v8273_v27 = vsel %vm1710_vm2, %v3633_v28, %v5570_v32  ;;  %v8276_v22 = vsel %vm1710_vm2, %v3634_v17, %v5571_v16  ;;  %v5559_v31 = vpop.permute.xlu1 %5558  ;;  %v3690_v63 = vsel %vm1743_vm3, %v3658_v18, %v5536_v58  ;;  %v3628_v16 = vsel %vm226_vm0, %v7897_v34, %v5526_v51 }
 0x32f   : > { %v8284_v55 = vpop.permute.xlu0 %5578  ;;  %v5561_v2 = vunpack.i.h.bf16 %v5559_v31  ;;  %v5560_v7 = vunpack.i.l.bf16 %v5559_v31  ;;  %v3722_v45 = vsel %vm1776_vm4, %v3690_v63, %v5556_v36  ;;  %v3627_v32 = vsel %vm226_vm0, %v7901_v25, %v5525_v53 }
 0x330   : > { %5853 = vrot.lane.b32.xlu1 %v5852_v15, %s5984_s27  ;;  %v3659_v17 = vsel %vm1710_vm2, %v3627_v32, %v5530_v57  ;;  %v3660_v28 = vsel %vm1710_vm2, %v3628_v16, %v5531_v14  ;;  %v5496_v36 = vunpack.i.h.bf16 %v8172_v21  ;;  %v5495_v34 = vunpack.i.l.bf16 %v8172_v21  ;;  %v2430_v57 = vld [vmem:[#allocation3 + $0x207] sm:$0xff] }
 0x331   : > { %5868 = vrot.lane.b32.xlu0 %v8091_v24, %s5986_s29  ;;  %v3753_v44 = vsel %vm1809_vm5, %v3721_v61, %v5560_v7  ;;  %v3754_v38 = vsel %vm1809_vm5, %v3722_v45, %v5561_v2  ;;  %v5521_v24 = vunpack.i.h.bf16 %v8219_v39  ;;  %v5501_v18 = vunpack.i.h.bf16 %v8152_v4 }
 0x332   : > { %v3785_v8 = vsel %vm1842_vm6, %v3753_v44, %v5510_v40  ;;  %v3786_v48 = vsel %vm1842_vm6, %v3754_v38, %v5511_v23  ;;  %v8305_v19 = vpop.permute.xlu1 %5573  ;;  %v3691_v11 = vsel %vm1743_vm3, %v3659_v17, %v5495_v34  ;;  %v3692_v59 = vsel %vm1743_vm3, %v3660_v28, %v5496_v36 }
 0x333   : > { %v8303_v43 = vpop.permute.xlu0 %5583  ;;  %v3817_v10 = vsel %vm1875_vm7, %v3785_v8, %v5515_v52  ;;  %v3818_v35 = vsel %vm1875_vm7, %v3786_v48, %v5516_v37  ;;  %v5500_v31 = vunpack.i.l.bf16 %v8152_v4  ;;  %v3724_v7 = vsel %vm1776_vm4, %v3692_v59, %v5501_v18  ;;  %v2495_v59 = vld [vmem:[#allocation3 + $0x211] sm:$0xff] }
 0x334   : > { %5863 = vrot.lane.b32.xlu1 %v8034_v46, %s5985_s28  ;;  %v3849_v56 = vsel %vm1908_vm8, %v3817_v10, %v5520_v12  ;;  %v3850_v39 = vsel %vm1908_vm8, %v3818_v35, %v5521_v24  ;;  %v5506_v23 = vunpack.i.h.bf16 %v8170_v41  ;;  %v5505_v40 = vunpack.i.l.bf16 %v8170_v41  ;;  %v2431_v12 = vld [vmem:[#allocation3 + $0x20f] sm:$0xff] }
 0x335   : > { %5878 = vrot.lane.b32.xlu0 %v5852_v15, %s5987_s30  ;;  %v3877_v6 = vpack.c.bf16 %v3850_v39, %v3849_v56  ;;  %v3723_v2 = vsel %vm1776_vm4, %v3691_v11, %v5500_v31  ;;  %v5912_v56 = vpack.i.bf16 %v2431_v12, %v2430_v57  ;;  %v2463_v39 = vld [vmem:[#allocation3 + $0x210] sm:$0xff] }
 0x336   : > { %v8322_v47 = vpop.permute.xlu1 %5588  ;;  %v3755_v4 = vsel %vm1809_vm5, %v3723_v2, %v5505_v40  ;;  %v3756_v61 = vsel %vm1809_vm5, %v3724_v7, %v5506_v23  ;;  %v2494_v11 = vld [vmem:[#allocation3 + $0x209] sm:$0xff] }
 0x337   : > { %v8320_v58 = vpop.permute.xlu0 %5613  ;;  %4644 = vmatprep.mubr.msk.bf16.mxu1 %vm1984_vm9, %v3877_v6  ;;  %v5932_v7 = vpack.i.bf16 %v2495_v59, %v2494_v11  ;;  %v2528_v23 = vld [vmem:[#allocation3 + $0x22f] sm:$0xff] }
 0x338   : > { %5873 = vrot.lane.b32.xlu1 %v8062_v0, %s5986_s29  ;;  %v5616_v36 = vunpack.i.h.bf16 %v8320_v58  ;;  %v5615_v34 = vunpack.i.l.bf16 %v8320_v58 }
 0x339   : > { %5888 = vrot.lane.b32.xlu0 %v8034_v46, %s5988_s12  ;;  %v5882_v46 = vpack.i.bf16 %v8331_v30, %v8341_v29 }
 0x33a   : > { %v8339_v25 = vpop.permute.xlu1 %5593  ;;  %v3694_v40 = vsel %vm1743_vm3, %v8146_v33, %v5616_v36 }
 0x33b   : > { %v5619_v50 = vpop.permute.xlu0 %5618  ;;  %v5596_v33 = vunpack.i.h.bf16 %v8339_v25 }
 0x33c   : > { %5883 = vrot.lane.b32.xlu1 %v5882_v46, %s5987_s30  ;;  %v5621_v42 = vunpack.i.h.bf16 %v5619_v50  ;;  %v5620_v63 = vunpack.i.l.bf16 %v5619_v50 }
 0x33d   : > { %5898 = vrot.lane.b32.xlu0 %v8062_v0, %s5989_s13 }
 0x33e   : > { %v8352_v15 = vpop.permute.xlu1 %5598  ;;  %v3787_v37 = vsel %vm1842_vm6, %v3755_v4, %v5620_v63  ;;  %v3788_v52 = vsel %vm1842_vm6, %v3756_v61, %v5621_v42  ;;  %v5591_v4 = vunpack.i.h.bf16 %v8322_v47  ;;  %v5590_v61 = vunpack.i.l.bf16 %v8322_v47 }
 0x33f   : > { %v5624_v21 = vpop.permute.xlu0 %5623 }
 0x340   : > { %v5626_v0 = vunpack.i.h.bf16 %v5624_v21  ;;  %v5625_v45 = vunpack.i.l.bf16 %v5624_v21  ;;  %5893 = vrot.lane.b32.xlu1 %v8105_v1, %s5988_s12 }
 0x341   : > { %5908 = vrot.lane.b32.xlu0 %v5882_v46, %s5984_s27 }
 0x342   : > { %v8363_v38 = vpop.permute.xlu1 %5603  ;;  %v3819_v48 = vsel %vm1875_vm7, %v3787_v37, %v5625_v45  ;;  %v3820_v24 = vsel %vm1875_vm7, %v3788_v52, %v5626_v0 }
 0x343   : > { %v5629_v44 = vpop.permute.xlu0 %5628 }
 0x344   : > { %v5631_v8 = vunpack.i.h.bf16 %v5629_v44  ;;  %v5630_v41 = vunpack.i.l.bf16 %v5629_v44  ;;  %5903 = vrot.lane.b32.xlu1 %v8119_v60, %s5989_s13 }
 0x345   : > { %5918 = vrot.lane.b32.xlu0 %v8105_v1, %s5985_s28  ;;  %v2462_v1 = vld [vmem:[#allocation3 + $0x208] sm:$0xff] }
 0x346   : > { %v3851_v51 = vsel %vm1908_vm8, %v3819_v48, %v5630_v41  ;;  %v3852_v53 = vsel %vm1908_vm8, %v3820_v24, %v5631_v8  ;;  %v8375_v14 = vpop.permute.xlu1 %5608  ;;  %v5922_v28 = vpack.i.bf16 %v2463_v39, %v2462_v1  ;;  %v5595_v41 = vunpack.i.l.bf16 %v8339_v25 }
 0x347   : > { %v3878_v10 = vpack.c.bf16 %v3852_v53, %v3851_v51  ;;  %v5644_v35 = vpop.permute.xlu0 %5643  ;;  %v2559_v51 = vld [vmem:[#allocation3 + $0x228] sm:$0xff]  ;;  %v2560_v53 = vld [vmem:[#allocation3 + $0x230] sm:$0xff] }
 0x348   : > { %v5646_v6 = vunpack.i.h.bf16 %v5644_v35  ;;  %v5645_v16 = vunpack.i.l.bf16 %v5644_v35  ;;  %5913 = vrot.lane.b32.xlu1 %v5912_v56, %s5984_s27  ;;  %v5600_v35 = vunpack.i.l.bf16 %v8352_v15  ;;  %s4395_s27 = sshll.u32 %s9007_s19, 8 }
 0x349   : > { %5928 = vrot.lane.b32.xlu0 %v8119_v60, %s5986_s29  ;;  %4645 = vmatmul.mubr.msk.bf16.gmra.mrb[8].mxu1 %vm1984_vm9, %v3878_v10  ;;  %v5601_v10 = vunpack.i.h.bf16 %v8352_v15  ;;  %v2592_v15 = vld [vmem:[#allocation3 + $0x231] sm:$0xff] }
 0x34a   : > { %v5634_v17 = vpop.permute.xlu1 %5633  ;;  %v3638_v18 = vsel %vm226_vm0, %v7961_v62, %v5646_v6  ;;  %v3637_v60 = vsel %vm226_vm0, %v7965_v13, %v5645_v16  ;;  %v2527_v62 = vld [vmem:[#allocation3 + $0x227] sm:$0xff]  ;;  %v3693_v13 = vsel %vm1743_vm3, %v8143_v9, %v5615_v34  ;;  %v5952_v6 = vpack.i.bf16 %v2560_v53, %v2559_v51 }
 0x34b   : > { %v5649_v32 = vpop.permute.xlu0 %5648  ;;  %v5636_v31 = vunpack.i.h.bf16 %v5634_v17  ;;  %v5635_v21 = vunpack.i.l.bf16 %v5634_v17  ;;  %v5942_v9 = vpack.i.bf16 %v2528_v23, %v2527_v62  ;;  %v2591_v17 = vld [vmem:[#allocation3 + $0x229] sm:$0xff]  ;;  %v5586_v53 = vunpack.i.h.bf16 %v8303_v43 }
 0x34c   : > { %v5651_v50 = vunpack.i.h.bf16 %v5649_v32  ;;  %v5650_v46 = vunpack.i.l.bf16 %v5649_v32  ;;  %5923 = vrot.lane.b32.xlu1 %v5922_v28, %s5985_s28 }
 0x34d   : > { %5938 = vrot.lane.b32.xlu0 %v5912_v56, %s5987_s30  ;;  %v3726_v44 = vsel %vm1776_vm4, %v3694_v40, %v5636_v31  ;;  %v3725_v37 = vsel %vm1776_vm4, %v3693_v13, %v5635_v21 }
 0x34e   : > { %v8389_v42 = vsel %vm1710_vm2, %v3637_v60, %v5650_v46  ;;  %v8392_v63 = vsel %vm1710_vm2, %v3638_v18, %v5651_v50  ;;  %v5639_v2 = vpop.permute.xlu1 %5638  ;;  %v5606_v18 = vunpack.i.h.bf16 %v8363_v38  ;;  %v5605_v60 = vunpack.i.l.bf16 %v8363_v38  ;;  %v2319_v38 = vld [vmem:[#allocation3 + $0xef] sm:$0xff] }
 0x34f   : > { %v8395_v58 = vpop.permute.xlu0 %5668  ;;  %v5641_v0 = vunpack.i.h.bf16 %v5639_v2  ;;  %v5640_v45 = vunpack.i.l.bf16 %v5639_v2  ;;  %v5611_v2 = vunpack.i.h.bf16 %v8375_v14 }
 0x350   : > { %5933 = vrot.lane.b32.xlu1 %v5932_v7, %s5986_s29 }
 0x351   : > { %5948 = vrot.lane.b32.xlu0 %v5922_v28, %s5988_s12  ;;  %v3757_v52 = vsel %vm1809_vm5, %v3725_v37, %v5640_v45  ;;  %v3758_v8 = vsel %vm1809_vm5, %v3726_v44, %v5641_v0  ;;  %v5962_v28 = vpack.i.bf16 %v2592_v15, %v2591_v17  ;;  %v2318_v0 = vld [vmem:[#allocation3 + $0xe7] sm:$0xff]  ;;  %v5576_v44 = vunpack.i.h.bf16 %v8305_v19 }
 0x352   : > { %v3789_v48 = vsel %vm1842_vm6, %v3757_v52, %v5590_v61  ;;  %v3790_v47 = vsel %vm1842_vm6, %v3758_v8, %v5591_v4  ;;  %v8415_v12 = vpop.permute.xlu1 %5653  ;;  %v3631_v61 = vsel %vm226_vm0, %v2318_v0, %v5605_v60  ;;  %v5575_v37 = vunpack.i.l.bf16 %v8305_v19 }
 0x353   : > { %v8413_v24 = vpop.permute.xlu0 %5673  ;;  %v3821_v57 = vsel %vm1875_vm7, %v3789_v48, %v5595_v41  ;;  %v3822_v25 = vsel %vm1875_vm7, %v3790_v47, %v5596_v33  ;;  %v5581_v41 = vunpack.i.h.bf16 %v8284_v55  ;;  %v5580_v48 = vunpack.i.l.bf16 %v8284_v55 }
 0x354   : > { %5943 = vrot.lane.b32.xlu1 %v5942_v9, %s5987_s30  ;;  %v3853_v56 = vsel %vm1908_vm8, %v3821_v57, %v5600_v35  ;;  %v3854_v39 = vsel %vm1908_vm8, %v3822_v25, %v5601_v10  ;;  %v5585_v10 = vunpack.i.l.bf16 %v8303_v43  ;;  %v5676_v25 = vunpack.i.h.bf16 %v8413_v24  ;;  %s8673_s30 = scalar_lea.vmem %s8790_s5, %s4395_s27 }
 0x355   : > { %5958 = vrot.lane.b32.xlu0 %v5932_v7, %s5989_s13  ;;  %v3879_v32 = vpack.c.bf16 %v3854_v39, %v3853_v56  ;;  %v5610_v7 = vunpack.i.l.bf16 %v8375_v14  ;;  %v3632_v14 = vsel %vm226_vm0, %v2319_v38, %v5606_v18  ;;  %v5675_v56 = vunpack.i.l.bf16 %v8413_v24 }
 0x356   : > { %v8427_v1 = vpop.permute.xlu1 %5658 }
 0x357   : > { %v8425_v16 = vpop.permute.xlu0 %5678  ;;  %4648 = vmatprep.mubr.msk.bf16.mxu1 %vm1984_vm9, %v3879_v32 }
 0x358   : > { %5953 = vrot.lane.b32.xlu1 %v5952_v6, %s5988_s12  ;;  %v5681_v55 = vunpack.i.h.bf16 %v8425_v16  ;;  %v5680_v17 = vunpack.i.l.bf16 %v8425_v16 }
 0x35a   : > { %v8431_v34 = vpop.permute.xlu1 %5663 }
 0x35b   : > { %v5684_v36 = vpop.permute.xlu0 %5683 }
 0x35c   : > { %v5686_v50 = vunpack.i.h.bf16 %v5684_v36  ;;  %v5685_v46 = vunpack.i.l.bf16 %v5684_v36  ;;  %5963 = vrot.lane.b32.xlu1 %v5962_v28, %s5989_s13 }
 0x35e   : > { %v8434_v59 = vpop.permute.xlu1 %5693  ;;  %v3642_v62 = vsel %vm226_vm0, %v8182_v26, %v5686_v50  ;;  %v3641_v23 = vsel %vm226_vm0, %v8194_v49, %v5685_v46  ;;  %v3663_v26 = vsel %vm1710_vm2, %v3631_v61, %v5610_v7  ;;  %v3664_v49 = vsel %vm1710_vm2, %v3632_v14, %v5611_v2 }
 0x35f   : > { %v5689_v11 = vpop.permute.xlu0 %5688  ;;  %v3695_v9 = vsel %vm1743_vm3, %v3663_v26, %v5575_v37  ;;  %v3696_v33 = vsel %vm1743_vm3, %v3664_v49, %v5576_v44  ;;  %v5661_v14 = vunpack.i.h.bf16 %v8427_v1  ;;  %v5660_v61 = vunpack.i.l.bf16 %v8427_v1 }
 0x360   : > { %v5691_v31 = vunpack.i.h.bf16 %v5689_v11  ;;  %v5690_v21 = vunpack.i.l.bf16 %v5689_v11  ;;  %v3727_v35 = vsel %vm1776_vm4, %v3695_v9, %v5580_v48  ;;  %v3728_v19 = vsel %vm1776_vm4, %v3696_v33, %v5581_v41  ;;  %v2322_v48 = vld [vmem:[#allocation3 + $0x127] sm:$0xff] }
 0x361   : > { %v3759_v24 = vsel %vm1809_vm5, %v3727_v35, %v5585_v10  ;;  %v3760_v50 = vsel %vm1809_vm5, %v3728_v19, %v5586_v53  ;;  %v5666_v44 = vunpack.i.h.bf16 %v8431_v34  ;;  %v5665_v37 = vunpack.i.l.bf16 %v8431_v34 }
 0x362   : > { %v8445_v13 = vsel %vm1710_vm2, %v3641_v23, %v5690_v21  ;;  %v8448_v40 = vsel %vm1710_vm2, %v3642_v62, %v5691_v31  ;;  %v8452_v4 = vpop.permute.xlu1 %5698  ;;  %v3791_v11 = vsel %vm1842_vm6, %v3759_v24, %v5675_v56  ;;  %v3792_v16 = vsel %vm1842_vm6, %v3760_v50, %v5676_v25 }
 0x363   : > { %v8450_v45 = vpop.permute.xlu0 %5703  ;;  %v3824_v31 = vsel %vm1875_vm7, %v3792_v16, %v5681_v55  ;;  %v5671_v33 = vunpack.i.h.bf16 %v8395_v58  ;;  %v5670_v41 = vunpack.i.l.bf16 %v8395_v58  ;;  %v3635_v1 = vsel %vm226_vm0, %v2322_v48, %v5660_v61 }
 0x364   : > { %v3667_v19 = vsel %vm1710_vm2, %v3635_v1, %v5665_v37 }
 0x366   : > { %v8460_v8 = vpop.permute.xlu1 %5723 }
 0x367   : > { %v5709_v52 = vpop.permute.xlu0 %5708  ;;  %v5726_v50 = vunpack.i.h.bf16 %v8460_v8 }
 0x368   : > { %v5711_v47 = vunpack.i.h.bf16 %v5709_v52  ;;  %v5710_v51 = vunpack.i.l.bf16 %v5709_v52 }
 0x36a   : > { %v8472_v32 = vpop.permute.xlu1 %5733  ;;  %v3646_v43 = vsel %vm226_vm0, %v8260_v3, %v5711_v47  ;;  %v3645_v15 = vsel %vm226_vm0, %v8280_v20, %v5710_v51  ;;  %v3823_v20 = vsel %vm1875_vm7, %v3791_v11, %v5680_v17  ;;  %v2323_v47 = vld [vmem:[#allocation3 + $0x12f] sm:$0xff] }
 0x36b   : > { %v5714_v57 = vpop.permute.xlu0 %5713  ;;  %v3636_v10 = vsel %vm226_vm0, %v2323_v47, %v5661_v14 }
 0x36c   : > { %v5716_v39 = vunpack.i.h.bf16 %v5714_v57  ;;  %v5715_v6 = vunpack.i.l.bf16 %v5714_v57  ;;  %v3668_v57 = vsel %vm1710_vm2, %v3636_v10, %v5666_v44 }
 0x36e   : > { %v8481_v28 = vsel %vm1710_vm2, %v3645_v15, %v5715_v6  ;;  %v8484_v36 = vsel %vm1710_vm2, %v3646_v43, %v5716_v39  ;;  %v8490_v60 = vpop.permute.xlu1 %5743  ;;  %v5656_v39 = vunpack.i.h.bf16 %v8415_v12  ;;  %v5655_v6 = vunpack.i.l.bf16 %v8415_v12 }
 0x36f   : > { %v5719_v46 = vpop.permute.xlu0 %5718  ;;  %v3698_v43 = vsel %vm1743_vm3, %v8276_v22, %v5671_v33  ;;  %v5736_v12 = vunpack.i.h.bf16 %v8472_v32 }
 0x370   : > { %v5721_v18 = vunpack.i.h.bf16 %v5719_v46  ;;  %v5720_v3 = vunpack.i.l.bf16 %v5719_v46  ;;  %v5725_v46 = vunpack.i.l.bf16 %v8460_v8  ;;  %v3699_v11 = vsel %vm1743_vm3, %v3667_v19, %v5655_v6 }
 0x371   : > { %v3700_v16 = vsel %vm1743_vm3, %v3668_v57, %v5656_v39 }
 0x372   : > { %v3855_v21 = vsel %vm1908_vm8, %v3823_v20, %v5720_v3  ;;  %v3856_v2 = vsel %vm1908_vm8, %v3824_v31, %v5721_v18  ;;  %v8496_v23 = vpop.permute.xlu1 %5748  ;;  %v5735_v18 = vunpack.i.l.bf16 %v8472_v32 }
 0x373   : > { %v3880_v7 = vpack.c.bf16 %v3856_v2, %v3855_v21  ;;  %v5729_v62 = vpop.permute.xlu0 %5728 }
 0x374   : > { %v5731_v55 = vunpack.i.h.bf16 %v5729_v62 }
 0x375   : > { %4649 = vmatmul.mubr.msk.bf16.gmra.mrb[12].mxu1 %vm1984_vm9, %v3880_v7 }
 0x376   : > { %v5754_v38 = vpop.permute.xlu1 %5753  ;;  %v3732_v22 = vsel %vm1776_vm4, %v3700_v16, %v5731_v55 }
 0x377   : > { %v5739_v0 = vpop.permute.xlu0 %5738  ;;  %v5756_v26 = vunpack.i.h.bf16 %v5754_v38  ;;  %v5755_v49 = vunpack.i.l.bf16 %v5754_v38 }
 0x378   : > { %v5741_v15 = vunpack.i.h.bf16 %v5739_v0  ;;  %v5740_v24 = vunpack.i.l.bf16 %v5739_v0 }
 0x379   : > { %v3648_v35 = vsel %vm226_vm0, %v8331_v30, %v5756_v26  ;;  %v3647_v34 = vsel %vm226_vm0, %v8341_v29, %v5755_v49  ;;  %v5730_v30 = vunpack.i.l.bf16 %v5729_v62  ;;  %v3697_v29 = vsel %vm1743_vm3, %v8273_v27, %v5670_v41 }
 0x37a   : > { %v5759_v9 = vpop.permute.xlu1 %5758  ;;  %v3764_v62 = vsel %vm1809_vm5, %v3732_v22, %v5741_v15  ;;  %v3730_v49 = vsel %vm1776_vm4, %v3698_v43, %v5726_v50  ;;  %v3729_v44 = vsel %vm1776_vm4, %v3697_v29, %v5725_v46  ;;  %v5705_v50 = vunpack.i.l.bf16 %v8450_v45 }
 0x37b   : > { %v5769_v52 = vpop.permute.xlu0 %5768  ;;  %v5761_v51 = vunpack.i.h.bf16 %v5759_v9  ;;  %v5760_v53 = vunpack.i.l.bf16 %v5759_v9  ;;  %v3731_v31 = vsel %vm1776_vm4, %v3699_v11, %v5730_v30  ;;  %v3761_v33 = vsel %vm1809_vm5, %v3729_v44, %v5735_v18 }
 0x37c   : > { %v5771_v3 = vunpack.i.h.bf16 %v5769_v52  ;;  %v5770_v20 = vunpack.i.l.bf16 %v5769_v52  ;;  %v3763_v8 = vsel %vm1809_vm5, %v3731_v31, %v5740_v24  ;;  %v3762_v41 = vsel %vm1809_vm5, %v3730_v49, %v5736_v12 }
 0x37d   : > { %v8514_v58 = vsel %vm1710_vm2, %v3647_v34, %v5760_v53  ;;  %v8517_v25 = vsel %vm1710_vm2, %v3648_v35, %v5761_v51  ;;  %v5706_v24 = vunpack.i.h.bf16 %v8450_v45  ;;  %v3701_v31 = vsel %vm1743_vm3, %v8389_v42, %v5705_v50 }
 0x37e   : > { %v5764_v17 = vpop.permute.xlu1 %5763  ;;  %v3795_v37 = vsel %vm1842_vm6, %v3763_v8, %v5770_v20  ;;  %v3796_v52 = vsel %vm1842_vm6, %v3764_v62, %v5771_v3  ;;  %v5696_v8 = vunpack.i.h.bf16 %v8434_v59  ;;  %v5695_v62 = vunpack.i.l.bf16 %v8434_v59 }
 0x37f   : > { %v5779_v56 = vpop.permute.xlu0 %5778  ;;  %v5766_v0 = vunpack.i.h.bf16 %v5764_v17  ;;  %v5765_v38 = vunpack.i.l.bf16 %v5764_v17  ;;  %v3702_v22 = vsel %vm1743_vm3, %v8392_v63, %v5706_v24  ;;  %v5701_v49 = vunpack.i.h.bf16 %v8452_v4 }
 0x380   : > { %v5781_v21 = vunpack.i.h.bf16 %v5779_v56  ;;  %v5780_v2 = vunpack.i.l.bf16 %v5779_v56  ;;  %v5700_v44 = vunpack.i.l.bf16 %v8452_v4 }
 0x381   : > { %v3793_v53 = vsel %vm1842_vm6, %v3761_v33, %v5765_v38  ;;  %v3794_v10 = vsel %vm1842_vm6, %v3762_v41, %v5766_v0 }
 0x382   : > { %v5774_v7 = vpop.permute.xlu1 %5773  ;;  %v3827_v48 = vsel %vm1875_vm7, %v3795_v37, %v5780_v2  ;;  %v3828_v47 = vsel %vm1875_vm7, %v3796_v52, %v5781_v21 }
 0x383   : > { %v5789_v27 = vpop.permute.xlu0 %5788  ;;  %v5776_v26 = vunpack.i.h.bf16 %v5774_v7  ;;  %v5775_v32 = vunpack.i.l.bf16 %v5774_v7 }
 0x384   : > { %v5791_v14 = vunpack.i.h.bf16 %v5789_v27  ;;  %v5790_v61 = vunpack.i.l.bf16 %v5789_v27 }
 0x385   : > { %v3825_v57 = vsel %vm1875_vm7, %v3793_v53, %v5775_v32  ;;  %v3826_v56 = vsel %vm1875_vm7, %v3794_v10, %v5776_v26 }
 0x386   : > { %v5784_v51 = vpop.permute.xlu1 %5783  ;;  %v3859_v34 = vsel %vm1908_vm8, %v3827_v48, %v5790_v61  ;;  %v3860_v19 = vsel %vm1908_vm8, %v3828_v47, %v5791_v14  ;;  %v2326_v48 = vld [vmem:[#allocation3 + $0x167] sm:$0xff]  ;;  %v2327_v47 = vld [vmem:[#allocation3 + $0x16f] sm:$0xff] }
 0x387   : > { %v5799_v9 = vpop.permute.xlu0 %5798  ;;  %v5786_v1 = vunpack.i.h.bf16 %v5784_v51  ;;  %v5785_v35 = vunpack.i.l.bf16 %v5784_v51  ;;  %v3882_v29 = vpack.c.bf16 %v3860_v19, %v3859_v34  ;;  %v3639_v4 = vsel %vm226_vm0, %v2326_v48, %v5695_v62 }
 0x388   : > { %v5801_v46 = vunpack.i.h.bf16 %v5799_v9  ;;  %v5800_v11 = vunpack.i.l.bf16 %v5799_v9  ;;  %v5746_v48 = vunpack.i.h.bf16 %v8490_v60 }
 0x389   : > { %v3857_v39 = vsel %vm1908_vm8, %v3825_v57, %v5785_v35  ;;  %v3858_v6 = vsel %vm1908_vm8, %v3826_v56, %v5786_v1  ;;  %v3640_v35 = vsel %vm226_vm0, %v2327_v47, %v5696_v8  ;;  %v3671_v56 = vsel %vm1710_vm2, %v3639_v4, %v5700_v44 }
 0x38a   : > { %v3881_v30 = vpack.c.bf16 %v3858_v6, %v3857_v39  ;;  %v5794_v17 = vpop.permute.xlu1 %5793  ;;  %v3733_v7 = vsel %vm1776_vm4, %v3701_v31, %v5800_v11  ;;  %v3734_v45 = vsel %vm1776_vm4, %v3702_v22, %v5801_v46  ;;  %v3672_v39 = vsel %vm1710_vm2, %v3640_v35, %v5701_v49 }
 0x38b   : > { %v5809_v55 = vpop.permute.xlu0 %5808  ;;  %v5796_v52 = vunpack.i.h.bf16 %v5794_v17  ;;  %v5795_v9 = vunpack.i.l.bf16 %v5794_v17  ;;  %v5745_v47 = vunpack.i.l.bf16 %v8490_v60 }
 0x38c   : > { %4652 = vmatprep.mubr.msk.bf16.mxu1 %vm1984_vm9, %v3881_v30  ;;  %v5811_v16 = vunpack.i.h.bf16 %v5809_v55  ;;  %v5810_v12 = vunpack.i.l.bf16 %v5809_v55 }
 0x38d   : > { %4653 = vmatmul.mubr.msk.bf16.gmra.mrb[16].mxu1 %vm1984_vm9, %v3882_v29  ;;  %v3703_v30 = vsel %vm1743_vm3, %v3671_v56, %v5795_v9  ;;  %v3704_v17 = vsel %vm1743_vm3, %v3672_v39, %v5796_v52 }
 0x38e   : > { %v5804_v15 = vpop.permute.xlu1 %5803  ;;  %v3765_v0 = vsel %vm1809_vm5, %v3733_v7, %v5810_v12  ;;  %v3766_v38 = vsel %vm1809_vm5, %v3734_v45, %v5811_v16 }
 0x38f   : > { %v5819_v43 = vpop.permute.xlu0 %5818  ;;  %v5806_v51 = vunpack.i.h.bf16 %v5804_v15  ;;  %v5805_v53 = vunpack.i.l.bf16 %v5804_v15 }
 0x390   : > { %v5821_v3 = vunpack.i.h.bf16 %v5819_v43  ;;  %v5820_v20 = vunpack.i.l.bf16 %v5819_v43 }
 0x391   : > { %v3735_v15 = vsel %vm1776_vm4, %v3703_v30, %v5805_v53  ;;  %v3736_v24 = vsel %vm1776_vm4, %v3704_v17, %v5806_v51 }
 0x392   : > { %v5814_v27 = vpop.permute.xlu1 %5813  ;;  %v3797_v42 = vsel %vm1842_vm6, %v3765_v0, %v5820_v20  ;;  %v3798_v61 = vsel %vm1842_vm6, %v3766_v38, %v5821_v3 }
 0x393   : > { %v5829_v18 = vpop.permute.xlu0 %5828  ;;  %v5816_v34 = vunpack.i.h.bf16 %v5814_v27  ;;  %v5815_v19 = vunpack.i.l.bf16 %v5814_v27 }
 0x394   : > { %v5831_v21 = vunpack.i.h.bf16 %v5829_v18  ;;  %v5830_v2 = vunpack.i.l.bf16 %v5829_v18 }
 0x395   : > { %v3767_v46 = vsel %vm1809_vm5, %v3735_v15, %v5815_v19  ;;  %v3768_v11 = vsel %vm1809_vm5, %v3736_v24, %v5816_v34  ;;  %v5751_v34 = vunpack.i.h.bf16 %v8496_v23  ;;  %v5750_v19 = vunpack.i.l.bf16 %v8496_v23 }
 0x396   : > { %v5824_v32 = vpop.permute.xlu1 %5823  ;;  %v3829_v37 = vsel %vm1875_vm7, %v3797_v42, %v5830_v2  ;;  %v3830_v59 = vsel %vm1875_vm7, %v3798_v61, %v5831_v21  ;;  %v3644_v15 = vsel %vm226_vm0, %v8223_v5, %v5746_v48  ;;  %v3643_v23 = vsel %vm226_vm0, %v8231_v54, %v5745_v47 }
 0x397   : > { %v5839_v14 = vpop.permute.xlu0 %5838  ;;  %v5826_v6 = vunpack.i.h.bf16 %v5824_v32  ;;  %v5825_v55 = vunpack.i.l.bf16 %v5824_v32 }
 0x398   : > { %v5841_v63 = vunpack.i.h.bf16 %v5839_v14  ;;  %v5840_v26 = vunpack.i.l.bf16 %v5839_v14 }
 0x399   : > { %v3799_v12 = vsel %vm1842_vm6, %v3767_v46, %v5825_v55  ;;  %v3800_v18 = vsel %vm1842_vm6, %v3768_v11, %v5826_v6  ;;  %v3675_v11 = vsel %vm1710_vm2, %v3643_v23, %v5750_v19 }
 0x39a   : > { %v3861_v33 = vsel %vm1908_vm8, %v3829_v37, %v5840_v26  ;;  %v3862_v41 = vsel %vm1908_vm8, %v3830_v59, %v5841_v63  ;;  %v5834_v57 = vpop.permute.xlu1 %5833 }
 0x39b   : > { %v3883_v10 = vpack.c.bf16 %v3862_v41, %v3861_v33  ;;  %v5849_v1 = vpop.permute.xlu0 %5848  ;;  %v5836_v29 = vunpack.i.h.bf16 %v5834_v57  ;;  %v5835_v43 = vunpack.i.l.bf16 %v5834_v57 }
 0x39c   : > { %v5851_v0 = vunpack.i.h.bf16 %v5849_v1  ;;  %v5850_v38 = vunpack.i.l.bf16 %v5849_v1 }
 0x39d   : > { %4656 = vmatprep.mubr.msk.bf16.mxu1 %vm1984_vm9, %v3883_v10  ;;  %v3831_v27 = vsel %vm1875_vm7, %v3799_v12, %v5835_v43  ;;  %v3832_v31 = vsel %vm1875_vm7, %v3800_v18, %v5836_v29 }
 0x39e   : > { %v5844_v16 = vpop.permute.xlu1 %5843  ;;  %v3705_v37 = vsel %vm1743_vm3, %v8445_v13, %v5850_v38  ;;  %v3706_v59 = vsel %vm1743_vm3, %v8448_v40, %v5851_v0 }
 0x39f   : > { %v5859_v50 = vpop.permute.xlu0 %5858  ;;  %v5846_v3 = vunpack.i.h.bf16 %v5844_v16  ;;  %v5845_v20 = vunpack.i.l.bf16 %v5844_v16  ;;  %v3676_v16 = vsel %vm1710_vm2, %v3644_v15, %v5751_v34 }
 0x3a0   : > { %v5861_v14 = vunpack.i.h.bf16 %v5859_v50  ;;  %v5860_v42 = vunpack.i.l.bf16 %v5859_v50 }
 0x3a1   : > { %v3863_v22 = vsel %vm1908_vm8, %v3831_v27, %v5845_v20  ;;  %v3864_v21 = vsel %vm1908_vm8, %v3832_v31, %v5846_v3 }
 0x3a2   : > { %v3884_v7 = vpack.c.bf16 %v3864_v21, %v3863_v22  ;;  %v5854_v45 = vpop.permute.xlu1 %5853  ;;  %v3737_v33 = vsel %vm1776_vm4, %v3705_v37, %v5860_v42  ;;  %v3738_v41 = vsel %vm1776_vm4, %v3706_v59, %v5861_v14 }
 0x3a3   : > { %v5869_v2 = vpop.permute.xlu0 %5868  ;;  %v5856_v56 = vunpack.i.h.bf16 %v5854_v45  ;;  %v5855_v39 = vunpack.i.l.bf16 %v5854_v45 }
 0x3a4   : > { %4657 = vmatmul.mubr.msk.bf16.gmra.mrb[20].mxu1 %vm1984_vm9, %v3884_v7  ;;  %v5871_v61 = vunpack.i.h.bf16 %v5869_v2  ;;  %v5870_v63 = vunpack.i.l.bf16 %v5869_v2 }
 0x3a5   : > { %v3707_v3 = vsel %vm1743_vm3, %v3675_v11, %v5855_v39  ;;  %v3708_v20 = vsel %vm1743_vm3, %v3676_v16, %v5856_v56 }
 0x3a6   : > { %v5864_v62 = vpop.permute.xlu1 %5863  ;;  %v3769_v51 = vsel %vm1809_vm5, %v3737_v33, %v5870_v63  ;;  %v3770_v53 = vsel %vm1809_vm5, %v3738_v41, %v5871_v61 }
 0x3a7   : > { %v5879_v8 = vpop.permute.xlu0 %5878  ;;  %v5866_v30 = vunpack.i.h.bf16 %v5864_v62  ;;  %v5865_v17 = vunpack.i.l.bf16 %v5864_v62 }
 0x3a8   : > { %v5881_v32 = vunpack.i.h.bf16 %v5879_v8  ;;  %v5880_v49 = vunpack.i.l.bf16 %v5879_v8 }
 0x3a9   : > { %v3739_v31 = vsel %vm1776_vm4, %v3707_v3, %v5865_v17  ;;  %v3740_v54 = vsel %vm1776_vm4, %v3708_v20, %v5866_v30 }
 0x3aa   : > { %v5874_v44 = vpop.permute.xlu1 %5873  ;;  %v3801_v13 = vsel %vm1842_vm6, %v3769_v51, %v5880_v49  ;;  %v3802_v1 = vsel %vm1842_vm6, %v3770_v53, %v5881_v32 }
 0x3ab   : > { %v5889_v26 = vpop.permute.xlu0 %5888  ;;  %v5876_v24 = vunpack.i.h.bf16 %v5874_v44  ;;  %v5875_v50 = vunpack.i.l.bf16 %v5874_v44 }
 0x3ac   : > { %v5891_v52 = vunpack.i.h.bf16 %v5889_v26  ;;  %v5890_v9 = vunpack.i.l.bf16 %v5889_v26 }
 0x3ad   : > { %v3771_v21 = vsel %vm1809_vm5, %v3739_v31, %v5875_v50  ;;  %v3772_v2 = vsel %vm1809_vm5, %v3740_v54, %v5876_v24 }
 0x3ae   : > { %v5884_v4 = vpop.permute.xlu1 %5883  ;;  %v3833_v57 = vsel %vm1875_vm7, %v3801_v13, %v5890_v9  ;;  %v3834_v60 = vsel %vm1875_vm7, %v3802_v1, %v5891_v52 }
 0x3af   : > { %v5899_v10 = vpop.permute.xlu0 %5898  ;;  %v5886_v12 = vunpack.i.h.bf16 %v5884_v4  ;;  %v5885_v18 = vunpack.i.l.bf16 %v5884_v4 }
 0x3b0   : > { %v5901_v40 = vunpack.i.h.bf16 %v5899_v10  ;;  %v5900_v35 = vunpack.i.l.bf16 %v5899_v10 }
 0x3b1   : > { %v3803_v45 = vsel %vm1842_vm6, %v3771_v21, %v5885_v18  ;;  %v3804_v8 = vsel %vm1842_vm6, %v3772_v2, %v5886_v12 }
 0x3b2   : > { %v3865_v6 = vsel %vm1908_vm8, %v3833_v57, %v5900_v35  ;;  %v3866_v55 = vsel %vm1908_vm8, %v3834_v60, %v5901_v40  ;;  %v5894_v46 = vpop.permute.xlu1 %5893 }
 0x3b3   : > { %v3885_v29 = vpack.c.bf16 %v3866_v55, %v3865_v6  ;;  %v5909_v43 = vpop.permute.xlu0 %5908  ;;  %v5896_v27 = vunpack.i.h.bf16 %v5894_v46  ;;  %v5895_v5 = vunpack.i.l.bf16 %v5894_v46 }
 0x3b4   : > { %v5911_v37 = vunpack.i.h.bf16 %v5909_v43  ;;  %v5910_v59 = vunpack.i.l.bf16 %v5909_v43 }
 0x3b5   : > { %4660 = vmatprep.mubr.msk.bf16.mxu1 %vm1984_vm9, %v3885_v29  ;;  %v3835_v38 = vsel %vm1875_vm7, %v3803_v45, %v5895_v5  ;;  %v3836_v14 = vsel %vm1875_vm7, %v3804_v8, %v5896_v27 }
 0x3b6   : > { %v5904_v7 = vpop.permute.xlu1 %5903  ;;  %v3709_v10 = vsel %vm1743_vm3, %v8481_v28, %v5910_v59  ;;  %v3710_v13 = vsel %vm1743_vm3, %v8484_v36, %v5911_v37 }
 0x3b7   : > { %v5919_v22 = vpop.permute.xlu0 %5918  ;;  %v5906_v62 = vunpack.i.h.bf16 %v5904_v7  ;;  %v5905_v0 = vunpack.i.l.bf16 %v5904_v7 }
 0x3b8   : > { %v5921_v52 = vunpack.i.h.bf16 %v5919_v22  ;;  %v5920_v9 = vunpack.i.l.bf16 %v5919_v22 }
 0x3b9   : > { %v3867_v42 = vsel %vm1908_vm8, %v3835_v38, %v5905_v0  ;;  %v3868_v61 = vsel %vm1908_vm8, %v3836_v14, %v5906_v62  ;;  %v4539_v14 = vld [vmem:[%s6204_s24 + $0x8] sm:$0xff]  }
 0x3ba   : > { %v3886_v26 = vpack.c.bf16 %v3868_v61, %v3867_v42  ;;  %v5914_v32 = vpop.permute.xlu1 %5913  ;;  %v3741_v35 = vsel %vm1776_vm4, %v3709_v10, %v5920_v9  ;;  %v3742_v4 = vsel %vm1776_vm4, %v3710_v13, %v5921_v52  ;;  %v4461_v42 = vld [vmem:[%s6204_s24] sm:$0xff]   ;;  %v4467_v37 = vunpack.c.h.bf16 %v4539_v14 }
 0x3bb   : > { %v5929_v63 = vpop.permute.xlu0 %5928  ;;  %v5916_v30 = vunpack.i.h.bf16 %v5914_v32  ;;  %v5915_v17 = vunpack.i.l.bf16 %v5914_v32  ;;  %v8664_v61 = vld [vmem:[%s8789_s4] ss:$0 sm:$0xff]  ;;  %v4462_v32 = vunpack.c.l.bf16 %v4461_v42  ;;  %v4463_v9 = vunpack.c.h.bf16 %v4461_v42 }
 0x3bc   : > { %4661 = vmatmul.mubr.msk.bf16.gmra.mrb[24].mxu1 %vm1984_vm9, %v3886_v26  ;;  %v5931_v33 = vunpack.i.h.bf16 %v5929_v63  ;;  %v5930_v41 = vunpack.i.l.bf16 %v5929_v63  ;;  %v4466_v63 = vunpack.c.l.bf16 %v4539_v14 }
 0x3bd   : > { %v3711_v18 = vsel %vm1743_vm3, %v8514_v58, %v5915_v17  ;;  %v3712_v3 = vsel %vm1743_vm3, %v8517_v25, %v5916_v30 }
 0x3be   : > { %v5924_v44 = vpop.permute.xlu1 %5923  ;;  %v3773_v34 = vsel %vm1809_vm5, %v3741_v35, %v5930_v41  ;;  %v3774_v19 = vsel %vm1809_vm5, %v3742_v4, %v5931_v33  ;;  %v4541_v4 = vld [vmem:[%s6204_s24 + $0x18] sm:$0xff]  }
 0x3bf   : > { %v5939_v49 = vpop.permute.xlu0 %5938  ;;  %v5926_v15 = vunpack.i.h.bf16 %v5924_v44  ;;  %v5925_v23 = vunpack.i.l.bf16 %v5924_v44 }
 0x3c0   : > { %v5941_v47 = vunpack.i.h.bf16 %v5939_v49  ;;  %v5940_v51 = vunpack.i.l.bf16 %v5939_v49 }
 0x3c1   : > { %v3743_v5 = vsel %vm1776_vm4, %v3711_v18, %v5925_v23  ;;  %v3744_v31 = vsel %vm1776_vm4, %v3712_v3, %v5926_v15  ;;  %v4542_v18 = vld [vmem:[%s6204_s24 + $0x20] sm:$0xff]  }
 0x3c2   : > { %v5934_v53 = vpop.permute.xlu1 %5933  ;;  %v3805_v60 = vsel %vm1842_vm6, %v3773_v34, %v5940_v51  ;;  %v3806_v56 = vsel %vm1842_vm6, %v3774_v19, %v5941_v47  ;;  %v4540_v34 = vld [vmem:[%s6204_s24 + $0x10] sm:$0xff]   ;;  %v4474_v19 = vunpack.c.l.bf16 %v4541_v4 }
 0x3c3   : > { %v5949_v48 = vpop.permute.xlu0 %5948  ;;  %v5936_v50 = vunpack.i.h.bf16 %v5934_v53  ;;  %v5935_v46 = vunpack.i.l.bf16 %v5934_v53 }
 0x3c4   : > { %v5951_v1 = vunpack.i.h.bf16 %v5949_v48  ;;  %v5950_v40 = vunpack.i.l.bf16 %v5949_v48 }
 0x3c5   : > { %v3775_v54 = vsel %vm1809_vm5, %v3743_v5, %v5935_v46  ;;  %v3776_v22 = vsel %vm1809_vm5, %v3744_v31, %v5936_v50 }
 0x3c6   : > { %v5944_v6 = vpop.permute.xlu1 %5943  ;;  %v3837_v36 = vsel %vm1875_vm7, %v3805_v60, %v5950_v40  ;;  %v3838_v55 = vsel %vm1875_vm7, %v3806_v56, %v5951_v1  ;;  %v4470_v60 = vunpack.c.l.bf16 %v4540_v34 }
 0x3c7   : > { %v5959_v57 = vpop.permute.xlu0 %5958  ;;  %v5946_v16 = vunpack.i.h.bf16 %v5944_v6  ;;  %v5945_v12 = vunpack.i.l.bf16 %v5944_v6 }
 0x3c8   : > { %v5961_v39 = vunpack.i.h.bf16 %v5959_v57  ;;  %v5960_v28 = vunpack.i.l.bf16 %v5959_v57 }
 0x3c9   : > { %v3807_v2 = vsel %vm1842_vm6, %v3775_v54, %v5945_v12  ;;  %v3808_v58 = vsel %vm1842_vm6, %v3776_v22, %v5946_v16  ;;  %v4543_v12 = vld [vmem:[%s6204_s24 + $0x28] sm:$0xff]  }
 0x3ca   : > { %v3869_v29 = vsel %vm1908_vm8, %v3837_v36, %v5960_v28  ;;  %v3870_v43 = vsel %vm1908_vm8, %v3838_v55, %v5961_v39  ;;  %v5954_v11 = vpop.permute.xlu1 %5953  ;;  %v4475_v28 = vunpack.c.h.bf16 %v4541_v4  ;;  %v4471_v55 = vunpack.c.h.bf16 %v4540_v34 }
 0x3cb   : > { %v3887_v24 = vpack.c.bf16 %v3870_v43, %v3869_v29  ;;  %v5956_v20 = vunpack.i.h.bf16 %v5954_v11  ;;  %v5955_v27 = vunpack.i.l.bf16 %v5954_v11  ;;  %v4482_v3 = vunpack.c.l.bf16 %v4543_v12 }
 0x3cc   : > { %v4483_v54 = vunpack.c.h.bf16 %v4543_v12 }
 0x3cd   : > { %4664 = vmatprep.mubr.msk.bf16.mxu1 %vm1984_vm9, %v3887_v24  ;;  %v3839_v45 = vsel %vm1875_vm7, %v3807_v2, %v5955_v27  ;;  %v3840_v8 = vsel %vm1875_vm7, %v3808_v58, %v5956_v20  ;;  %v4478_v27 = vunpack.c.l.bf16 %v4542_v18  ;;  %v4479_v2 = vunpack.c.h.bf16 %v4542_v18 }
 0x3ce   : > { %v5964_v21 = vpop.permute.xlu1 %5963 }
 0x3cf   : > { %v5966_v7 = vunpack.i.h.bf16 %v5964_v21  ;;  %v5965_v25 = vunpack.i.l.bf16 %v5964_v21 }
 0x3d1   : > { %v3871_v62 = vsel %vm1908_vm8, %v3839_v45, %v5965_v25  ;;  %v3872_v0 = vsel %vm1908_vm8, %v3840_v8, %v5966_v7 }
 0x3d2   : > { %v3888_v38 = vpack.c.bf16 %v3872_v0, %v3871_v62 }
 0x3d4   : > { %4665 = vmatmul.mubr.msk.bf16.gmra.mrb[28].mxu1 %vm1984_vm9, %v3888_v38 }
 0x3dc   : > { %v4638_v26 = vpop.f32.mrb[0].mxu1 }
 0x3dd   : > { %v4010_v49 = vadd.f32 %v4638_v26, %v8664_v61  ;;  %v4001_v44 = vpop.f32.mrb[1].mxu1  ;;  %v4545_v26 = vld [vmem:[%s6204_s24 + $0x38] sm:$0xff]  }
 0x3de   : > { %v4002_v59 = vadd.f32 %v8664_v61, %v4001_v44  ;;  %v4639_v52 = vpop.f32.mrb[2].mxu1 }
 0x3df   : > { %v4194_v33 = vadd.f32 %v4466_v63, %v4010_v49  ;;  %v4013_v41 = vadd.f32 %v4639_v52, %v8664_v61  ;;  %v4004_v48 = vpop.f32.mrb[3].mxu1  ;;  %v4490_v49 = vunpack.c.l.bf16 %v4545_v26 }
 0x3e0   : > { %v4192_v47 = vadd.f32 %v4462_v32, %v4002_v59  ;;  %v4005_v51 = vadd.f32 %v8664_v61, %v4004_v48  ;;  %v4544_v32 = vld [vmem:[%s6204_s24 + $0x30] sm:$0xff]  }
 0x3e1   : > { %v4226_v53 = vmax.f32 %v4194_v33, 0.0  ;;  %v4195_v10 = vadd.f32 %v4467_v37, %v4013_v41  ;;  %v4486_v37 = vunpack.c.l.bf16 %v4544_v32  ;;  %v4487_v48 = vunpack.c.h.bf16 %v4544_v32 }
 0x3e2   : > { %v4224_v13 = vmax.f32 %v4192_v47, 0.0  ;;  %v4193_v1 = vadd.f32 %v4463_v9, %v4005_v51  ;;  %v4491_v9 = vunpack.c.h.bf16 %v4545_v26 }
 0x3e3   : > { %4258 = vst.msk [vmem:[%s8673_s30 + $0x10] sm:$0xff] %vm226_vm0, %v4226_v53  ;;  %v4227_v40 = vmax.f32 %v4195_v10, 0.0 }
 0x3e4   : > { %4256 = vst.msk [vmem:[%s8673_s30] sm:$0xff] %vm226_vm0, %v4224_v13  ;;  %v4225_v35 = vmax.f32 %v4193_v1, 0.0 }
 0x3e5   : > { %4259 = vst.msk [vmem:[%s8673_s30 + $0x18] sm:$0xff] %vm226_vm0, %v4227_v40 }
 0x3e6   : > { %4257 = vst.msk [vmem:[%s8673_s30 + $0x8] sm:$0xff] %vm226_vm0, %v4225_v35 }
 0x3fc   : > { %v4642_v57 = vpop.f32.mrb[4].mxu1 }
 0x3fd   : > { %v4026_v56 = vadd.f32 %v4642_v57, %v8664_v61  ;;  %v4017_v39 = vpop.f32.mrb[5].mxu1  ;;  %v4547_v57 = vld [vmem:[%s6204_s24 + $0x48] sm:$0xff]  }
 0x3fe   : > { %v4018_v6 = vadd.f32 %v8664_v61, %v4017_v39  ;;  %v4643_v36 = vpop.f32.mrb[6].mxu1 }
 0x3ff   : > { %v4198_v30 = vadd.f32 %v4474_v19, %v4026_v56  ;;  %v4029_v17 = vadd.f32 %v4643_v36, %v8664_v61  ;;  %v4020_v29 = vpop.f32.mrb[7].mxu1  ;;  %v4498_v56 = vunpack.c.l.bf16 %v4547_v57 }
 0x400   : > { %v4196_v43 = vadd.f32 %v4470_v60, %v4018_v6  ;;  %v4021_v15 = vadd.f32 %v8664_v61, %v4020_v29  ;;  %v4546_v60 = vld [vmem:[%s6204_s24 + $0x40] sm:$0xff]  }
 0x401   : > { %v4230_v23 = vmax.f32 %v4198_v30, 0.0  ;;  %v4199_v24 = vadd.f32 %v4475_v28, %v4029_v17  ;;  %v4494_v28 = vunpack.c.l.bf16 %v4546_v60  ;;  %v4495_v29 = vunpack.c.h.bf16 %v4546_v60 }
 0x402   : > { %v4228_v50 = vmax.f32 %v4196_v43, 0.0  ;;  %v4197_v46 = vadd.f32 %v4471_v55, %v4021_v15  ;;  %v4499_v55 = vunpack.c.h.bf16 %v4547_v57 }
 0x403   : > { %4262 = vst.msk [vmem:[%s8673_s30 + $0x30] sm:$0xff] %vm226_vm0, %v4230_v23  ;;  %v4231_v11 = vmax.f32 %v4199_v24, 0.0 }
 0x404   : > { %4260 = vst.msk [vmem:[%s8673_s30 + $0x20] sm:$0xff] %vm226_vm0, %v4228_v50  ;;  %v4229_v16 = vmax.f32 %v4197_v46, 0.0 }
 0x405   : > { %4263 = vst.msk [vmem:[%s8673_s30 + $0x38] sm:$0xff] %vm226_vm0, %v4231_v11 }
 0x406   : > { %4261 = vst.msk [vmem:[%s8673_s30 + $0x28] sm:$0xff] %vm226_vm0, %v4229_v16 }
 0x41c   : > { %v4646_v20 = vpop.f32.mrb[8].mxu1 }
 0x41d   : > { %v4042_v5 = vadd.f32 %v4646_v20, %v8664_v61  ;;  %v4033_v31 = vpop.f32.mrb[9].mxu1  ;;  %v4549_v20 = vld [vmem:[%s6204_s24 + $0x58] sm:$0xff]  }
 0x41e   : > { %v4034_v22 = vadd.f32 %v8664_v61, %v4033_v31  ;;  %v4647_v21 = vpop.f32.mrb[10].mxu1 }
 0x41f   : > { %v4202_v58 = vadd.f32 %v4482_v3, %v4042_v5  ;;  %v4045_v7 = vadd.f32 %v4647_v21, %v8664_v61  ;;  %v4036_v25 = vpop.f32.mrb[11].mxu1  ;;  %v4506_v5 = vunpack.c.l.bf16 %v4549_v20 }
 0x420   : > { %v4200_v45 = vadd.f32 %v4478_v27, %v4034_v22  ;;  %v4037_v8 = vadd.f32 %v8664_v61, %v4036_v25  ;;  %v4548_v27 = vld [vmem:[%s6204_s24 + $0x50] sm:$0xff]  }
 0x421   : > { %v4234_v62 = vmax.f32 %v4202_v58, 0.0  ;;  %v4203_v0 = vadd.f32 %v4483_v54, %v4045_v7  ;;  %v4502_v54 = vunpack.c.l.bf16 %v4548_v27  ;;  %v4503_v25 = vunpack.c.h.bf16 %v4548_v27 }
 0x422   : > { %v4232_v38 = vmax.f32 %v4200_v45, 0.0  ;;  %v4201_v14 = vadd.f32 %v4479_v2, %v4037_v8  ;;  %v4507_v2 = vunpack.c.h.bf16 %v4549_v20 }
 0x423   : > { %4266 = vst.msk [vmem:[%s8673_s30 + $0x50] sm:$0xff] %vm226_vm0, %v4234_v62  ;;  %v4235_v42 = vmax.f32 %v4203_v0, 0.0 }
 0x424   : > { %4264 = vst.msk [vmem:[%s8673_s30 + $0x40] sm:$0xff] %vm226_vm0, %v4232_v38  ;;  %v4233_v63 = vmax.f32 %v4201_v14, 0.0 }
 0x425   : > { %4267 = vst.msk [vmem:[%s8673_s30 + $0x58] sm:$0xff] %vm226_vm0, %v4235_v42 }
 0x426   : > { %4265 = vst.msk [vmem:[%s8673_s30 + $0x48] sm:$0xff] %vm226_vm0, %v4233_v63 }
 0x448   : > { %v4650_v44 = vpop.f32.mrb[12].mxu1 }
 0x449   : > { %v4058_v59 = vadd.f32 %v4650_v44, %v8664_v61  ;;  %v4049_v52 = vpop.f32.mrb[13].mxu1  ;;  %v4551_v44 = vld [vmem:[%s6204_s24 + $0x68] sm:$0xff]  }
 0x44a   : > { %v4050_v33 = vadd.f32 %v8664_v61, %v4049_v52  ;;  %v4651_v41 = vpop.f32.mrb[14].mxu1 }
 0x44b   : > { %v4206_v47 = vadd.f32 %v4490_v49, %v4058_v59  ;;  %v4061_v51 = vadd.f32 %v4651_v41, %v8664_v61  ;;  %v4052_v53 = vpop.f32.mrb[15].mxu1  ;;  %v4514_v59 = vunpack.c.l.bf16 %v4551_v44 }
 0x44c   : > { %v4204_v10 = vadd.f32 %v4486_v37, %v4050_v33  ;;  %v4053_v13 = vadd.f32 %v8664_v61, %v4052_v53  ;;  %v4550_v37 = vld [vmem:[%s6204_s24 + $0x60] sm:$0xff]  }
 0x44d   : > { %v4238_v1 = vmax.f32 %v4206_v47, 0.0  ;;  %v4207_v40 = vadd.f32 %v4491_v9, %v4061_v51  ;;  %v4510_v9 = vunpack.c.l.bf16 %v4550_v37  ;;  %v4511_v53 = vunpack.c.h.bf16 %v4550_v37 }
 0x44e   : > { %v4236_v35 = vmax.f32 %v4204_v10, 0.0  ;;  %v4205_v4 = vadd.f32 %v4487_v48, %v4053_v13  ;;  %v4515_v48 = vunpack.c.h.bf16 %v4551_v44 }
 0x44f   : > { %4270 = vst.msk [vmem:[%s8673_s30 + $0x70] sm:$0xff] %vm226_vm0, %v4238_v1  ;;  %v4239_v34 = vmax.f32 %v4207_v40, 0.0 }
 0x450   : > { %4268 = vst.msk [vmem:[%s8673_s30 + $0x60] sm:$0xff] %vm226_vm0, %v4236_v35  ;;  %v4237_v19 = vmax.f32 %v4205_v4, 0.0 }
 0x451   : > { %4271 = vst.msk [vmem:[%s8673_s30 + $0x78] sm:$0xff] %vm226_vm0, %v4239_v34 }
 0x452   : > { %4269 = vst.msk [vmem:[%s8673_s30 + $0x68] sm:$0xff] %vm226_vm0, %v4237_v19 }
 0x460   : > { %v4654_v39 = vpop.f32.mrb[16].mxu1 }
 0x461   : > { %v4074_v6 = vadd.f32 %v4654_v39, %v8664_v61  ;;  %v4065_v36 = vpop.f32.mrb[17].mxu1  ;;  %v4553_v39 = vld [vmem:[%s6204_s24 + $0x78] sm:$0xff]  }
 0x462   : > { %v4066_v30 = vadd.f32 %v8664_v61, %v4065_v36  ;;  %v4655_v17 = vpop.f32.mrb[18].mxu1 }
 0x463   : > { %v4210_v43 = vadd.f32 %v4498_v56, %v4074_v6  ;;  %v4077_v15 = vadd.f32 %v4655_v17, %v8664_v61  ;;  %v4068_v23 = vpop.f32.mrb[19].mxu1  ;;  %v4522_v6 = vunpack.c.l.bf16 %v4553_v39 }
 0x464   : > { %v4208_v24 = vadd.f32 %v4494_v28, %v4066_v30  ;;  %v4069_v50 = vadd.f32 %v8664_v61, %v4068_v23  ;;  %v4552_v28 = vld [vmem:[%s6204_s24 + $0x70] sm:$0xff]  }
 0x465   : > { %v4242_v46 = vmax.f32 %v4210_v43, 0.0  ;;  %v4211_v11 = vadd.f32 %v4499_v55, %v4077_v15  ;;  %v4518_v55 = vunpack.c.l.bf16 %v4552_v28  ;;  %v4519_v23 = vunpack.c.h.bf16 %v4552_v28 }
 0x466   : > { %v4240_v16 = vmax.f32 %v4208_v24, 0.0  ;;  %v4209_v12 = vadd.f32 %v4495_v29, %v4069_v50  ;;  %v4523_v29 = vunpack.c.h.bf16 %v4553_v39 }
 0x467   : > { %4274 = vst.msk [vmem:[%s8673_s30 + $0x90] sm:$0xff] %vm226_vm0, %v4242_v46  ;;  %v4243_v18 = vmax.f32 %v4211_v11, 0.0 }
 0x468   : > { %4272 = vst.msk [vmem:[%s8673_s30 + $0x80] sm:$0xff] %vm226_vm0, %v4240_v16  ;;  %v4241_v3 = vmax.f32 %v4209_v12, 0.0 }
 0x469   : > { %4275 = vst.msk [vmem:[%s8673_s30 + $0x98] sm:$0xff] %vm226_vm0, %v4243_v18 }
 0x46a   : > { %4273 = vst.msk [vmem:[%s8673_s30 + $0x88] sm:$0xff] %vm226_vm0, %v4241_v3 }
 0x477   : > { %v4658_v31 = vpop.f32.mrb[20].mxu1 }
 0x478   : > { %v4090_v22 = vadd.f32 %v4658_v31, %v8664_v61  ;;  %v4081_v21 = vpop.f32.mrb[21].mxu1 }
 0x479   : > { %v4082_v58 = vadd.f32 %v8664_v61, %v4081_v21  ;;  %v4659_v7 = vpop.f32.mrb[22].mxu1 }
 0x47a   : > { %v4214_v45 = vadd.f32 %v4506_v5, %v4090_v22  ;;  %v4093_v8 = vadd.f32 %v4659_v7, %v8664_v61  ;;  %v4084_v62 = vpop.f32.mrb[23].mxu1 }
 0x47b   : > { %v4212_v0 = vadd.f32 %v4502_v54, %v4082_v58  ;;  %v4085_v38 = vadd.f32 %v8664_v61, %v4084_v62 }
 0x47c   : > { %v4246_v14 = vmax.f32 %v4214_v45, 0.0  ;;  %v4215_v42 = vadd.f32 %v4507_v2, %v4093_v8 }
 0x47d   : > { %v4244_v63 = vmax.f32 %v4212_v0, 0.0  ;;  %v4213_v26 = vadd.f32 %v4503_v25, %v4085_v38 }
 0x47e   : > { %4278 = vst.msk [vmem:[%s8673_s30 + $0xb0] sm:$0xff] %vm226_vm0, %v4246_v14  ;;  %v4247_v32 = vmax.f32 %v4215_v42, 0.0 }
 0x47f   : > { %4276 = vst.msk [vmem:[%s8673_s30 + $0xa0] sm:$0xff] %vm226_vm0, %v4244_v63  ;;  %v4245_v49 = vmax.f32 %v4213_v26, 0.0 }
 0x480   : > { %4279 = vst.msk [vmem:[%s8673_s30 + $0xb8] sm:$0xff] %vm226_vm0, %v4247_v32 }
 0x481   : > { %4277 = vst.msk [vmem:[%s8673_s30 + $0xa8] sm:$0xff] %vm226_vm0, %v4245_v49 }
 0x48f   : > { %v4662_v52 = vpop.f32.mrb[24].mxu1 }
 0x490   : > { %v4106_v33 = vadd.f32 %v4662_v52, %v8664_v61  ;;  %v4097_v41 = vpop.f32.mrb[25].mxu1 }
 0x491   : > { %v4098_v47 = vadd.f32 %v8664_v61, %v4097_v41  ;;  %v4663_v51 = vpop.f32.mrb[26].mxu1 }
 0x492   : > { %v4218_v10 = vadd.f32 %v4514_v59, %v4106_v33  ;;  %v4109_v13 = vadd.f32 %v4663_v51, %v8664_v61  ;;  %v4100_v1 = vpop.f32.mrb[27].mxu1 }
 0x493   : > { %v4216_v40 = vadd.f32 %v4510_v9, %v4098_v47  ;;  %v4101_v35 = vadd.f32 %v8664_v61, %v4100_v1 }
 0x494   : > { %v4250_v4 = vmax.f32 %v4218_v10, 0.0  ;;  %v4219_v34 = vadd.f32 %v4515_v48, %v4109_v13 }
 0x495   : > { %v4248_v19 = vmax.f32 %v4216_v40, 0.0  ;;  %v4217_v57 = vadd.f32 %v4511_v53, %v4101_v35 }
 0x496   : > { %4282 = vst.msk [vmem:[%s8673_s30 + $0xd0] sm:$0xff] %vm226_vm0, %v4250_v4  ;;  %v4251_v60 = vmax.f32 %v4219_v34, 0.0 }
 0x497   : > { %4280 = vst.msk [vmem:[%s8673_s30 + $0xc0] sm:$0xff] %vm226_vm0, %v4248_v19  ;;  %v4249_v56 = vmax.f32 %v4217_v57, 0.0 }
 0x498   : > { %4283 = vst.msk [vmem:[%s8673_s30 + $0xd8] sm:$0xff] %vm226_vm0, %v4251_v60 }
 0x499   : > { %4281 = vst.msk [vmem:[%s8673_s30 + $0xc8] sm:$0xff] %vm226_vm0, %v4249_v56 }
 0x4a7   : > { %v4666_v36 = vpop.f32.mrb[28].mxu1 }
 0x4a8   : > { %v4122_v30 = vadd.f32 %v4666_v36, %v8664_v61  ;;  %v4113_v17 = vpop.f32.mrb[29].mxu1 }
 0x4a9   : > { %v4114_v43 = vadd.f32 %v8664_v61, %v4113_v17  ;;  %v4667_v15 = vpop.f32.mrb[30].mxu1 }
 0x4aa   : > { %v4222_v24 = vadd.f32 %v4522_v6, %v4122_v30  ;;  %v4125_v50 = vadd.f32 %v4667_v15, %v8664_v61  ;;  %v4116_v46 = vpop.f32.mrb[31].mxu1 }
 0x4ab   : > { %v4220_v11 = vadd.f32 %v4518_v55, %v4114_v43  ;;  %v4117_v16 = vadd.f32 %v8664_v61, %v4116_v46 }
 0x4ac   : > { %v4254_v12 = vmax.f32 %v4222_v24, 0.0  ;;  %v4223_v18 = vadd.f32 %v4523_v29, %v4125_v50 }
 0x4ad   : > { %v4252_v3 = vmax.f32 %v4220_v11, 0.0  ;;  %v4221_v20 = vadd.f32 %v4519_v23, %v4117_v16 }
 0x4ae   : > { %4286 = vst.msk [vmem:[%s8673_s30 + $0xf0] sm:$0xff] %vm226_vm0, %v4254_v12  ;;  %v4255_v27 = vmax.f32 %v4223_v18, 0.0 }
 0x4af   : > { %4284 = vst.msk [vmem:[%s8673_s30 + $0xe0] sm:$0xff] %vm226_vm0, %v4252_v3  ;;  %v4253_v5 = vmax.f32 %v4221_v20, 0.0 }
 0x4b0   : > { %4287 = vst.msk [vmem:[%s8673_s30 + $0xf8] sm:$0xff] %vm226_vm0, %v4255_v27 }
 0x4b1   : > { %4285 = vst.msk [vmem:[%s8673_s30 + $0xe8] sm:$0xff] %vm226_vm0, %v4253_v5 }
 0x4b2 PF: > { %s15_s18 = sadd.s32 1, %s5979_s18  }
 0x4b3   : > { %p12_p4 = scmp.ge.s32.totalorder %s15_s18, 4  }
 0x4b5   :  { %14 = sbr.rel (!%p12_p4) target bundleno = 1 (0x1), region = 76 }

</bundles_post_ra>
